<compile_context>
chip_gen: v5e
topology: v5e:2x2
jax: 0.10.0
libtpu: 0.0.40
codegen_flags: <defaults>
</compile_context>

<pallas_src>
import jax
import jax.numpy as jnp
from jax.experimental import pallas as pl
from jax.experimental.pallas import tpu as pltpu

# ---------------- hyper-parameters (small, consistent with the module) -------
FEATURES   = 4
SEQ_LEN    = 16
HIDDEN     = 32
KSIZE      = 3
OUT_SIZE   = 5
NUM_LAYERS = 1
PADDING    = 15
BN_EPS     = 1e-5

L_PAD = SEQ_LEN + 2 * PADDING        # 46
L_OUT = L_PAD - KSIZE + 1            # 44  == lstm_size in the PyTorch module


# ---------------- fused kernel: Conv1d(+BN folded)+ReLU -> LSTM -> Linear ----
def fused_kernel(xs_ref, wc_ref, bc_ref, wih_ref, bl_ref, whh_ref, w2_ref, b2_ref,
                 o_ref, gates_scr):
    # xs_ref  : (B, K*C, L_OUT)  im2col-stacked, padded conv input
    # wc_ref  : (H, K*C)         conv weight with BN scale folded in
    # bc_ref  : (H, 1)           conv bias with BN shift folded in
    # wih_ref : (L_OUT, 4H)      LSTM input weights (transposed)
    # bl_ref  : (1, 4H)          b_ih + b_hh
    # whh_ref : (H, 4H)          LSTM recurrent weights (transposed)
    # w2_ref  : (H, OUT)         final linear weight (transposed)
    # b2_ref  : (1, OUT)
    # o_ref   : (B, OUT)
    # gates_scr : (B*T, 4H) VMEM scratch holding the hoisted input projection
    B = xs_ref.shape[0]
    H = HIDDEN
    T = HIDDEN                                  # LSTM sequence length == conv out channels

    # ---- conv1d + folded BatchNorm + ReLU: one small matmul per batch elem ----
    wc = wc_ref[...]                            # (H, K*C)
    bc = bc_ref[...]                            # (H, 1)
    rows = []
    for b in range(B):                          # static python loop, B is tiny
        cb = jnp.dot(wc, xs_ref[b], preferred_element_type=jnp.float32) + bc
        rows.append(jnp.maximum(cb, 0.0))       # (T, L_OUT)
    conv_all = jnp.concatenate(rows, axis=0)    # (B*T, L_OUT), row index = b*T + t

    # ---- hoisted LSTM input projection (single matmul, outside the loop) -----
    gates_scr[...] = (jnp.dot(conv_all, wih_ref[...],
                              preferred_element_type=jnp.float32)
                      + bl_ref[...])            # (B*T, 4H)

    # ---- recurrence: h, c live in vregs as loop carries -----------------------
    whh = whh_ref[...]                          # (H, 4H), loaded once

    def step(t, carry):
        h, c = carry
        parts = [gates_scr[pl.ds(b * T + t, 1), :] for b in range(B)]
        g = jnp.concatenate(parts, axis=0)      # (B, 4H) precomputed x-contribution
        g = g + jnp.dot(h, whh, preferred_element_type=jnp.float32)
        i_g = jax.nn.sigmoid(g[:, 0:H])
        f_g = jax.nn.sigmoid(g[:, H:2 * H])
        g_g = jnp.tanh(g[:, 2 * H:3 * H])
        o_g = jax.nn.sigmoid(g[:, 3 * H:4 * H])
        c_new = f_g * c + i_g * g_g
        h_new = o_g * jnp.tanh(c_new)
        return (h_new, c_new)

    h0 = jnp.zeros((B, H), jnp.float32)
    c0 = jnp.zeros((B, H), jnp.float32)
    h_final, _ = jax.lax.fori_loop(0, T, step, (h0, c0), unroll=True)

    # h_n.permute(1,0,2).reshape(B,-1) == final h for num_layers == 1.
    # TODO(synk): dropout is identity in eval/inference mode.
    o_ref[...] = (jnp.dot(h_final, w2_ref[...], preferred_element_type=jnp.float32)
                  + b2_ref[...])


# ---------------- glue (tiny XLA preamble: permute + pad + im2col stack) ------
def lstm_conv1d_forward(x, p):
    # x: (batch, seq_len, features)
    B = x.shape[0]
    x_cs = jnp.transpose(x, (0, 2, 1))                              # (B, C, S)   = input.permute(0,2,1)
    x_pad = jnp.pad(x_cs, ((0, 0), (0, 0), (PADDING, PADDING)))     # (B, C, L_PAD)
    # stack the KSIZE taps (im2col), tap-major rows: index = k*C + c
    x_stack = jnp.concatenate(
        [x_pad[:, :, k:k + L_OUT] for k in range(KSIZE)], axis=1)   # (B, K*C, L_OUT)

    return pl.pallas_call(
        fused_kernel,
        out_shape=jax.ShapeDtypeStruct((B, OUT_SIZE), jnp.float32),
        scratch_shapes=[pltpu.VMEM((B * HIDDEN, 4 * HIDDEN), jnp.float32)],
    )(x_stack, p['wc_stack'], p['bc_eff_col'], p['wih_T'], p['b_lstm_row'],
      p['whh_T'], p['w2_T'], p['b2_row'])


# ---------------- deterministic parameter init --------------------------------
def init_params(key):
    ks = jax.random.split(key, 12)
    w_conv = 0.1 * jax.random.normal(ks[0], (HIDDEN, FEATURES, KSIZE), jnp.float32)
    b_conv = 0.1 * jax.random.normal(ks[1], (HIDDEN,), jnp.float32)
    bn_gamma = 1.0 + 0.1 * jax.random.normal(ks[2], (HIDDEN,), jnp.float32)
    bn_beta = 0.1 * jax.random.normal(ks[3], (HIDDEN,), jnp.float32)
    bn_mean = 0.1 * jax.random.normal(ks[4], (HIDDEN,), jnp.float32)
    bn_var = jax.random.uniform(ks[5], (HIDDEN,), jnp.float32, 0.5, 1.5)
    w_ih = 0.1 * jax.random.normal(ks[6], (4 * HIDDEN, L_OUT), jnp.float32)
    w_hh = 0.1 * jax.random.normal(ks[7], (4 * HIDDEN, HIDDEN), jnp.float32)
    b_ih = 0.1 * jax.random.normal(ks[8], (4 * HIDDEN,), jnp.float32)
    b_hh = 0.1 * jax.random.normal(ks[9], (4 * HIDDEN,), jnp.float32)
    w2 = 0.1 * jax.random.normal(ks[10], (OUT_SIZE, NUM_LAYERS * HIDDEN), jnp.float32)
    b2 = 0.1 * jax.random.normal(ks[11], (OUT_SIZE,), jnp.float32)

    p = dict(w_conv=w_conv, b_conv=b_conv, bn_gamma=bn_gamma, bn_beta=bn_beta,
             bn_mean=bn_mean, bn_var=bn_var, w_ih=w_ih, w_hh=w_hh,
             b_ih=b_ih, b_hh=b_hh, w2=w2, b2=b2)

    # ---- kernel-friendly layouts with BatchNorm folded into the conv ----------
    scale = bn_gamma / jnp.sqrt(bn_var + BN_EPS)                    # (H,)
    w_eff = w_conv * scale[:, None, None]                           # (H, C, K)
    b_eff = bn_beta + (b_conv - bn_mean) * scale                    # (H,)
    # tap-major stacking: column index = k*C + c  (matches x_stack rows)
    p['wc_stack']   = jnp.transpose(w_eff, (0, 2, 1)).reshape(HIDDEN, KSIZE * FEATURES)
    p['bc_eff_col'] = b_eff[:, None]                                # (H, 1)
    p['wih_T']      = w_ih.T                                        # (L_OUT, 4H)
    p['whh_T']      = w_hh.T                                        # (H, 4H)
    p['b_lstm_row'] = (b_ih + b_hh)[None, :]                        # (1, 4H)
    p['w2_T']       = w2.T                                          # (H, OUT)
    p['b2_row']     = b2[None, :]                                   # (1, OUT)
    return p


# ---------------- pure-JAX reference (for validation) ------------------------
def reference_forward(x, p):
    x_cs = jnp.transpose(x, (0, 2, 1))
    xp = jnp.pad(x_cs, ((0, 0), (0, 0), (PADDING, PADDING)))
    windows = jnp.stack([xp[:, :, k:k + L_OUT] for k in range(KSIZE)], axis=-1)  # (B,C,L,K)
    conv = jnp.einsum('bclk,hck->bhl', windows, p['w_conv']) + p['b_conv'][None, :, None]
    bn = ((conv - p['bn_mean'][None, :, None])
          / jnp.sqrt(p['bn_var'][None, :, None] + BN_EPS)
          * p['bn_gamma'][None, :, None] + p['bn_beta'][None, :, None])
    a = jnp.maximum(bn, 0.0)                                  # (B, H, L_OUT)
    B = x.shape[0]
    h = jnp.zeros((B, HIDDEN), jnp.float32)
    c = jnp.zeros((B, HIDDEN), jnp.float32)
    for t in range(HIDDEN):
        x_t = a[:, t, :]
        gates = x_t @ p['w_ih'].T + h @ p['w_hh'].T + p['b_ih'] + p['b_hh']
        i = jax.nn.sigmoid(gates[:, :HIDDEN])
        f = jax.nn.sigmoid(gates[:, HIDDEN:2 * HIDDEN])
        g = jnp.tanh(gates[:, 2 * HIDDEN:3 * HIDDEN])
        o = jax.nn.sigmoid(gates[:, 3 * HIDDEN:])
        c = f * c + i * g
        h = o * jnp.tanh(c)
    return h @ p['w2'].T + p['b2']


if __name__ == "__main__":
    key = jax.random.PRNGKey(0)
    k_param, k_x = jax.random.split(key)
    params = init_params(k_param)

    BATCH = 2
    x = jax.random.normal(k_x, (BATCH, SEQ_LEN, FEATURES), jnp.float32)

    out = jax.block_until_ready(lstm_conv1d_forward(x, params))
    ref = jax.block_until_ready(reference_forward(x, params))

    assert out.shape == (BATCH, OUT_SIZE)
    assert jnp.all(jnp.isfinite(out))
    assert jnp.allclose(out, ref, atol=1e-2, rtol=1e-2), (out, ref)
    print("KERNEL_OK")
</pallas_src>

<mosaic_0001>
module attributes {stable_mosaic.version = 11 : i64} {
  func.func @fused_kernel(%arg0: memref<2x12x44xf32, #tpu.memory_space<vmem>>, %arg1: memref<32x12xf32, #tpu.memory_space<vmem>>, %arg2: memref<32x1xf32, #tpu.memory_space<vmem>>, %arg3: memref<44x128xf32, #tpu.memory_space<vmem>>, %arg4: memref<1x128xf32, #tpu.memory_space<vmem>>, %arg5: memref<32x128xf32, #tpu.memory_space<vmem>>, %arg6: memref<32x5xf32, #tpu.memory_space<vmem>>, %arg7: memref<1x5xf32, #tpu.memory_space<vmem>>, %arg8: memref<2x5xf32, #tpu.memory_space<vmem>>, %arg9: memref<64x128xf32, #tpu.memory_space<vmem>>) attributes {dimension_semantics = [], scalar_prefetch = 0 : i64, scratch_operands = 1 : i64, tpu.core_type = #tpu.core_type<tc>} {
    %c0 = arith.constant 0 : index
    %c0_0 = arith.constant 0 : index
    %0 = vector.load %arg1[%c0, %c0_0] : memref<32x12xf32, #tpu.memory_space<vmem>>, vector<32x12xf32>
    %c0_1 = arith.constant 0 : index
    %c0_2 = arith.constant 0 : index
    %1 = vector.load %arg2[%c0_1, %c0_2] : memref<32x1xf32, #tpu.memory_space<vmem>>, vector<32x1xf32>
    %c0_3 = arith.constant 0 : index
    %c0_4 = arith.constant 0 : index
    %c0_5 = arith.constant 0 : index
    %2 = vector.load %arg0[%c0_3, %c0_4, %c0_5] : memref<2x12x44xf32, #tpu.memory_space<vmem>>, vector<1x12x44xf32>
    %3 = vector.shape_cast %2 : vector<1x12x44xf32> to vector<12x44xf32>
    %cst = arith.constant dense<0.000000e+00> : vector<32x44xf32>
    %4 = tpu.matmul %0, %3, %cst {dimension_numbers = #tpu.dot_dimension_numbers<[1], [0], [0], [1], [0, 0, 1, 1], [], []>} : vector<32x12xf32>, vector<12x44xf32>, vector<32x44xf32> -> vector<32x44xf32>
    %5 = vector.broadcast %1 : vector<32x1xf32> to vector<32x44xf32>
    %6 = arith.addf %4, %5 : vector<32x44xf32>
    %cst_6 = arith.constant 0.000000e+00 : f32
    %7 = vector.broadcast %cst_6 : f32 to vector<32x44xf32>
    %8 = arith.maximumf %6, %7 : vector<32x44xf32>
    %c1 = arith.constant 1 : index
    %c0_7 = arith.constant 0 : index
    %c0_8 = arith.constant 0 : index
    %9 = vector.load %arg0[%c1, %c0_7, %c0_8] : memref<2x12x44xf32, #tpu.memory_space<vmem>>, vector<1x12x44xf32>
    %10 = vector.shape_cast %9 : vector<1x12x44xf32> to vector<12x44xf32>
    %cst_9 = arith.constant dense<0.000000e+00> : vector<32x44xf32>
    %11 = tpu.matmul %0, %10, %cst_9 {dimension_numbers = #tpu.dot_dimension_numbers<[1], [0], [0], [1], [0, 0, 1, 1], [], []>} : vector<32x12xf32>, vector<12x44xf32>, vector<32x44xf32> -> vector<32x44xf32>
    %12 = vector.broadcast %1 : vector<32x1xf32> to vector<32x44xf32>
    %13 = arith.addf %11, %12 : vector<32x44xf32>
    %cst_10 = arith.constant 0.000000e+00 : f32
    %14 = vector.broadcast %cst_10 : f32 to vector<32x44xf32>
    %15 = arith.maximumf %13, %14 : vector<32x44xf32>
    %16 = tpu.concatenate %8, %15 in 0 : vector<32x44xf32>, vector<32x44xf32> -> vector<64x44xf32>
    %c0_11 = arith.constant 0 : index
    %c0_12 = arith.constant 0 : index
    %17 = vector.load %arg3[%c0_11, %c0_12] : memref<44x128xf32, #tpu.memory_space<vmem>>, vector<44x128xf32>
    %cst_13 = arith.constant dense<0.000000e+00> : vector<64x128xf32>
    %18 = tpu.matmul %16, %17, %cst_13 {dimension_numbers = #tpu.dot_dimension_numbers<[1], [0], [0], [1], [0, 0, 1, 1], [], []>} : vector<64x44xf32>, vector<44x128xf32>, vector<64x128xf32> -> vector<64x128xf32>
    %c0_14 = arith.constant 0 : index
    %c0_15 = arith.constant 0 : index
    %19 = vector.load %arg4[%c0_14, %c0_15] : memref<1x128xf32, #tpu.memory_space<vmem>>, vector<1x128xf32>
    %20 = vector.broadcast %19 : vector<1x128xf32> to vector<64x128xf32>
    %21 = arith.addf %18, %20 : vector<64x128xf32>
    %c0_16 = arith.constant 0 : index
    %c0_17 = arith.constant 0 : index
    %22 = vector.load %arg9[%c0_16, %c0_17] : memref<64x128xf32, #tpu.memory_space<vmem>>, vector<64x128xf32>
    tpu.vector_store %arg9[%c0_16, %c0_17], %21 {strides = array<i32>} : memref<64x128xf32, #tpu.memory_space<vmem>>, vector<64x128xf32>,
    %c0_18 = arith.constant 0 : index
    %c0_19 = arith.constant 0 : index
    %23 = vector.load %arg5[%c0_18, %c0_19] : memref<32x128xf32, #tpu.memory_space<vmem>>, vector<32x128xf32>
    %cst_20 = arith.constant 0.000000e+00 : f32
    %24 = vector.broadcast %cst_20 : f32 to vector<2x32xf32>
    %cst_21 = arith.constant 0.000000e+00 : f32
    %25 = vector.broadcast %cst_21 : f32 to vector<2x32xf32>
    %c0_i32 = arith.constant 0 : i32
    %c0_i32_22 = arith.constant 0 : i32
    %26 = arith.addi %c0_i32_22, %c0_i32 : i32
    %27 = arith.index_cast %26 : i32 to index
    %c0_23 = arith.constant 0 : index
    %28 = vector.load %arg9[%27, %c0_23] : memref<64x128xf32, #tpu.memory_space<vmem>>, vector<1x128xf32>
    %c32_i32 = arith.constant 32 : i32
    %29 = arith.addi %c32_i32, %c0_i32 : i32
    %30 = arith.index_cast %29 : i32 to index
    %c0_24 = arith.constant 0 : index
    %31 = vector.load %arg9[%30, %c0_24] : memref<64x128xf32, #tpu.memory_space<vmem>>, vector<1x128xf32>
    %32 = tpu.concatenate %28, %31 in 0 : vector<1x128xf32>, vector<1x128xf32> -> vector<2x128xf32>
    %cst_25 = arith.constant dense<0.000000e+00> : vector<2x128xf32>
    %33 = tpu.matmul %24, %23, %cst_25 {dimension_numbers = #tpu.dot_dimension_numbers<[1], [0], [0], [1], [0, 0, 1, 1], [], []>} : vector<2x32xf32>, vector<32x128xf32>, vector<2x128xf32> -> vector<2x128xf32>
    %34 = arith.addf %32, %33 : vector<2x128xf32>
    %35 = vector.extract_strided_slice %34 {offsets = [0, 0], sizes = [2, 32], strides = [1, 1]} : vector<2x128xf32> to vector<2x32xf32>
    %36 = arith.negf %35 : vector<2x32xf32>
    %37 = math.exp %36 : vector<2x32xf32>
    %cst_26 = arith.constant 1.000000e+00 : f32
    %38 = vector.broadcast %cst_26 : f32 to vector<2x32xf32>
    %39 = arith.addf %38, %37 : vector<2x32xf32>
    %40 = arith.divf %38, %39 : vector<2x32xf32>
    %41 = vector.extract_strided_slice %34 {offsets = [0, 32], sizes = [2, 32], strides = [1, 1]} : vector<2x128xf32> to vector<2x32xf32>
    %42 = arith.negf %41 : vector<2x32xf32>
    %43 = math.exp %42 : vector<2x32xf32>
    %cst_27 = arith.constant 1.000000e+00 : f32
    %44 = vector.broadcast %cst_27 : f32 to vector<2x32xf32>
    %45 = arith.addf %44, %43 : vector<2x32xf32>
    %46 = arith.divf %44, %45 : vector<2x32xf32>
    %47 = vector.extract_strided_slice %34 {offsets = [0, 64], sizes = [2, 32], strides = [1, 1]} : vector<2x128xf32> to vector<2x32xf32>
    %48 = math.tanh %47 : vector<2x32xf32>
    %49 = vector.extract_strided_slice %34 {offsets = [0, 96], sizes = [2, 32], strides = [1, 1]} : vector<2x128xf32> to vector<2x32xf32>
    %50 = arith.negf %49 : vector<2x32xf32>
    %51 = math.exp %50 : vector<2x32xf32>
    %cst_28 = arith.constant 1.000000e+00 : f32
    %52 = vector.broadcast %cst_28 : f32 to vector<2x32xf32>
    %53 = arith.addf %52, %51 : vector<2x32xf32>
    %54 = arith.divf %52, %53 : vector<2x32xf32>
    %55 = arith.mulf %46, %25 : vector<2x32xf32>
    %56 = arith.mulf %40, %48 : vector<2x32xf32>
    %57 = arith.addf %55, %56 : vector<2x32xf32>
    %58 = math.tanh %57 : vector<2x32xf32>
    %59 = arith.mulf %54, %58 : vector<2x32xf32>
    %c1_i32 = arith.constant 1 : i32
    %c0_i32_29 = arith.constant 0 : i32
    %60 = arith.addi %c0_i32_29, %c1_i32 : i32
    %61 = arith.index_cast %60 : i32 to index
    %c0_30 = arith.constant 0 : index
    %62 = vector.load %arg9[%61, %c0_30] : memref<64x128xf32, #tpu.memory_space<vmem>>, vector<1x128xf32>
    %c32_i32_31 = arith.constant 32 : i32
    %63 = arith.addi %c32_i32_31, %c1_i32 : i32
    %64 = arith.index_cast %63 : i32 to index
    %c0_32 = arith.constant 0 : index
    %65 = vector.load %arg9[%64, %c0_32] : memref<64x128xf32, #tpu.memory_space<vmem>>, vector<1x128xf32>
    %66 = tpu.concatenate %62, %65 in 0 : vector<1x128xf32>, vector<1x128xf32> -> vector<2x128xf32>
    %cst_33 = arith.constant dense<0.000000e+00> : vector<2x128xf32>
    %67 = tpu.matmul %59, %23, %cst_33 {dimension_numbers = #tpu.dot_dimension_numbers<[1], [0], [0], [1], [0, 0, 1, 1], [], []>} : vector<2x32xf32>, vector<32x128xf32>, vector<2x128xf32> -> vector<2x128xf32>
    %68 = arith.addf %66, %67 : vector<2x128xf32>
    %69 = vector.extract_strided_slice %68 {offsets = [0, 0], sizes = [2, 32], strides = [1, 1]} : vector<2x128xf32> to vector<2x32xf32>
    %70 = arith.negf %69 : vector<2x32xf32>
    %71 = math.exp %70 : vector<2x32xf32>
    %cst_34 = arith.constant 1.000000e+00 : f32
    %72 = vector.broadcast %cst_34 : f32 to vector<2x32xf32>
    %73 = arith.addf %72, %71 : vector<2x32xf32>
    %74 = arith.divf %72, %73 : vector<2x32xf32>
    %75 = vector.extract_strided_slice %68 {offsets = [0, 32], sizes = [2, 32], strides = [1, 1]} : vector<2x128xf32> to vector<2x32xf32>
    %76 = arith.negf %75 : vector<2x32xf32>
    %77 = math.exp %76 : vector<2x32xf32>
    %cst_35 = arith.constant 1.000000e+00 : f32
    %78 = vector.broadcast %cst_35 : f32 to vector<2x32xf32>
    %79 = arith.addf %78, %77 : vector<2x32xf32>
    %80 = arith.divf %78, %79 : vector<2x32xf32>
    %81 = vector.extract_strided_slice %68 {offsets = [0, 64], sizes = [2, 32], strides = [1, 1]} : vector<2x128xf32> to vector<2x32xf32>
    %82 = math.tanh %81 : vector<2x32xf32>
    %83 = vector.extract_strided_slice %68 {offsets = [0, 96], sizes = [2, 32], strides = [1, 1]} : vector<2x128xf32> to vector<2x32xf32>
    %84 = arith.negf %83 : vector<2x32xf32>
    %85 = math.exp %84 : vector<2x32xf32>
    %cst_36 = arith.constant 1.000000e+00 : f32
    %86 = vector.broadcast %cst_36 : f32 to vector<2x32xf32>
    %87 = arith.addf %86, %85 : vector<2x32xf32>
    %88 = arith.divf %86, %87 : vector<2x32xf32>
    %89 = arith.mulf %80, %57 : vector<2x32xf32>
    %90 = arith.mulf %74, %82 : vector<2x32xf32>
    %91 = arith.addf %89, %90 : vector<2x32xf32>
    %92 = math.tanh %91 : vector<2x32xf32>
    %93 = arith.mulf %88, %92 : vector<2x32xf32>
    %c2_i32 = arith.constant 2 : i32
    %c0_i32_37 = arith.constant 0 : i32
    %94 = arith.addi %c0_i32_37, %c2_i32 : i32
    %95 = arith.index_cast %94 : i32 to index
    %c0_38 = arith.constant 0 : index
    %96 = vector.load %arg9[%95, %c0_38] : memref<64x128xf32, #tpu.memory_space<vmem>>, vector<1x128xf32>
    %c32_i32_39 = arith.constant 32 : i32
    %97 = arith.addi %c32_i32_39, %c2_i32 : i32
    %98 = arith.index_cast %97 : i32 to index
    %c0_40 = arith.constant 0 : index
    %99 = vector.load %arg9[%98, %c0_40] : memref<64x128xf32, #tpu.memory_space<vmem>>, vector<1x128xf32>
    %100 = tpu.concatenate %96, %99 in 0 : vector<1x128xf32>, vector<1x128xf32> -> vector<2x128xf32>
    %cst_41 = arith.constant dense<0.000000e+00> : vector<2x128xf32>
    %101 = tpu.matmul %93, %23, %cst_41 {dimension_numbers = #tpu.dot_dimension_numbers<[1], [0], [0], [1], [0, 0, 1, 1], [], []>} : vector<2x32xf32>, vector<32x128xf32>, vector<2x128xf32> -> vector<2x128xf32>
    %102 = arith.addf %100, %101 : vector<2x128xf32>
    %103 = vector.extract_strided_slice %102 {offsets = [0, 0], sizes = [2, 32], strides = [1, 1]} : vector<2x128xf32> to vector<2x32xf32>
    %104 = arith.negf %103 : vector<2x32xf32>
    %105 = math.exp %104 : vector<2x32xf32>
    %cst_42 = arith.constant 1.000000e+00 : f32
    %106 = vector.broadcast %cst_42 : f32 to vector<2x32xf32>
    %107 = arith.addf %106, %105 : vector<2x32xf32>
    %108 = arith.divf %106, %107 : vector<2x32xf32>
    %109 = vector.extract_strided_slice %102 {offsets = [0, 32], sizes = [2, 32], strides = [1, 1]} : vector<2x128xf32> to vector<2x32xf32>
    %110 = arith.negf %109 : vector<2x32xf32>
    %111 = math.exp %110 : vector<2x32xf32>
    %cst_43 = arith.constant 1.000000e+00 : f32
    %112 = vector.broadcast %cst_43 : f32 to vector<2x32xf32>
    %113 = arith.addf %112, %111 : vector<2x32xf32>
    %114 = arith.divf %112, %113 : vector<2x32xf32>
    %115 = vector.extract_strided_slice %102 {offsets = [0, 64], sizes = [2, 32], strides = [1, 1]} : vector<2x128xf32> to vector<2x32xf32>
    %116 = math.tanh %115 : vector<2x32xf32>
    %117 = vector.extract_strided_slice %102 {offsets = [0, 96], sizes = [2, 32], strides = [1, 1]} : vector<2x128xf32> to vector<2x32xf32>
    %118 = arith.negf %117 : vector<2x32xf32>
    %119 = math.exp %118 : vector<2x32xf32>
    %cst_44 = arith.constant 1.000000e+00 : f32
    %120 = vector.broadcast %cst_44 : f32 to vector<2x32xf32>
    %121 = arith.addf %120, %119 : vector<2x32xf32>
    %122 = arith.divf %120, %121 : vector<2x32xf32>
    %123 = arith.mulf %114, %91 : vector<2x32xf32>
    %124 = arith.mulf %108, %116 : vector<2x32xf32>
    %125 = arith.addf %123, %124 : vector<2x32xf32>
    %126 = math.tanh %125 : vector<2x32xf32>
    %127 = arith.mulf %122, %126 : vector<2x32xf32>
    %c3_i32 = arith.constant 3 : i32
    %c0_i32_45 = arith.constant 0 : i32
    %128 = arith.addi %c0_i32_45, %c3_i32 : i32
    %129 = arith.index_cast %128 : i32 to index
    %c0_46 = arith.constant 0 : index
    %130 = vector.load %arg9[%129, %c0_46] : memref<64x128xf32, #tpu.memory_space<vmem>>, vector<1x128xf32>
    %c32_i32_47 = arith.constant 32 : i32
    %131 = arith.addi %c32_i32_47, %c3_i32 : i32
    %132 = arith.index_cast %131 : i32 to index
    %c0_48 = arith.constant 0 : index
    %133 = vector.load %arg9[%132, %c0_48] : memref<64x128xf32, #tpu.memory_space<vmem>>, vector<1x128xf32>
    %134 = tpu.concatenate %130, %133 in 0 : vector<1x128xf32>, vector<1x128xf32> -> vector<2x128xf32>
    %cst_49 = arith.constant dense<0.000000e+00> : vector<2x128xf32>
    %135 = tpu.matmul %127, %23, %cst_49 {dimension_numbers = #tpu.dot_dimension_numbers<[1], [0], [0], [1], [0, 0, 1, 1], [], []>} : vector<2x32xf32>, vector<32x128xf32>, vector<2x128xf32> -> vector<2x128xf32>
    %136 = arith.addf %134, %135 : vector<2x128xf32>
    %137 = vector.extract_strided_slice %136 {offsets = [0, 0], sizes = [2, 32], strides = [1, 1]} : vector<2x128xf32> to vector<2x32xf32>
    %138 = arith.negf %137 : vector<2x32xf32>
    %139 = math.exp %138 : vector<2x32xf32>
    %cst_50 = arith.constant 1.000000e+00 : f32
    %140 = vector.broadcast %cst_50 : f32 to vector<2x32xf32>
    %141 = arith.addf %140, %139 : vector<2x32xf32>
    %142 = arith.divf %140, %141 : vector<2x32xf32>
    %143 = vector.extract_strided_slice %136 {offsets = [0, 32], sizes = [2, 32], strides = [1, 1]} : vector<2x128xf32> to vector<2x32xf32>
    %144 = arith.negf %143 : vector<2x32xf32>
    %145 = math.exp %144 : vector<2x32xf32>
    %cst_51 = arith.constant 1.000000e+00 : f32
    %146 = vector.broadcast %cst_51 : f32 to vector<2x32xf32>
    %147 = arith.addf %146, %145 : vector<2x32xf32>
    %148 = arith.divf %146, %147 : vector<2x32xf32>
    %149 = vector.extract_strided_slice %136 {offsets = [0, 64], sizes = [2, 32], strides = [1, 1]} : vector<2x128xf32> to vector<2x32xf32>
    %150 = math.tanh %149 : vector<2x32xf32>
    %151 = vector.extract_strided_slice %136 {offsets = [0, 96], sizes = [2, 32], strides = [1, 1]} : vector<2x128xf32> to vector<2x32xf32>
    %152 = arith.negf %151 : vector<2x32xf32>
    %153 = math.exp %152 : vector<2x32xf32>
    %cst_52 = arith.constant 1.000000e+00 : f32
    %154 = vector.broadcast %cst_52 : f32 to vector<2x32xf32>
    %155 = arith.addf %154, %153 : vector<2x32xf32>
    %156 = arith.divf %154, %155 : vector<2x32xf32>
    %157 = arith.mulf %148, %125 : vector<2x32xf32>
    %158 = arith.mulf %142, %150 : vector<2x32xf32>
    %159 = arith.addf %157, %158 : vector<2x32xf32>
    %160 = math.tanh %159 : vector<2x32xf32>
    %161 = arith.mulf %156, %160 : vector<2x32xf32>
    %c4_i32 = arith.constant 4 : i32
    %c0_i32_53 = arith.constant 0 : i32
    %162 = arith.addi %c0_i32_53, %c4_i32 : i32
    %163 = arith.index_cast %162 : i32 to index
    %c0_54 = arith.constant 0 : index
    %164 = vector.load %arg9[%163, %c0_54] : memref<64x128xf32, #tpu.memory_space<vmem>>, vector<1x128xf32>
    %c32_i32_55 = arith.constant 32 : i32
    %165 = arith.addi %c32_i32_55, %c4_i32 : i32
    %166 = arith.index_cast %165 : i32 to index
    %c0_56 = arith.constant 0 : index
    %167 = vector.load %arg9[%166, %c0_56] : memref<64x128xf32, #tpu.memory_space<vmem>>, vector<1x128xf32>
    %168 = tpu.concatenate %164, %167 in 0 : vector<1x128xf32>, vector<1x128xf32> -> vector<2x128xf32>
    %cst_57 = arith.constant dense<0.000000e+00> : vector<2x128xf32>
    %169 = tpu.matmul %161, %23, %cst_57 {dimension_numbers = #tpu.dot_dimension_numbers<[1], [0], [0], [1], [0, 0, 1, 1], [], []>} : vector<2x32xf32>, vector<32x128xf32>, vector<2x128xf32> -> vector<2x128xf32>
    %170 = arith.addf %168, %169 : vector<2x128xf32>
    %171 = vector.extract_strided_slice %170 {offsets = [0, 0], sizes = [2, 32], strides = [1, 1]} : vector<2x128xf32> to vector<2x32xf32>
    %172 = arith.negf %171 : vector<2x32xf32>
    %173 = math.exp %172 : vector<2x32xf32>
    %cst_58 = arith.constant 1.000000e+00 : f32
    %174 = vector.broadcast %cst_58 : f32 to vector<2x32xf32>
    %175 = arith.addf %174, %173 : vector<2x32xf32>
    %176 = arith.divf %174, %175 : vector<2x32xf32>
    %177 = vector.extract_strided_slice %170 {offsets = [0, 32], sizes = [2, 32], strides = [1, 1]} : vector<2x128xf32> to vector<2x32xf32>
    %178 = arith.negf %177 : vector<2x32xf32>
    %179 = math.exp %178 : vector<2x32xf32>
    %cst_59 = arith.constant 1.000000e+00 : f32
    %180 = vector.broadcast %cst_59 : f32 to vector<2x32xf32>
    %181 = arith.addf %180, %179 : vector<2x32xf32>
    %182 = arith.divf %180, %181 : vector<2x32xf32>
    %183 = vector.extract_strided_slice %170 {offsets = [0, 64], sizes = [2, 32], strides = [1, 1]} : vector<2x128xf32> to vector<2x32xf32>
    %184 = math.tanh %183 : vector<2x32xf32>
    %185 = vector.extract_strided_slice %170 {offsets = [0, 96], sizes = [2, 32], strides = [1, 1]} : vector<2x128xf32> to vector<2x32xf32>
    %186 = arith.negf %185 : vector<2x32xf32>
    %187 = math.exp %186 : vector<2x32xf32>
    %cst_60 = arith.constant 1.000000e+00 : f32
    %188 = vector.broadcast %cst_60 : f32 to vector<2x32xf32>
    %189 = arith.addf %188, %187 : vector<2x32xf32>
    %190 = arith.divf %188, %189 : vector<2x32xf32>
    %191 = arith.mulf %182, %159 : vector<2x32xf32>
    %192 = arith.mulf %176, %184 : vector<2x32xf32>
    %193 = arith.addf %191, %192 : vector<2x32xf32>
    %194 = math.tanh %193 : vector<2x32xf32>
    %195 = arith.mulf %190, %194 : vector<2x32xf32>
    %c5_i32 = arith.constant 5 : i32
    %c0_i32_61 = arith.constant 0 : i32
    %196 = arith.addi %c0_i32_61, %c5_i32 : i32
    %197 = arith.index_cast %196 : i32 to index
    %c0_62 = arith.constant 0 : index
    %198 = vector.load %arg9[%197, %c0_62] : memref<64x128xf32, #tpu.memory_space<vmem>>, vector<1x128xf32>
    %c32_i32_63 = arith.constant 32 : i32
    %199 = arith.addi %c32_i32_63, %c5_i32 : i32
    %200 = arith.index_cast %199 : i32 to index
    %c0_64 = arith.constant 0 : index
    %201 = vector.load %arg9[%200, %c0_64] : memref<64x128xf32, #tpu.memory_space<vmem>>, vector<1x128xf32>
    %202 = tpu.concatenate %198, %201 in 0 : vector<1x128xf32>, vector<1x128xf32> -> vector<2x128xf32>
    %cst_65 = arith.constant dense<0.000000e+00> : vector<2x128xf32>
    %203 = tpu.matmul %195, %23, %cst_65 {dimension_numbers = #tpu.dot_dimension_numbers<[1], [0], [0], [1], [0, 0, 1, 1], [], []>} : vector<2x32xf32>, vector<32x128xf32>, vector<2x128xf32> -> vector<2x128xf32>
    %204 = arith.addf %202, %203 : vector<2x128xf32>
    %205 = vector.extract_strided_slice %204 {offsets = [0, 0], sizes = [2, 32], strides = [1, 1]} : vector<2x128xf32> to vector<2x32xf32>
    %206 = arith.negf %205 : vector<2x32xf32>
    %207 = math.exp %206 : vector<2x32xf32>
    %cst_66 = arith.constant 1.000000e+00 : f32
    %208 = vector.broadcast %cst_66 : f32 to vector<2x32xf32>
    %209 = arith.addf %208, %207 : vector<2x32xf32>
    %210 = arith.divf %208, %209 : vector<2x32xf32>
    %211 = vector.extract_strided_slice %204 {offsets = [0, 32], sizes = [2, 32], strides = [1, 1]} : vector<2x128xf32> to vector<2x32xf32>
    %212 = arith.negf %211 : vector<2x32xf32>
    %213 = math.exp %212 : vector<2x32xf32>
    %cst_67 = arith.constant 1.000000e+00 : f32
    %214 = vector.broadcast %cst_67 : f32 to vector<2x32xf32>
    %215 = arith.addf %214, %213 : vector<2x32xf32>
    %216 = arith.divf %214, %215 : vector<2x32xf32>
    %217 = vector.extract_strided_slice %204 {offsets = [0, 64], sizes = [2, 32], strides = [1, 1]} : vector<2x128xf32> to vector<2x32xf32>
    %218 = math.tanh %217 : vector<2x32xf32>
    %219 = vector.extract_strided_slice %204 {offsets = [0, 96], sizes = [2, 32], strides = [1, 1]} : vector<2x128xf32> to vector<2x32xf32>
    %220 = arith.negf %219 : vector<2x32xf32>
    %221 = math.exp %220 : vector<2x32xf32>
    %cst_68 = arith.constant 1.000000e+00 : f32
    %222 = vector.broadcast %cst_68 : f32 to vector<2x32xf32>
    %223 = arith.addf %222, %221 : vector<2x32xf32>
    %224 = arith.divf %222, %223 : vector<2x32xf32>
    %225 = arith.mulf %216, %193 : vector<2x32xf32>
    %226 = arith.mulf %210, %218 : vector<2x32xf32>
    %227 = arith.addf %225, %226 : vector<2x32xf32>
    %228 = math.tanh %227 : vector<2x32xf32>
    %229 = arith.mulf %224, %228 : vector<2x32xf32>
    %c6_i32 = arith.constant 6 : i32
    %c0_i32_69 = arith.constant 0 : i32
    %230 = arith.addi %c0_i32_69, %c6_i32 : i32
    %231 = arith.index_cast %230 : i32 to index
    %c0_70 = arith.constant 0 : index
    %232 = vector.load %arg9[%231, %c0_70] : memref<64x128xf32, #tpu.memory_space<vmem>>, vector<1x128xf32>
    %c32_i32_71 = arith.constant 32 : i32
    %233 = arith.addi %c32_i32_71, %c6_i32 : i32
    %234 = arith.index_cast %233 : i32 to index
    %c0_72 = arith.constant 0 : index
    %235 = vector.load %arg9[%234, %c0_72] : memref<64x128xf32, #tpu.memory_space<vmem>>, vector<1x128xf32>
    %236 = tpu.concatenate %232, %235 in 0 : vector<1x128xf32>, vector<1x128xf32> -> vector<2x128xf32>
    %cst_73 = arith.constant dense<0.000000e+00> : vector<2x128xf32>
    %237 = tpu.matmul %229, %23, %cst_73 {dimension_numbers = #tpu.dot_dimension_numbers<[1], [0], [0], [1], [0, 0, 1, 1], [], []>} : vector<2x32xf32>, vector<32x128xf32>, vector<2x128xf32> -> vector<2x128xf32>
    %238 = arith.addf %236, %237 : vector<2x128xf32>
    %239 = vector.extract_strided_slice %238 {offsets = [0, 0], sizes = [2, 32], strides = [1, 1]} : vector<2x128xf32> to vector<2x32xf32>
    %240 = arith.negf %239 : vector<2x32xf32>
    %241 = math.exp %240 : vector<2x32xf32>
    %cst_74 = arith.constant 1.000000e+00 : f32
    %242 = vector.broadcast %cst_74 : f32 to vector<2x32xf32>
    %243 = arith.addf %242, %241 : vector<2x32xf32>
    %244 = arith.divf %242, %243 : vector<2x32xf32>
    %245 = vector.extract_strided_slice %238 {offsets = [0, 32], sizes = [2, 32], strides = [1, 1]} : vector<2x128xf32> to vector<2x32xf32>
    %246 = arith.negf %245 : vector<2x32xf32>
    %247 = math.exp %246 : vector<2x32xf32>
    %cst_75 = arith.constant 1.000000e+00 : f32
    %248 = vector.broadcast %cst_75 : f32 to vector<2x32xf32>
    %249 = arith.addf %248, %247 : vector<2x32xf32>
    %250 = arith.divf %248, %249 : vector<2x32xf32>
    %251 = vector.extract_strided_slice %238 {offsets = [0, 64], sizes = [2, 32], strides = [1, 1]} : vector<2x128xf32> to vector<2x32xf32>
    %252 = math.tanh %251 : vector<2x32xf32>
    %253 = vector.extract_strided_slice %238 {offsets = [0, 96], sizes = [2, 32], strides = [1, 1]} : vector<2x128xf32> to vector<2x32xf32>
    %254 = arith.negf %253 : vector<2x32xf32>
    %255 = math.exp %254 : vector<2x32xf32>
    %cst_76 = arith.constant 1.000000e+00 : f32
    %256 = vector.broadcast %cst_76 : f32 to vector<2x32xf32>
    %257 = arith.addf %256, %255 : vector<2x32xf32>
    %258 = arith.divf %256, %257 : vector<2x32xf32>
    %259 = arith.mulf %250, %227 : vector<2x32xf32>
    %260 = arith.mulf %244, %252 : vector<2x32xf32>
    %261 = arith.addf %259, %260 : vector<2x32xf32>
    %262 = math.tanh %261 : vector<2x32xf32>
    %263 = arith.mulf %258, %262 : vector<2x32xf32>
    %c7_i32 = arith.constant 7 : i32
    %c0_i32_77 = arith.constant 0 : i32
    %264 = arith.addi %c0_i32_77, %c7_i32 : i32
    %265 = arith.index_cast %264 : i32 to index
    %c0_78 = arith.constant 0 : index
    %266 = vector.load %arg9[%265, %c0_78] : memref<64x128xf32, #tpu.memory_space<vmem>>, vector<1x128xf32>
    %c32_i32_79 = arith.constant 32 : i32
    %267 = arith.addi %c32_i32_79, %c7_i32 : i32
    %268 = arith.index_cast %267 : i32 to index
    %c0_80 = arith.constant 0 : index
    %269 = vector.load %arg9[%268, %c0_80] : memref<64x128xf32, #tpu.memory_space<vmem>>, vector<1x128xf32>
    %270 = tpu.concatenate %266, %269 in 0 : vector<1x128xf32>, vector<1x128xf32> -> vector<2x128xf32>
    %cst_81 = arith.constant dense<0.000000e+00> : vector<2x128xf32>
    %271 = tpu.matmul %263, %23, %cst_81 {dimension_numbers = #tpu.dot_dimension_numbers<[1], [0], [0], [1], [0, 0, 1, 1], [], []>} : vector<2x32xf32>, vector<32x128xf32>, vector<2x128xf32> -> vector<2x128xf32>
    %272 = arith.addf %270, %271 : vector<2x128xf32>
    %273 = vector.extract_strided_slice %272 {offsets = [0, 0], sizes = [2, 32], strides = [1, 1]} : vector<2x128xf32> to vector<2x32xf32>
    %274 = arith.negf %273 : vector<2x32xf32>
    %275 = math.exp %274 : vector<2x32xf32>
    %cst_82 = arith.constant 1.000000e+00 : f32
    %276 = vector.broadcast %cst_82 : f32 to vector<2x32xf32>
    %277 = arith.addf %276, %275 : vector<2x32xf32>
    %278 = arith.divf %276, %277 : vector<2x32xf32>
    %279 = vector.extract_strided_slice %272 {offsets = [0, 32], sizes = [2, 32], strides = [1, 1]} : vector<2x128xf32> to vector<2x32xf32>
    %280 = arith.negf %279 : vector<2x32xf32>
    %281 = math.exp %280 : vector<2x32xf32>
    %cst_83 = arith.constant 1.000000e+00 : f32
    %282 = vector.broadcast %cst_83 : f32 to vector<2x32xf32>
    %283 = arith.addf %282, %281 : vector<2x32xf32>
    %284 = arith.divf %282, %283 : vector<2x32xf32>
    %285 = vector.extract_strided_slice %272 {offsets = [0, 64], sizes = [2, 32], strides = [1, 1]} : vector<2x128xf32> to vector<2x32xf32>
    %286 = math.tanh %285 : vector<2x32xf32>
    %287 = vector.extract_strided_slice %272 {offsets = [0, 96], sizes = [2, 32], strides = [1, 1]} : vector<2x128xf32> to vector<2x32xf32>
    %288 = arith.negf %287 : vector<2x32xf32>
    %289 = math.exp %288 : vector<2x32xf32>
    %cst_84 = arith.constant 1.000000e+00 : f32
    %290 = vector.broadcast %cst_84 : f32 to vector<2x32xf32>
    %291 = arith.addf %290, %289 : vector<2x32xf32>
    %292 = arith.divf %290, %291 : vector<2x32xf32>
    %293 = arith.mulf %284, %261 : vector<2x32xf32>
    %294 = arith.mulf %278, %286 : vector<2x32xf32>
    %295 = arith.addf %293, %294 : vector<2x32xf32>
    %296 = math.tanh %295 : vector<2x32xf32>
    %297 = arith.mulf %292, %296 : vector<2x32xf32>
    %c8_i32 = arith.constant 8 : i32
    %c0_i32_85 = arith.constant 0 : i32
    %298 = arith.addi %c0_i32_85, %c8_i32 : i32
    %299 = arith.index_cast %298 : i32 to index
    %c0_86 = arith.constant 0 : index
    %300 = vector.load %arg9[%299, %c0_86] : memref<64x128xf32, #tpu.memory_space<vmem>>, vector<1x128xf32>
    %c32_i32_87 = arith.constant 32 : i32
    %301 = arith.addi %c32_i32_87, %c8_i32 : i32
    %302 = arith.index_cast %301 : i32 to index
    %c0_88 = arith.constant 0 : index
    %303 = vector.load %arg9[%302, %c0_88] : memref<64x128xf32, #tpu.memory_space<vmem>>, vector<1x128xf32>
    %304 = tpu.concatenate %300, %303 in 0 : vector<1x128xf32>, vector<1x128xf32> -> vector<2x128xf32>
    %cst_89 = arith.constant dense<0.000000e+00> : vector<2x128xf32>
    %305 = tpu.matmul %297, %23, %cst_89 {dimension_numbers = #tpu.dot_dimension_numbers<[1], [0], [0], [1], [0, 0, 1, 1], [], []>} : vector<2x32xf32>, vector<32x128xf32>, vector<2x128xf32> -> vector<2x128xf32>
    %306 = arith.addf %304, %305 : vector<2x128xf32>
    %307 = vector.extract_strided_slice %306 {offsets = [0, 0], sizes = [2, 32], strides = [1, 1]} : vector<2x128xf32> to vector<2x32xf32>
    %308 = arith.negf %307 : vector<2x32xf32>
    %309 = math.exp %308 : vector<2x32xf32>
    %cst_90 = arith.constant 1.000000e+00 : f32
    %310 = vector.broadcast %cst_90 : f32 to vector<2x32xf32>
    %311 = arith.addf %310, %309 : vector<2x32xf32>
    %312 = arith.divf %310, %311 : vector<2x32xf32>
    %313 = vector.extract_strided_slice %306 {offsets = [0, 32], sizes = [2, 32], strides = [1, 1]} : vector<2x128xf32> to vector<2x32xf32>
    %314 = arith.negf %313 : vector<2x32xf32>
    %315 = math.exp %314 : vector<2x32xf32>
    %cst_91 = arith.constant 1.000000e+00 : f32
    %316 = vector.broadcast %cst_91 : f32 to vector<2x32xf32>
    %317 = arith.addf %316, %315 : vector<2x32xf32>
    %318 = arith.divf %316, %317 : vector<2x32xf32>
    %319 = vector.extract_strided_slice %306 {offsets = [0, 64], sizes = [2, 32], strides = [1, 1]} : vector<2x128xf32> to vector<2x32xf32>
    %320 = math.tanh %319 : vector<2x32xf32>
    %321 = vector.extract_strided_slice %306 {offsets = [0, 96], sizes = [2, 32], strides = [1, 1]} : vector<2x128xf32> to vector<2x32xf32>
    %322 = arith.negf %321 : vector<2x32xf32>
    %323 = math.exp %322 : vector<2x32xf32>
    %cst_92 = arith.constant 1.000000e+00 : f32
    %324 = vector.broadcast %cst_92 : f32 to vector<2x32xf32>
    %325 = arith.addf %324, %323 : vector<2x32xf32>
    %326 = arith.divf %324, %325 : vector<2x32xf32>
    %327 = arith.mulf %318, %295 : vector<2x32xf32>
    %328 = arith.mulf %312, %320 : vector<2x32xf32>
    %329 = arith.addf %327, %328 : vector<2x32xf32>
    %330 = math.tanh %329 : vector<2x32xf32>
    %331 = arith.mulf %326, %330 : vector<2x32xf32>
    %c9_i32 = arith.constant 9 : i32
    %c0_i32_93 = arith.constant 0 : i32
    %332 = arith.addi %c0_i32_93, %c9_i32 : i32
    %333 = arith.index_cast %332 : i32 to index
    %c0_94 = arith.constant 0 : index
    %334 = vector.load %arg9[%333, %c0_94] : memref<64x128xf32, #tpu.memory_space<vmem>>, vector<1x128xf32>
    %c32_i32_95 = arith.constant 32 : i32
    %335 = arith.addi %c32_i32_95, %c9_i32 : i32
    %336 = arith.index_cast %335 : i32 to index
    %c0_96 = arith.constant 0 : index
    %337 = vector.load %arg9[%336, %c0_96] : memref<64x128xf32, #tpu.memory_space<vmem>>, vector<1x128xf32>
    %338 = tpu.concatenate %334, %337 in 0 : vector<1x128xf32>, vector<1x128xf32> -> vector<2x128xf32>
    %cst_97 = arith.constant dense<0.000000e+00> : vector<2x128xf32>
    %339 = tpu.matmul %331, %23, %cst_97 {dimension_numbers = #tpu.dot_dimension_numbers<[1], [0], [0], [1], [0, 0, 1, 1], [], []>} : vector<2x32xf32>, vector<32x128xf32>, vector<2x128xf32> -> vector<2x128xf32>
    %340 = arith.addf %338, %339 : vector<2x128xf32>
    %341 = vector.extract_strided_slice %340 {offsets = [0, 0], sizes = [2, 32], strides = [1, 1]} : vector<2x128xf32> to vector<2x32xf32>
    %342 = arith.negf %341 : vector<2x32xf32>
    %343 = math.exp %342 : vector<2x32xf32>
    %cst_98 = arith.constant 1.000000e+00 : f32
    %344 = vector.broadcast %cst_98 : f32 to vector<2x32xf32>
    %345 = arith.addf %344, %343 : vector<2x32xf32>
    %346 = arith.divf %344, %345 : vector<2x32xf32>
    %347 = vector.extract_strided_slice %340 {offsets = [0, 32], sizes = [2, 32], strides = [1, 1]} : vector<2x128xf32> to vector<2x32xf32>
    %348 = arith.negf %347 : vector<2x32xf32>
    %349 = math.exp %348 : vector<2x32xf32>
    %cst_99 = arith.constant 1.000000e+00 : f32
    %350 = vector.broadcast %cst_99 : f32 to vector<2x32xf32>
    %351 = arith.addf %350, %349 : vector<2x32xf32>
    %352 = arith.divf %350, %351 : vector<2x32xf32>
    %353 = vector.extract_strided_slice %340 {offsets = [0, 64], sizes = [2, 32], strides = [1, 1]} : vector<2x128xf32> to vector<2x32xf32>
    %354 = math.tanh %353 : vector<2x32xf32>
    %355 = vector.extract_strided_slice %340 {offsets = [0, 96], sizes = [2, 32], strides = [1, 1]} : vector<2x128xf32> to vector<2x32xf32>
    %356 = arith.negf %355 : vector<2x32xf32>
    %357 = math.exp %356 : vector<2x32xf32>
    %cst_100 = arith.constant 1.000000e+00 : f32
    %358 = vector.broadcast %cst_100 : f32 to vector<2x32xf32>
    %359 = arith.addf %358, %357 : vector<2x32xf32>
    %360 = arith.divf %358, %359 : vector<2x32xf32>
    %361 = arith.mulf %352, %329 : vector<2x32xf32>
    %362 = arith.mulf %346, %354 : vector<2x32xf32>
    %363 = arith.addf %361, %362 : vector<2x32xf32>
    %364 = math.tanh %363 : vector<2x32xf32>
    %365 = arith.mulf %360, %364 : vector<2x32xf32>
    %c10_i32 = arith.constant 10 : i32
    %c0_i32_101 = arith.constant 0 : i32
    %366 = arith.addi %c0_i32_101, %c10_i32 : i32
    %367 = arith.index_cast %366 : i32 to index
    %c0_102 = arith.constant 0 : index
    %368 = vector.load %arg9[%367, %c0_102] : memref<64x128xf32, #tpu.memory_space<vmem>>, vector<1x128xf32>
    %c32_i32_103 = arith.constant 32 : i32
    %369 = arith.addi %c32_i32_103, %c10_i32 : i32
    %370 = arith.index_cast %369 : i32 to index
    %c0_104 = arith.constant 0 : index
    %371 = vector.load %arg9[%370, %c0_104] : memref<64x128xf32, #tpu.memory_space<vmem>>, vector<1x128xf32>
    %372 = tpu.concatenate %368, %371 in 0 : vector<1x128xf32>, vector<1x128xf32> -> vector<2x128xf32>
    %cst_105 = arith.constant dense<0.000000e+00> : vector<2x128xf32>
    %373 = tpu.matmul %365, %23, %cst_105 {dimension_numbers = #tpu.dot_dimension_numbers<[1], [0], [0], [1], [0, 0, 1, 1], [], []>} : vector<2x32xf32>, vector<32x128xf32>, vector<2x128xf32> -> vector<2x128xf32>
    %374 = arith.addf %372, %373 : vector<2x128xf32>
    %375 = vector.extract_strided_slice %374 {offsets = [0, 0], sizes = [2, 32], strides = [1, 1]} : vector<2x128xf32> to vector<2x32xf32>
    %376 = arith.negf %375 : vector<2x32xf32>
    %377 = math.exp %376 : vector<2x32xf32>
    %cst_106 = arith.constant 1.000000e+00 : f32
    %378 = vector.broadcast %cst_106 : f32 to vector<2x32xf32>
    %379 = arith.addf %378, %377 : vector<2x32xf32>
    %380 = arith.divf %378, %379 : vector<2x32xf32>
    %381 = vector.extract_strided_slice %374 {offsets = [0, 32], sizes = [2, 32], strides = [1, 1]} : vector<2x128xf32> to vector<2x32xf32>
    %382 = arith.negf %381 : vector<2x32xf32>
    %383 = math.exp %382 : vector<2x32xf32>
    %cst_107 = arith.constant 1.000000e+00 : f32
    %384 = vector.broadcast %cst_107 : f32 to vector<2x32xf32>
    %385 = arith.addf %384, %383 : vector<2x32xf32>
    %386 = arith.divf %384, %385 : vector<2x32xf32>
    %387 = vector.extract_strided_slice %374 {offsets = [0, 64], sizes = [2, 32], strides = [1, 1]} : vector<2x128xf32> to vector<2x32xf32>
    %388 = math.tanh %387 : vector<2x32xf32>
    %389 = vector.extract_strided_slice %374 {offsets = [0, 96], sizes = [2, 32], strides = [1, 1]} : vector<2x128xf32> to vector<2x32xf32>
    %390 = arith.negf %389 : vector<2x32xf32>
    %391 = math.exp %390 : vector<2x32xf32>
    %cst_108 = arith.constant 1.000000e+00 : f32
    %392 = vector.broadcast %cst_108 : f32 to vector<2x32xf32>
    %393 = arith.addf %392, %391 : vector<2x32xf32>
    %394 = arith.divf %392, %393 : vector<2x32xf32>
    %395 = arith.mulf %386, %363 : vector<2x32xf32>
    %396 = arith.mulf %380, %388 : vector<2x32xf32>
    %397 = arith.addf %395, %396 : vector<2x32xf32>
    %398 = math.tanh %397 : vector<2x32xf32>
    %399 = arith.mulf %394, %398 : vector<2x32xf32>
    %c11_i32 = arith.constant 11 : i32
    %c0_i32_109 = arith.constant 0 : i32
    %400 = arith.addi %c0_i32_109, %c11_i32 : i32
    %401 = arith.index_cast %400 : i32 to index
    %c0_110 = arith.constant 0 : index
    %402 = vector.load %arg9[%401, %c0_110] : memref<64x128xf32, #tpu.memory_space<vmem>>, vector<1x128xf32>
    %c32_i32_111 = arith.constant 32 : i32
    %403 = arith.addi %c32_i32_111, %c11_i32 : i32
    %404 = arith.index_cast %403 : i32 to index
    %c0_112 = arith.constant 0 : index
    %405 = vector.load %arg9[%404, %c0_112] : memref<64x128xf32, #tpu.memory_space<vmem>>, vector<1x128xf32>
    %406 = tpu.concatenate %402, %405 in 0 : vector<1x128xf32>, vector<1x128xf32> -> vector<2x128xf32>
    %cst_113 = arith.constant dense<0.000000e+00> : vector<2x128xf32>
    %407 = tpu.matmul %399, %23, %cst_113 {dimension_numbers = #tpu.dot_dimension_numbers<[1], [0], [0], [1], [0, 0, 1, 1], [], []>} : vector<2x32xf32>, vector<32x128xf32>, vector<2x128xf32> -> vector<2x128xf32>
    %408 = arith.addf %406, %407 : vector<2x128xf32>
    %409 = vector.extract_strided_slice %408 {offsets = [0, 0], sizes = [2, 32], strides = [1, 1]} : vector<2x128xf32> to vector<2x32xf32>
    %410 = arith.negf %409 : vector<2x32xf32>
    %411 = math.exp %410 : vector<2x32xf32>
    %cst_114 = arith.constant 1.000000e+00 : f32
    %412 = vector.broadcast %cst_114 : f32 to vector<2x32xf32>
    %413 = arith.addf %412, %411 : vector<2x32xf32>
    %414 = arith.divf %412, %413 : vector<2x32xf32>
    %415 = vector.extract_strided_slice %408 {offsets = [0, 32], sizes = [2, 32], strides = [1, 1]} : vector<2x128xf32> to vector<2x32xf32>
    %416 = arith.negf %415 : vector<2x32xf32>
    %417 = math.exp %416 : vector<2x32xf32>
    %cst_115 = arith.constant 1.000000e+00 : f32
    %418 = vector.broadcast %cst_115 : f32 to vector<2x32xf32>
    %419 = arith.addf %418, %417 : vector<2x32xf32>
    %420 = arith.divf %418, %419 : vector<2x32xf32>
    %421 = vector.extract_strided_slice %408 {offsets = [0, 64], sizes = [2, 32], strides = [1, 1]} : vector<2x128xf32> to vector<2x32xf32>
    %422 = math.tanh %421 : vector<2x32xf32>
    %423 = vector.extract_strided_slice %408 {offsets = [0, 96], sizes = [2, 32], strides = [1, 1]} : vector<2x128xf32> to vector<2x32xf32>
    %424 = arith.negf %423 : vector<2x32xf32>
    %425 = math.exp %424 : vector<2x32xf32>
    %cst_116 = arith.constant 1.000000e+00 : f32
    %426 = vector.broadcast %cst_116 : f32 to vector<2x32xf32>
    %427 = arith.addf %426, %425 : vector<2x32xf32>
    %428 = arith.divf %426, %427 : vector<2x32xf32>
    %429 = arith.mulf %420, %397 : vector<2x32xf32>
    %430 = arith.mulf %414, %422 : vector<2x32xf32>
    %431 = arith.addf %429, %430 : vector<2x32xf32>
    %432 = math.tanh %431 : vector<2x32xf32>
    %433 = arith.mulf %428, %432 : vector<2x32xf32>
    %c12_i32 = arith.constant 12 : i32
    %c0_i32_117 = arith.constant 0 : i32
    %434 = arith.addi %c0_i32_117, %c12_i32 : i32
    %435 = arith.index_cast %434 : i32 to index
    %c0_118 = arith.constant 0 : index
    %436 = vector.load %arg9[%435, %c0_118] : memref<64x128xf32, #tpu.memory_space<vmem>>, vector<1x128xf32>
    %c32_i32_119 = arith.constant 32 : i32
    %437 = arith.addi %c32_i32_119, %c12_i32 : i32
    %438 = arith.index_cast %437 : i32 to index
    %c0_120 = arith.constant 0 : index
    %439 = vector.load %arg9[%438, %c0_120] : memref<64x128xf32, #tpu.memory_space<vmem>>, vector<1x128xf32>
    %440 = tpu.concatenate %436, %439 in 0 : vector<1x128xf32>, vector<1x128xf32> -> vector<2x128xf32>
    %cst_121 = arith.constant dense<0.000000e+00> : vector<2x128xf32>
    %441 = tpu.matmul %433, %23, %cst_121 {dimension_numbers = #tpu.dot_dimension_numbers<[1], [0], [0], [1], [0, 0, 1, 1], [], []>} : vector<2x32xf32>, vector<32x128xf32>, vector<2x128xf32> -> vector<2x128xf32>
    %442 = arith.addf %440, %441 : vector<2x128xf32>
    %443 = vector.extract_strided_slice %442 {offsets = [0, 0], sizes = [2, 32], strides = [1, 1]} : vector<2x128xf32> to vector<2x32xf32>
    %444 = arith.negf %443 : vector<2x32xf32>
    %445 = math.exp %444 : vector<2x32xf32>
    %cst_122 = arith.constant 1.000000e+00 : f32
    %446 = vector.broadcast %cst_122 : f32 to vector<2x32xf32>
    %447 = arith.addf %446, %445 : vector<2x32xf32>
    %448 = arith.divf %446, %447 : vector<2x32xf32>
    %449 = vector.extract_strided_slice %442 {offsets = [0, 32], sizes = [2, 32], strides = [1, 1]} : vector<2x128xf32> to vector<2x32xf32>
    %450 = arith.negf %449 : vector<2x32xf32>
    %451 = math.exp %450 : vector<2x32xf32>
    %cst_123 = arith.constant 1.000000e+00 : f32
    %452 = vector.broadcast %cst_123 : f32 to vector<2x32xf32>
    %453 = arith.addf %452, %451 : vector<2x32xf32>
    %454 = arith.divf %452, %453 : vector<2x32xf32>
    %455 = vector.extract_strided_slice %442 {offsets = [0, 64], sizes = [2, 32], strides = [1, 1]} : vector<2x128xf32> to vector<2x32xf32>
    %456 = math.tanh %455 : vector<2x32xf32>
    %457 = vector.extract_strided_slice %442 {offsets = [0, 96], sizes = [2, 32], strides = [1, 1]} : vector<2x128xf32> to vector<2x32xf32>
    %458 = arith.negf %457 : vector<2x32xf32>
    %459 = math.exp %458 : vector<2x32xf32>
    %cst_124 = arith.constant 1.000000e+00 : f32
    %460 = vector.broadcast %cst_124 : f32 to vector<2x32xf32>
    %461 = arith.addf %460, %459 : vector<2x32xf32>
    %462 = arith.divf %460, %461 : vector<2x32xf32>
    %463 = arith.mulf %454, %431 : vector<2x32xf32>
    %464 = arith.mulf %448, %456 : vector<2x32xf32>
    %465 = arith.addf %463, %464 : vector<2x32xf32>
    %466 = math.tanh %465 : vector<2x32xf32>
    %467 = arith.mulf %462, %466 : vector<2x32xf32>
    %c13_i32 = arith.constant 13 : i32
    %c0_i32_125 = arith.constant 0 : i32
    %468 = arith.addi %c0_i32_125, %c13_i32 : i32
    %469 = arith.index_cast %468 : i32 to index
    %c0_126 = arith.constant 0 : index
    %470 = vector.load %arg9[%469, %c0_126] : memref<64x128xf32, #tpu.memory_space<vmem>>, vector<1x128xf32>
    %c32_i32_127 = arith.constant 32 : i32
    %471 = arith.addi %c32_i32_127, %c13_i32 : i32
    %472 = arith.index_cast %471 : i32 to index
    %c0_128 = arith.constant 0 : index
    %473 = vector.load %arg9[%472, %c0_128] : memref<64x128xf32, #tpu.memory_space<vmem>>, vector<1x128xf32>
    %474 = tpu.concatenate %470, %473 in 0 : vector<1x128xf32>, vector<1x128xf32> -> vector<2x128xf32>
    %cst_129 = arith.constant dense<0.000000e+00> : vector<2x128xf32>
    %475 = tpu.matmul %467, %23, %cst_129 {dimension_numbers = #tpu.dot_dimension_numbers<[1], [0], [0], [1], [0, 0, 1, 1], [], []>} : vector<2x32xf32>, vector<32x128xf32>, vector<2x128xf32> -> vector<2x128xf32>
    %476 = arith.addf %474, %475 : vector<2x128xf32>
    %477 = vector.extract_strided_slice %476 {offsets = [0, 0], sizes = [2, 32], strides = [1, 1]} : vector<2x128xf32> to vector<2x32xf32>
    %478 = arith.negf %477 : vector<2x32xf32>
    %479 = math.exp %478 : vector<2x32xf32>
    %cst_130 = arith.constant 1.000000e+00 : f32
    %480 = vector.broadcast %cst_130 : f32 to vector<2x32xf32>
    %481 = arith.addf %480, %479 : vector<2x32xf32>
    %482 = arith.divf %480, %481 : vector<2x32xf32>
    %483 = vector.extract_strided_slice %476 {offsets = [0, 32], sizes = [2, 32], strides = [1, 1]} : vector<2x128xf32> to vector<2x32xf32>
    %484 = arith.negf %483 : vector<2x32xf32>
    %485 = math.exp %484 : vector<2x32xf32>
    %cst_131 = arith.constant 1.000000e+00 : f32
    %486 = vector.broadcast %cst_131 : f32 to vector<2x32xf32>
    %487 = arith.addf %486, %485 : vector<2x32xf32>
    %488 = arith.divf %486, %487 : vector<2x32xf32>
    %489 = vector.extract_strided_slice %476 {offsets = [0, 64], sizes = [2, 32], strides = [1, 1]} : vector<2x128xf32> to vector<2x32xf32>
    %490 = math.tanh %489 : vector<2x32xf32>
    %491 = vector.extract_strided_slice %476 {offsets = [0, 96], sizes = [2, 32], strides = [1, 1]} : vector<2x128xf32> to vector<2x32xf32>
    %492 = arith.negf %491 : vector<2x32xf32>
    %493 = math.exp %492 : vector<2x32xf32>
    %cst_132 = arith.constant 1.000000e+00 : f32
    %494 = vector.broadcast %cst_132 : f32 to vector<2x32xf32>
    %495 = arith.addf %494, %493 : vector<2x32xf32>
    %496 = arith.divf %494, %495 : vector<2x32xf32>
    %497 = arith.mulf %488, %465 : vector<2x32xf32>
    %498 = arith.mulf %482, %490 : vector<2x32xf32>
    %499 = arith.addf %497, %498 : vector<2x32xf32>
    %500 = math.tanh %499 : vector<2x32xf32>
    %501 = arith.mulf %496, %500 : vector<2x32xf32>
    %c14_i32 = arith.constant 14 : i32
    %c0_i32_133 = arith.constant 0 : i32
    %502 = arith.addi %c0_i32_133, %c14_i32 : i32
    %503 = arith.index_cast %502 : i32 to index
    %c0_134 = arith.constant 0 : index
    %504 = vector.load %arg9[%503, %c0_134] : memref<64x128xf32, #tpu.memory_space<vmem>>, vector<1x128xf32>
    %c32_i32_135 = arith.constant 32 : i32
    %505 = arith.addi %c32_i32_135, %c14_i32 : i32
    %506 = arith.index_cast %505 : i32 to index
    %c0_136 = arith.constant 0 : index
    %507 = vector.load %arg9[%506, %c0_136] : memref<64x128xf32, #tpu.memory_space<vmem>>, vector<1x128xf32>
    %508 = tpu.concatenate %504, %507 in 0 : vector<1x128xf32>, vector<1x128xf32> -> vector<2x128xf32>
    %cst_137 = arith.constant dense<0.000000e+00> : vector<2x128xf32>
    %509 = tpu.matmul %501, %23, %cst_137 {dimension_numbers = #tpu.dot_dimension_numbers<[1], [0], [0], [1], [0, 0, 1, 1], [], []>} : vector<2x32xf32>, vector<32x128xf32>, vector<2x128xf32> -> vector<2x128xf32>
    %510 = arith.addf %508, %509 : vector<2x128xf32>
    %511 = vector.extract_strided_slice %510 {offsets = [0, 0], sizes = [2, 32], strides = [1, 1]} : vector<2x128xf32> to vector<2x32xf32>
    %512 = arith.negf %511 : vector<2x32xf32>
    %513 = math.exp %512 : vector<2x32xf32>
    %cst_138 = arith.constant 1.000000e+00 : f32
    %514 = vector.broadcast %cst_138 : f32 to vector<2x32xf32>
    %515 = arith.addf %514, %513 : vector<2x32xf32>
    %516 = arith.divf %514, %515 : vector<2x32xf32>
    %517 = vector.extract_strided_slice %510 {offsets = [0, 32], sizes = [2, 32], strides = [1, 1]} : vector<2x128xf32> to vector<2x32xf32>
    %518 = arith.negf %517 : vector<2x32xf32>
    %519 = math.exp %518 : vector<2x32xf32>
    %cst_139 = arith.constant 1.000000e+00 : f32
    %520 = vector.broadcast %cst_139 : f32 to vector<2x32xf32>
    %521 = arith.addf %520, %519 : vector<2x32xf32>
    %522 = arith.divf %520, %521 : vector<2x32xf32>
    %523 = vector.extract_strided_slice %510 {offsets = [0, 64], sizes = [2, 32], strides = [1, 1]} : vector<2x128xf32> to vector<2x32xf32>
    %524 = math.tanh %523 : vector<2x32xf32>
    %525 = vector.extract_strided_slice %510 {offsets = [0, 96], sizes = [2, 32], strides = [1, 1]} : vector<2x128xf32> to vector<2x32xf32>
    %526 = arith.negf %525 : vector<2x32xf32>
    %527 = math.exp %526 : vector<2x32xf32>
    %cst_140 = arith.constant 1.000000e+00 : f32
    %528 = vector.broadcast %cst_140 : f32 to vector<2x32xf32>
    %529 = arith.addf %528, %527 : vector<2x32xf32>
    %530 = arith.divf %528, %529 : vector<2x32xf32>
    %531 = arith.mulf %522, %499 : vector<2x32xf32>
    %532 = arith.mulf %516, %524 : vector<2x32xf32>
    %533 = arith.addf %531, %532 : vector<2x32xf32>
    %534 = math.tanh %533 : vector<2x32xf32>
    %535 = arith.mulf %530, %534 : vector<2x32xf32>
    %c15_i32 = arith.constant 15 : i32
    %c0_i32_141 = arith.constant 0 : i32
    %536 = arith.addi %c0_i32_141, %c15_i32 : i32
    %537 = arith.index_cast %536 : i32 to index
    %c0_142 = arith.constant 0 : index
    %538 = vector.load %arg9[%537, %c0_142] : memref<64x128xf32, #tpu.memory_space<vmem>>, vector<1x128xf32>
    %c32_i32_143 = arith.constant 32 : i32
    %539 = arith.addi %c32_i32_143, %c15_i32 : i32
    %540 = arith.index_cast %539 : i32 to index
    %c0_144 = arith.constant 0 : index
    %541 = vector.load %arg9[%540, %c0_144] : memref<64x128xf32, #tpu.memory_space<vmem>>, vector<1x128xf32>
    %542 = tpu.concatenate %538, %541 in 0 : vector<1x128xf32>, vector<1x128xf32> -> vector<2x128xf32>
    %cst_145 = arith.constant dense<0.000000e+00> : vector<2x128xf32>
    %543 = tpu.matmul %535, %23, %cst_145 {dimension_numbers = #tpu.dot_dimension_numbers<[1], [0], [0], [1], [0, 0, 1, 1], [], []>} : vector<2x32xf32>, vector<32x128xf32>, vector<2x128xf32> -> vector<2x128xf32>
    %544 = arith.addf %542, %543 : vector<2x128xf32>
    %545 = vector.extract_strided_slice %544 {offsets = [0, 0], sizes = [2, 32], strides = [1, 1]} : vector<2x128xf32> to vector<2x32xf32>
    %546 = arith.negf %545 : vector<2x32xf32>
    %547 = math.exp %546 : vector<2x32xf32>
    %cst_146 = arith.constant 1.000000e+00 : f32
    %548 = vector.broadcast %cst_146 : f32 to vector<2x32xf32>
    %549 = arith.addf %548, %547 : vector<2x32xf32>
    %550 = arith.divf %548, %549 : vector<2x32xf32>
    %551 = vector.extract_strided_slice %544 {offsets = [0, 32], sizes = [2, 32], strides = [1, 1]} : vector<2x128xf32> to vector<2x32xf32>
    %552 = arith.negf %551 : vector<2x32xf32>
    %553 = math.exp %552 : vector<2x32xf32>
    %cst_147 = arith.constant 1.000000e+00 : f32
    %554 = vector.broadcast %cst_147 : f32 to vector<2x32xf32>
    %555 = arith.addf %554, %553 : vector<2x32xf32>
    %556 = arith.divf %554, %555 : vector<2x32xf32>
    %557 = vector.extract_strided_slice %544 {offsets = [0, 64], sizes = [2, 32], strides = [1, 1]} : vector<2x128xf32> to vector<2x32xf32>
    %558 = math.tanh %557 : vector<2x32xf32>
    %559 = vector.extract_strided_slice %544 {offsets = [0, 96], sizes = [2, 32], strides = [1, 1]} : vector<2x128xf32> to vector<2x32xf32>
    %560 = arith.negf %559 : vector<2x32xf32>
    %561 = math.exp %560 : vector<2x32xf32>
    %cst_148 = arith.constant 1.000000e+00 : f32
    %562 = vector.broadcast %cst_148 : f32 to vector<2x32xf32>
    %563 = arith.addf %562, %561 : vector<2x32xf32>
    %564 = arith.divf %562, %563 : vector<2x32xf32>
    %565 = arith.mulf %556, %533 : vector<2x32xf32>
    %566 = arith.mulf %550, %558 : vector<2x32xf32>
    %567 = arith.addf %565, %566 : vector<2x32xf32>
    %568 = math.tanh %567 : vector<2x32xf32>
    %569 = arith.mulf %564, %568 : vector<2x32xf32>
    %c16_i32 = arith.constant 16 : i32
    %c0_i32_149 = arith.constant 0 : i32
    %570 = arith.addi %c0_i32_149, %c16_i32 : i32
    %571 = arith.index_cast %570 : i32 to index
    %c0_150 = arith.constant 0 : index
    %572 = vector.load %arg9[%571, %c0_150] : memref<64x128xf32, #tpu.memory_space<vmem>>, vector<1x128xf32>
    %c32_i32_151 = arith.constant 32 : i32
    %573 = arith.addi %c32_i32_151, %c16_i32 : i32
    %574 = arith.index_cast %573 : i32 to index
    %c0_152 = arith.constant 0 : index
    %575 = vector.load %arg9[%574, %c0_152] : memref<64x128xf32, #tpu.memory_space<vmem>>, vector<1x128xf32>
    %576 = tpu.concatenate %572, %575 in 0 : vector<1x128xf32>, vector<1x128xf32> -> vector<2x128xf32>
    %cst_153 = arith.constant dense<0.000000e+00> : vector<2x128xf32>
    %577 = tpu.matmul %569, %23, %cst_153 {dimension_numbers = #tpu.dot_dimension_numbers<[1], [0], [0], [1], [0, 0, 1, 1], [], []>} : vector<2x32xf32>, vector<32x128xf32>, vector<2x128xf32> -> vector<2x128xf32>
    %578 = arith.addf %576, %577 : vector<2x128xf32>
    %579 = vector.extract_strided_slice %578 {offsets = [0, 0], sizes = [2, 32], strides = [1, 1]} : vector<2x128xf32> to vector<2x32xf32>
    %580 = arith.negf %579 : vector<2x32xf32>
    %581 = math.exp %580 : vector<2x32xf32>
    %cst_154 = arith.constant 1.000000e+00 : f32
    %582 = vector.broadcast %cst_154 : f32 to vector<2x32xf32>
    %583 = arith.addf %582, %581 : vector<2x32xf32>
    %584 = arith.divf %582, %583 : vector<2x32xf32>
    %585 = vector.extract_strided_slice %578 {offsets = [0, 32], sizes = [2, 32], strides = [1, 1]} : vector<2x128xf32> to vector<2x32xf32>
    %586 = arith.negf %585 : vector<2x32xf32>
    %587 = math.exp %586 : vector<2x32xf32>
    %cst_155 = arith.constant 1.000000e+00 : f32
    %588 = vector.broadcast %cst_155 : f32 to vector<2x32xf32>
    %589 = arith.addf %588, %587 : vector<2x32xf32>
    %590 = arith.divf %588, %589 : vector<2x32xf32>
    %591 = vector.extract_strided_slice %578 {offsets = [0, 64], sizes = [2, 32], strides = [1, 1]} : vector<2x128xf32> to vector<2x32xf32>
    %592 = math.tanh %591 : vector<2x32xf32>
    %593 = vector.extract_strided_slice %578 {offsets = [0, 96], sizes = [2, 32], strides = [1, 1]} : vector<2x128xf32> to vector<2x32xf32>
    %594 = arith.negf %593 : vector<2x32xf32>
    %595 = math.exp %594 : vector<2x32xf32>
    %cst_156 = arith.constant 1.000000e+00 : f32
    %596 = vector.broadcast %cst_156 : f32 to vector<2x32xf32>
    %597 = arith.addf %596, %595 : vector<2x32xf32>
    %598 = arith.divf %596, %597 : vector<2x32xf32>
    %599 = arith.mulf %590, %567 : vector<2x32xf32>
    %600 = arith.mulf %584, %592 : vector<2x32xf32>
    %601 = arith.addf %599, %600 : vector<2x32xf32>
    %602 = math.tanh %601 : vector<2x32xf32>
    %603 = arith.mulf %598, %602 : vector<2x32xf32>
    %c17_i32 = arith.constant 17 : i32
    %c0_i32_157 = arith.constant 0 : i32
    %604 = arith.addi %c0_i32_157, %c17_i32 : i32
    %605 = arith.index_cast %604 : i32 to index
    %c0_158 = arith.constant 0 : index
    %606 = vector.load %arg9[%605, %c0_158] : memref<64x128xf32, #tpu.memory_space<vmem>>, vector<1x128xf32>
    %c32_i32_159 = arith.constant 32 : i32
    %607 = arith.addi %c32_i32_159, %c17_i32 : i32
    %608 = arith.index_cast %607 : i32 to index
    %c0_160 = arith.constant 0 : index
    %609 = vector.load %arg9[%608, %c0_160] : memref<64x128xf32, #tpu.memory_space<vmem>>, vector<1x128xf32>
    %610 = tpu.concatenate %606, %609 in 0 : vector<1x128xf32>, vector<1x128xf32> -> vector<2x128xf32>
    %cst_161 = arith.constant dense<0.000000e+00> : vector<2x128xf32>
    %611 = tpu.matmul %603, %23, %cst_161 {dimension_numbers = #tpu.dot_dimension_numbers<[1], [0], [0], [1], [0, 0, 1, 1], [], []>} : vector<2x32xf32>, vector<32x128xf32>, vector<2x128xf32> -> vector<2x128xf32>
    %612 = arith.addf %610, %611 : vector<2x128xf32>
    %613 = vector.extract_strided_slice %612 {offsets = [0, 0], sizes = [2, 32], strides = [1, 1]} : vector<2x128xf32> to vector<2x32xf32>
    %614 = arith.negf %613 : vector<2x32xf32>
    %615 = math.exp %614 : vector<2x32xf32>
    %cst_162 = arith.constant 1.000000e+00 : f32
    %616 = vector.broadcast %cst_162 : f32 to vector<2x32xf32>
    %617 = arith.addf %616, %615 : vector<2x32xf32>
    %618 = arith.divf %616, %617 : vector<2x32xf32>
    %619 = vector.extract_strided_slice %612 {offsets = [0, 32], sizes = [2, 32], strides = [1, 1]} : vector<2x128xf32> to vector<2x32xf32>
    %620 = arith.negf %619 : vector<2x32xf32>
    %621 = math.exp %620 : vector<2x32xf32>
    %cst_163 = arith.constant 1.000000e+00 : f32
    %622 = vector.broadcast %cst_163 : f32 to vector<2x32xf32>
    %623 = arith.addf %622, %621 : vector<2x32xf32>
    %624 = arith.divf %622, %623 : vector<2x32xf32>
    %625 = vector.extract_strided_slice %612 {offsets = [0, 64], sizes = [2, 32], strides = [1, 1]} : vector<2x128xf32> to vector<2x32xf32>
    %626 = math.tanh %625 : vector<2x32xf32>
    %627 = vector.extract_strided_slice %612 {offsets = [0, 96], sizes = [2, 32], strides = [1, 1]} : vector<2x128xf32> to vector<2x32xf32>
    %628 = arith.negf %627 : vector<2x32xf32>
    %629 = math.exp %628 : vector<2x32xf32>
    %cst_164 = arith.constant 1.000000e+00 : f32
    %630 = vector.broadcast %cst_164 : f32 to vector<2x32xf32>
    %631 = arith.addf %630, %629 : vector<2x32xf32>
    %632 = arith.divf %630, %631 : vector<2x32xf32>
    %633 = arith.mulf %624, %601 : vector<2x32xf32>
    %634 = arith.mulf %618, %626 : vector<2x32xf32>
    %635 = arith.addf %633, %634 : vector<2x32xf32>
    %636 = math.tanh %635 : vector<2x32xf32>
    %637 = arith.mulf %632, %636 : vector<2x32xf32>
    %c18_i32 = arith.constant 18 : i32
    %c0_i32_165 = arith.constant 0 : i32
    %638 = arith.addi %c0_i32_165, %c18_i32 : i32
    %639 = arith.index_cast %638 : i32 to index
    %c0_166 = arith.constant 0 : index
    %640 = vector.load %arg9[%639, %c0_166] : memref<64x128xf32, #tpu.memory_space<vmem>>, vector<1x128xf32>
    %c32_i32_167 = arith.constant 32 : i32
    %641 = arith.addi %c32_i32_167, %c18_i32 : i32
    %642 = arith.index_cast %641 : i32 to index
    %c0_168 = arith.constant 0 : index
    %643 = vector.load %arg9[%642, %c0_168] : memref<64x128xf32, #tpu.memory_space<vmem>>, vector<1x128xf32>
    %644 = tpu.concatenate %640, %643 in 0 : vector<1x128xf32>, vector<1x128xf32> -> vector<2x128xf32>
    %cst_169 = arith.constant dense<0.000000e+00> : vector<2x128xf32>
    %645 = tpu.matmul %637, %23, %cst_169 {dimension_numbers = #tpu.dot_dimension_numbers<[1], [0], [0], [1], [0, 0, 1, 1], [], []>} : vector<2x32xf32>, vector<32x128xf32>, vector<2x128xf32> -> vector<2x128xf32>
    %646 = arith.addf %644, %645 : vector<2x128xf32>
    %647 = vector.extract_strided_slice %646 {offsets = [0, 0], sizes = [2, 32], strides = [1, 1]} : vector<2x128xf32> to vector<2x32xf32>
    %648 = arith.negf %647 : vector<2x32xf32>
    %649 = math.exp %648 : vector<2x32xf32>
    %cst_170 = arith.constant 1.000000e+00 : f32
    %650 = vector.broadcast %cst_170 : f32 to vector<2x32xf32>
    %651 = arith.addf %650, %649 : vector<2x32xf32>
    %652 = arith.divf %650, %651 : vector<2x32xf32>
    %653 = vector.extract_strided_slice %646 {offsets = [0, 32], sizes = [2, 32], strides = [1, 1]} : vector<2x128xf32> to vector<2x32xf32>
    %654 = arith.negf %653 : vector<2x32xf32>
    %655 = math.exp %654 : vector<2x32xf32>
    %cst_171 = arith.constant 1.000000e+00 : f32
    %656 = vector.broadcast %cst_171 : f32 to vector<2x32xf32>
    %657 = arith.addf %656, %655 : vector<2x32xf32>
    %658 = arith.divf %656, %657 : vector<2x32xf32>
    %659 = vector.extract_strided_slice %646 {offsets = [0, 64], sizes = [2, 32], strides = [1, 1]} : vector<2x128xf32> to vector<2x32xf32>
    %660 = math.tanh %659 : vector<2x32xf32>
    %661 = vector.extract_strided_slice %646 {offsets = [0, 96], sizes = [2, 32], strides = [1, 1]} : vector<2x128xf32> to vector<2x32xf32>
    %662 = arith.negf %661 : vector<2x32xf32>
    %663 = math.exp %662 : vector<2x32xf32>
    %cst_172 = arith.constant 1.000000e+00 : f32
    %664 = vector.broadcast %cst_172 : f32 to vector<2x32xf32>
    %665 = arith.addf %664, %663 : vector<2x32xf32>
    %666 = arith.divf %664, %665 : vector<2x32xf32>
    %667 = arith.mulf %658, %635 : vector<2x32xf32>
    %668 = arith.mulf %652, %660 : vector<2x32xf32>
    %669 = arith.addf %667, %668 : vector<2x32xf32>
    %670 = math.tanh %669 : vector<2x32xf32>
    %671 = arith.mulf %666, %670 : vector<2x32xf32>
    %c19_i32 = arith.constant 19 : i32
    %c0_i32_173 = arith.constant 0 : i32
    %672 = arith.addi %c0_i32_173, %c19_i32 : i32
    %673 = arith.index_cast %672 : i32 to index
    %c0_174 = arith.constant 0 : index
    %674 = vector.load %arg9[%673, %c0_174] : memref<64x128xf32, #tpu.memory_space<vmem>>, vector<1x128xf32>
    %c32_i32_175 = arith.constant 32 : i32
    %675 = arith.addi %c32_i32_175, %c19_i32 : i32
    %676 = arith.index_cast %675 : i32 to index
    %c0_176 = arith.constant 0 : index
    %677 = vector.load %arg9[%676, %c0_176] : memref<64x128xf32, #tpu.memory_space<vmem>>, vector<1x128xf32>
    %678 = tpu.concatenate %674, %677 in 0 : vector<1x128xf32>, vector<1x128xf32> -> vector<2x128xf32>
    %cst_177 = arith.constant dense<0.000000e+00> : vector<2x128xf32>
    %679 = tpu.matmul %671, %23, %cst_177 {dimension_numbers = #tpu.dot_dimension_numbers<[1], [0], [0], [1], [0, 0, 1, 1], [], []>} : vector<2x32xf32>, vector<32x128xf32>, vector<2x128xf32> -> vector<2x128xf32>
    %680 = arith.addf %678, %679 : vector<2x128xf32>
    %681 = vector.extract_strided_slice %680 {offsets = [0, 0], sizes = [2, 32], strides = [1, 1]} : vector<2x128xf32> to vector<2x32xf32>
    %682 = arith.negf %681 : vector<2x32xf32>
    %683 = math.exp %682 : vector<2x32xf32>
    %cst_178 = arith.constant 1.000000e+00 : f32
    %684 = vector.broadcast %cst_178 : f32 to vector<2x32xf32>
    %685 = arith.addf %684, %683 : vector<2x32xf32>
    %686 = arith.divf %684, %685 : vector<2x32xf32>
    %687 = vector.extract_strided_slice %680 {offsets = [0, 32], sizes = [2, 32], strides = [1, 1]} : vector<2x128xf32> to vector<2x32xf32>
    %688 = arith.negf %687 : vector<2x32xf32>
    %689 = math.exp %688 : vector<2x32xf32>
    %cst_179 = arith.constant 1.000000e+00 : f32
    %690 = vector.broadcast %cst_179 : f32 to vector<2x32xf32>
    %691 = arith.addf %690, %689 : vector<2x32xf32>
    %692 = arith.divf %690, %691 : vector<2x32xf32>
    %693 = vector.extract_strided_slice %680 {offsets = [0, 64], sizes = [2, 32], strides = [1, 1]} : vector<2x128xf32> to vector<2x32xf32>
    %694 = math.tanh %693 : vector<2x32xf32>
    %695 = vector.extract_strided_slice %680 {offsets = [0, 96], sizes = [2, 32], strides = [1, 1]} : vector<2x128xf32> to vector<2x32xf32>
    %696 = arith.negf %695 : vector<2x32xf32>
    %697 = math.exp %696 : vector<2x32xf32>
    %cst_180 = arith.constant 1.000000e+00 : f32
    %698 = vector.broadcast %cst_180 : f32 to vector<2x32xf32>
    %699 = arith.addf %698, %697 : vector<2x32xf32>
    %700 = arith.divf %698, %699 : vector<2x32xf32>
    %701 = arith.mulf %692, %669 : vector<2x32xf32>
    %702 = arith.mulf %686, %694 : vector<2x32xf32>
    %703 = arith.addf %701, %702 : vector<2x32xf32>
    %704 = math.tanh %703 : vector<2x32xf32>
    %705 = arith.mulf %700, %704 : vector<2x32xf32>
    %c20_i32 = arith.constant 20 : i32
    %c0_i32_181 = arith.constant 0 : i32
    %706 = arith.addi %c0_i32_181, %c20_i32 : i32
    %707 = arith.index_cast %706 : i32 to index
    %c0_182 = arith.constant 0 : index
    %708 = vector.load %arg9[%707, %c0_182] : memref<64x128xf32, #tpu.memory_space<vmem>>, vector<1x128xf32>
    %c32_i32_183 = arith.constant 32 : i32
    %709 = arith.addi %c32_i32_183, %c20_i32 : i32
    %710 = arith.index_cast %709 : i32 to index
    %c0_184 = arith.constant 0 : index
    %711 = vector.load %arg9[%710, %c0_184] : memref<64x128xf32, #tpu.memory_space<vmem>>, vector<1x128xf32>
    %712 = tpu.concatenate %708, %711 in 0 : vector<1x128xf32>, vector<1x128xf32> -> vector<2x128xf32>
    %cst_185 = arith.constant dense<0.000000e+00> : vector<2x128xf32>
    %713 = tpu.matmul %705, %23, %cst_185 {dimension_numbers = #tpu.dot_dimension_numbers<[1], [0], [0], [1], [0, 0, 1, 1], [], []>} : vector<2x32xf32>, vector<32x128xf32>, vector<2x128xf32> -> vector<2x128xf32>
    %714 = arith.addf %712, %713 : vector<2x128xf32>
    %715 = vector.extract_strided_slice %714 {offsets = [0, 0], sizes = [2, 32], strides = [1, 1]} : vector<2x128xf32> to vector<2x32xf32>
    %716 = arith.negf %715 : vector<2x32xf32>
    %717 = math.exp %716 : vector<2x32xf32>
    %cst_186 = arith.constant 1.000000e+00 : f32
    %718 = vector.broadcast %cst_186 : f32 to vector<2x32xf32>
    %719 = arith.addf %718, %717 : vector<2x32xf32>
    %720 = arith.divf %718, %719 : vector<2x32xf32>
    %721 = vector.extract_strided_slice %714 {offsets = [0, 32], sizes = [2, 32], strides = [1, 1]} : vector<2x128xf32> to vector<2x32xf32>
    %722 = arith.negf %721 : vector<2x32xf32>
    %723 = math.exp %722 : vector<2x32xf32>
    %cst_187 = arith.constant 1.000000e+00 : f32
    %724 = vector.broadcast %cst_187 : f32 to vector<2x32xf32>
    %725 = arith.addf %724, %723 : vector<2x32xf32>
    %726 = arith.divf %724, %725 : vector<2x32xf32>
    %727 = vector.extract_strided_slice %714 {offsets = [0, 64], sizes = [2, 32], strides = [1, 1]} : vector<2x128xf32> to vector<2x32xf32>
    %728 = math.tanh %727 : vector<2x32xf32>
    %729 = vector.extract_strided_slice %714 {offsets = [0, 96], sizes = [2, 32], strides = [1, 1]} : vector<2x128xf32> to vector<2x32xf32>
    %730 = arith.negf %729 : vector<2x32xf32>
    %731 = math.exp %730 : vector<2x32xf32>
    %cst_188 = arith.constant 1.000000e+00 : f32
    %732 = vector.broadcast %cst_188 : f32 to vector<2x32xf32>
    %733 = arith.addf %732, %731 : vector<2x32xf32>
    %734 = arith.divf %732, %733 : vector<2x32xf32>
    %735 = arith.mulf %726, %703 : vector<2x32xf32>
    %736 = arith.mulf %720, %728 : vector<2x32xf32>
    %737 = arith.addf %735, %736 : vector<2x32xf32>
    %738 = math.tanh %737 : vector<2x32xf32>
    %739 = arith.mulf %734, %738 : vector<2x32xf32>
    %c21_i32 = arith.constant 21 : i32
    %c0_i32_189 = arith.constant 0 : i32
    %740 = arith.addi %c0_i32_189, %c21_i32 : i32
    %741 = arith.index_cast %740 : i32 to index
    %c0_190 = arith.constant 0 : index
    %742 = vector.load %arg9[%741, %c0_190] : memref<64x128xf32, #tpu.memory_space<vmem>>, vector<1x128xf32>
    %c32_i32_191 = arith.constant 32 : i32
    %743 = arith.addi %c32_i32_191, %c21_i32 : i32
    %744 = arith.index_cast %743 : i32 to index
    %c0_192 = arith.constant 0 : index
    %745 = vector.load %arg9[%744, %c0_192] : memref<64x128xf32, #tpu.memory_space<vmem>>, vector<1x128xf32>
    %746 = tpu.concatenate %742, %745 in 0 : vector<1x128xf32>, vector<1x128xf32> -> vector<2x128xf32>
    %cst_193 = arith.constant dense<0.000000e+00> : vector<2x128xf32>
    %747 = tpu.matmul %739, %23, %cst_193 {dimension_numbers = #tpu.dot_dimension_numbers<[1], [0], [0], [1], [0, 0, 1, 1], [], []>} : vector<2x32xf32>, vector<32x128xf32>, vector<2x128xf32> -> vector<2x128xf32>
    %748 = arith.addf %746, %747 : vector<2x128xf32>
    %749 = vector.extract_strided_slice %748 {offsets = [0, 0], sizes = [2, 32], strides = [1, 1]} : vector<2x128xf32> to vector<2x32xf32>
    %750 = arith.negf %749 : vector<2x32xf32>
    %751 = math.exp %750 : vector<2x32xf32>
    %cst_194 = arith.constant 1.000000e+00 : f32
    %752 = vector.broadcast %cst_194 : f32 to vector<2x32xf32>
    %753 = arith.addf %752, %751 : vector<2x32xf32>
    %754 = arith.divf %752, %753 : vector<2x32xf32>
    %755 = vector.extract_strided_slice %748 {offsets = [0, 32], sizes = [2, 32], strides = [1, 1]} : vector<2x128xf32> to vector<2x32xf32>
    %756 = arith.negf %755 : vector<2x32xf32>
    %757 = math.exp %756 : vector<2x32xf32>
    %cst_195 = arith.constant 1.000000e+00 : f32
    %758 = vector.broadcast %cst_195 : f32 to vector<2x32xf32>
    %759 = arith.addf %758, %757 : vector<2x32xf32>
    %760 = arith.divf %758, %759 : vector<2x32xf32>
    %761 = vector.extract_strided_slice %748 {offsets = [0, 64], sizes = [2, 32], strides = [1, 1]} : vector<2x128xf32> to vector<2x32xf32>
    %762 = math.tanh %761 : vector<2x32xf32>
    %763 = vector.extract_strided_slice %748 {offsets = [0, 96], sizes = [2, 32], strides = [1, 1]} : vector<2x128xf32> to vector<2x32xf32>
    %764 = arith.negf %763 : vector<2x32xf32>
    %765 = math.exp %764 : vector<2x32xf32>
    %cst_196 = arith.constant 1.000000e+00 : f32
    %766 = vector.broadcast %cst_196 : f32 to vector<2x32xf32>
    %767 = arith.addf %766, %765 : vector<2x32xf32>
    %768 = arith.divf %766, %767 : vector<2x32xf32>
    %769 = arith.mulf %760, %737 : vector<2x32xf32>
    %770 = arith.mulf %754, %762 : vector<2x32xf32>
    %771 = arith.addf %769, %770 : vector<2x32xf32>
    %772 = math.tanh %771 : vector<2x32xf32>
    %773 = arith.mulf %768, %772 : vector<2x32xf32>
    %c22_i32 = arith.constant 22 : i32
    %c0_i32_197 = arith.constant 0 : i32
    %774 = arith.addi %c0_i32_197, %c22_i32 : i32
    %775 = arith.index_cast %774 : i32 to index
    %c0_198 = arith.constant 0 : index
    %776 = vector.load %arg9[%775, %c0_198] : memref<64x128xf32, #tpu.memory_space<vmem>>, vector<1x128xf32>
    %c32_i32_199 = arith.constant 32 : i32
    %777 = arith.addi %c32_i32_199, %c22_i32 : i32
    %778 = arith.index_cast %777 : i32 to index
    %c0_200 = arith.constant 0 : index
    %779 = vector.load %arg9[%778, %c0_200] : memref<64x128xf32, #tpu.memory_space<vmem>>, vector<1x128xf32>
    %780 = tpu.concatenate %776, %779 in 0 : vector<1x128xf32>, vector<1x128xf32> -> vector<2x128xf32>
    %cst_201 = arith.constant dense<0.000000e+00> : vector<2x128xf32>
    %781 = tpu.matmul %773, %23, %cst_201 {dimension_numbers = #tpu.dot_dimension_numbers<[1], [0], [0], [1], [0, 0, 1, 1], [], []>} : vector<2x32xf32>, vector<32x128xf32>, vector<2x128xf32> -> vector<2x128xf32>
    %782 = arith.addf %780, %781 : vector<2x128xf32>
    %783 = vector.extract_strided_slice %782 {offsets = [0, 0], sizes = [2, 32], strides = [1, 1]} : vector<2x128xf32> to vector<2x32xf32>
    %784 = arith.negf %783 : vector<2x32xf32>
    %785 = math.exp %784 : vector<2x32xf32>
    %cst_202 = arith.constant 1.000000e+00 : f32
    %786 = vector.broadcast %cst_202 : f32 to vector<2x32xf32>
    %787 = arith.addf %786, %785 : vector<2x32xf32>
    %788 = arith.divf %786, %787 : vector<2x32xf32>
    %789 = vector.extract_strided_slice %782 {offsets = [0, 32], sizes = [2, 32], strides = [1, 1]} : vector<2x128xf32> to vector<2x32xf32>
    %790 = arith.negf %789 : vector<2x32xf32>
    %791 = math.exp %790 : vector<2x32xf32>
    %cst_203 = arith.constant 1.000000e+00 : f32
    %792 = vector.broadcast %cst_203 : f32 to vector<2x32xf32>
    %793 = arith.addf %792, %791 : vector<2x32xf32>
    %794 = arith.divf %792, %793 : vector<2x32xf32>
    %795 = vector.extract_strided_slice %782 {offsets = [0, 64], sizes = [2, 32], strides = [1, 1]} : vector<2x128xf32> to vector<2x32xf32>
    %796 = math.tanh %795 : vector<2x32xf32>
    %797 = vector.extract_strided_slice %782 {offsets = [0, 96], sizes = [2, 32], strides = [1, 1]} : vector<2x128xf32> to vector<2x32xf32>
    %798 = arith.negf %797 : vector<2x32xf32>
    %799 = math.exp %798 : vector<2x32xf32>
    %cst_204 = arith.constant 1.000000e+00 : f32
    %800 = vector.broadcast %cst_204 : f32 to vector<2x32xf32>
    %801 = arith.addf %800, %799 : vector<2x32xf32>
    %802 = arith.divf %800, %801 : vector<2x32xf32>
    %803 = arith.mulf %794, %771 : vector<2x32xf32>
    %804 = arith.mulf %788, %796 : vector<2x32xf32>
    %805 = arith.addf %803, %804 : vector<2x32xf32>
    %806 = math.tanh %805 : vector<2x32xf32>
    %807 = arith.mulf %802, %806 : vector<2x32xf32>
    %c23_i32 = arith.constant 23 : i32
    %c0_i32_205 = arith.constant 0 : i32
    %808 = arith.addi %c0_i32_205, %c23_i32 : i32
    %809 = arith.index_cast %808 : i32 to index
    %c0_206 = arith.constant 0 : index
    %810 = vector.load %arg9[%809, %c0_206] : memref<64x128xf32, #tpu.memory_space<vmem>>, vector<1x128xf32>
    %c32_i32_207 = arith.constant 32 : i32
    %811 = arith.addi %c32_i32_207, %c23_i32 : i32
    %812 = arith.index_cast %811 : i32 to index
    %c0_208 = arith.constant 0 : index
    %813 = vector.load %arg9[%812, %c0_208] : memref<64x128xf32, #tpu.memory_space<vmem>>, vector<1x128xf32>
    %814 = tpu.concatenate %810, %813 in 0 : vector<1x128xf32>, vector<1x128xf32> -> vector<2x128xf32>
    %cst_209 = arith.constant dense<0.000000e+00> : vector<2x128xf32>
    %815 = tpu.matmul %807, %23, %cst_209 {dimension_numbers = #tpu.dot_dimension_numbers<[1], [0], [0], [1], [0, 0, 1, 1], [], []>} : vector<2x32xf32>, vector<32x128xf32>, vector<2x128xf32> -> vector<2x128xf32>
    %816 = arith.addf %814, %815 : vector<2x128xf32>
    %817 = vector.extract_strided_slice %816 {offsets = [0, 0], sizes = [2, 32], strides = [1, 1]} : vector<2x128xf32> to vector<2x32xf32>
    %818 = arith.negf %817 : vector<2x32xf32>
    %819 = math.exp %818 : vector<2x32xf32>
    %cst_210 = arith.constant 1.000000e+00 : f32
    %820 = vector.broadcast %cst_210 : f32 to vector<2x32xf32>
    %821 = arith.addf %820, %819 : vector<2x32xf32>
    %822 = arith.divf %820, %821 : vector<2x32xf32>
    %823 = vector.extract_strided_slice %816 {offsets = [0, 32], sizes = [2, 32], strides = [1, 1]} : vector<2x128xf32> to vector<2x32xf32>
    %824 = arith.negf %823 : vector<2x32xf32>
    %825 = math.exp %824 : vector<2x32xf32>
    %cst_211 = arith.constant 1.000000e+00 : f32
    %826 = vector.broadcast %cst_211 : f32 to vector<2x32xf32>
    %827 = arith.addf %826, %825 : vector<2x32xf32>
    %828 = arith.divf %826, %827 : vector<2x32xf32>
    %829 = vector.extract_strided_slice %816 {offsets = [0, 64], sizes = [2, 32], strides = [1, 1]} : vector<2x128xf32> to vector<2x32xf32>
    %830 = math.tanh %829 : vector<2x32xf32>
    %831 = vector.extract_strided_slice %816 {offsets = [0, 96], sizes = [2, 32], strides = [1, 1]} : vector<2x128xf32> to vector<2x32xf32>
    %832 = arith.negf %831 : vector<2x32xf32>
    %833 = math.exp %832 : vector<2x32xf32>
    %cst_212 = arith.constant 1.000000e+00 : f32
    %834 = vector.broadcast %cst_212 : f32 to vector<2x32xf32>
    %835 = arith.addf %834, %833 : vector<2x32xf32>
    %836 = arith.divf %834, %835 : vector<2x32xf32>
    %837 = arith.mulf %828, %805 : vector<2x32xf32>
    %838 = arith.mulf %822, %830 : vector<2x32xf32>
    %839 = arith.addf %837, %838 : vector<2x32xf32>
    %840 = math.tanh %839 : vector<2x32xf32>
    %841 = arith.mulf %836, %840 : vector<2x32xf32>
    %c24_i32 = arith.constant 24 : i32
    %c0_i32_213 = arith.constant 0 : i32
    %842 = arith.addi %c0_i32_213, %c24_i32 : i32
    %843 = arith.index_cast %842 : i32 to index
    %c0_214 = arith.constant 0 : index
    %844 = vector.load %arg9[%843, %c0_214] : memref<64x128xf32, #tpu.memory_space<vmem>>, vector<1x128xf32>
    %c32_i32_215 = arith.constant 32 : i32
    %845 = arith.addi %c32_i32_215, %c24_i32 : i32
    %846 = arith.index_cast %845 : i32 to index
    %c0_216 = arith.constant 0 : index
    %847 = vector.load %arg9[%846, %c0_216] : memref<64x128xf32, #tpu.memory_space<vmem>>, vector<1x128xf32>
    %848 = tpu.concatenate %844, %847 in 0 : vector<1x128xf32>, vector<1x128xf32> -> vector<2x128xf32>
    %cst_217 = arith.constant dense<0.000000e+00> : vector<2x128xf32>
    %849 = tpu.matmul %841, %23, %cst_217 {dimension_numbers = #tpu.dot_dimension_numbers<[1], [0], [0], [1], [0, 0, 1, 1], [], []>} : vector<2x32xf32>, vector<32x128xf32>, vector<2x128xf32> -> vector<2x128xf32>
    %850 = arith.addf %848, %849 : vector<2x128xf32>
    %851 = vector.extract_strided_slice %850 {offsets = [0, 0], sizes = [2, 32], strides = [1, 1]} : vector<2x128xf32> to vector<2x32xf32>
    %852 = arith.negf %851 : vector<2x32xf32>
    %853 = math.exp %852 : vector<2x32xf32>
    %cst_218 = arith.constant 1.000000e+00 : f32
    %854 = vector.broadcast %cst_218 : f32 to vector<2x32xf32>
    %855 = arith.addf %854, %853 : vector<2x32xf32>
    %856 = arith.divf %854, %855 : vector<2x32xf32>
    %857 = vector.extract_strided_slice %850 {offsets = [0, 32], sizes = [2, 32], strides = [1, 1]} : vector<2x128xf32> to vector<2x32xf32>
    %858 = arith.negf %857 : vector<2x32xf32>
    %859 = math.exp %858 : vector<2x32xf32>
    %cst_219 = arith.constant 1.000000e+00 : f32
    %860 = vector.broadcast %cst_219 : f32 to vector<2x32xf32>
    %861 = arith.addf %860, %859 : vector<2x32xf32>
    %862 = arith.divf %860, %861 : vector<2x32xf32>
    %863 = vector.extract_strided_slice %850 {offsets = [0, 64], sizes = [2, 32], strides = [1, 1]} : vector<2x128xf32> to vector<2x32xf32>
    %864 = math.tanh %863 : vector<2x32xf32>
    %865 = vector.extract_strided_slice %850 {offsets = [0, 96], sizes = [2, 32], strides = [1, 1]} : vector<2x128xf32> to vector<2x32xf32>
    %866 = arith.negf %865 : vector<2x32xf32>
    %867 = math.exp %866 : vector<2x32xf32>
    %cst_220 = arith.constant 1.000000e+00 : f32
    %868 = vector.broadcast %cst_220 : f32 to vector<2x32xf32>
    %869 = arith.addf %868, %867 : vector<2x32xf32>
    %870 = arith.divf %868, %869 : vector<2x32xf32>
    %871 = arith.mulf %862, %839 : vector<2x32xf32>
    %872 = arith.mulf %856, %864 : vector<2x32xf32>
    %873 = arith.addf %871, %872 : vector<2x32xf32>
    %874 = math.tanh %873 : vector<2x32xf32>
    %875 = arith.mulf %870, %874 : vector<2x32xf32>
    %c25_i32 = arith.constant 25 : i32
    %c0_i32_221 = arith.constant 0 : i32
    %876 = arith.addi %c0_i32_221, %c25_i32 : i32
    %877 = arith.index_cast %876 : i32 to index
    %c0_222 = arith.constant 0 : index
    %878 = vector.load %arg9[%877, %c0_222] : memref<64x128xf32, #tpu.memory_space<vmem>>, vector<1x128xf32>
    %c32_i32_223 = arith.constant 32 : i32
    %879 = arith.addi %c32_i32_223, %c25_i32 : i32
    %880 = arith.index_cast %879 : i32 to index
    %c0_224 = arith.constant 0 : index
    %881 = vector.load %arg9[%880, %c0_224] : memref<64x128xf32, #tpu.memory_space<vmem>>, vector<1x128xf32>
    %882 = tpu.concatenate %878, %881 in 0 : vector<1x128xf32>, vector<1x128xf32> -> vector<2x128xf32>
    %cst_225 = arith.constant dense<0.000000e+00> : vector<2x128xf32>
    %883 = tpu.matmul %875, %23, %cst_225 {dimension_numbers = #tpu.dot_dimension_numbers<[1], [0], [0], [1], [0, 0, 1, 1], [], []>} : vector<2x32xf32>, vector<32x128xf32>, vector<2x128xf32> -> vector<2x128xf32>
    %884 = arith.addf %882, %883 : vector<2x128xf32>
    %885 = vector.extract_strided_slice %884 {offsets = [0, 0], sizes = [2, 32], strides = [1, 1]} : vector<2x128xf32> to vector<2x32xf32>
    %886 = arith.negf %885 : vector<2x32xf32>
    %887 = math.exp %886 : vector<2x32xf32>
    %cst_226 = arith.constant 1.000000e+00 : f32
    %888 = vector.broadcast %cst_226 : f32 to vector<2x32xf32>
    %889 = arith.addf %888, %887 : vector<2x32xf32>
    %890 = arith.divf %888, %889 : vector<2x32xf32>
    %891 = vector.extract_strided_slice %884 {offsets = [0, 32], sizes = [2, 32], strides = [1, 1]} : vector<2x128xf32> to vector<2x32xf32>
    %892 = arith.negf %891 : vector<2x32xf32>
    %893 = math.exp %892 : vector<2x32xf32>
    %cst_227 = arith.constant 1.000000e+00 : f32
    %894 = vector.broadcast %cst_227 : f32 to vector<2x32xf32>
    %895 = arith.addf %894, %893 : vector<2x32xf32>
    %896 = arith.divf %894, %895 : vector<2x32xf32>
    %897 = vector.extract_strided_slice %884 {offsets = [0, 64], sizes = [2, 32], strides = [1, 1]} : vector<2x128xf32> to vector<2x32xf32>
    %898 = math.tanh %897 : vector<2x32xf32>
    %899 = vector.extract_strided_slice %884 {offsets = [0, 96], sizes = [2, 32], strides = [1, 1]} : vector<2x128xf32> to vector<2x32xf32>
    %900 = arith.negf %899 : vector<2x32xf32>
    %901 = math.exp %900 : vector<2x32xf32>
    %cst_228 = arith.constant 1.000000e+00 : f32
    %902 = vector.broadcast %cst_228 : f32 to vector<2x32xf32>
    %903 = arith.addf %902, %901 : vector<2x32xf32>
    %904 = arith.divf %902, %903 : vector<2x32xf32>
    %905 = arith.mulf %896, %873 : vector<2x32xf32>
    %906 = arith.mulf %890, %898 : vector<2x32xf32>
    %907 = arith.addf %905, %906 : vector<2x32xf32>
    %908 = math.tanh %907 : vector<2x32xf32>
    %909 = arith.mulf %904, %908 : vector<2x32xf32>
    %c26_i32 = arith.constant 26 : i32
    %c0_i32_229 = arith.constant 0 : i32
    %910 = arith.addi %c0_i32_229, %c26_i32 : i32
    %911 = arith.index_cast %910 : i32 to index
    %c0_230 = arith.constant 0 : index
    %912 = vector.load %arg9[%911, %c0_230] : memref<64x128xf32, #tpu.memory_space<vmem>>, vector<1x128xf32>
    %c32_i32_231 = arith.constant 32 : i32
    %913 = arith.addi %c32_i32_231, %c26_i32 : i32
    %914 = arith.index_cast %913 : i32 to index
    %c0_232 = arith.constant 0 : index
    %915 = vector.load %arg9[%914, %c0_232] : memref<64x128xf32, #tpu.memory_space<vmem>>, vector<1x128xf32>
    %916 = tpu.concatenate %912, %915 in 0 : vector<1x128xf32>, vector<1x128xf32> -> vector<2x128xf32>
    %cst_233 = arith.constant dense<0.000000e+00> : vector<2x128xf32>
    %917 = tpu.matmul %909, %23, %cst_233 {dimension_numbers = #tpu.dot_dimension_numbers<[1], [0], [0], [1], [0, 0, 1, 1], [], []>} : vector<2x32xf32>, vector<32x128xf32>, vector<2x128xf32> -> vector<2x128xf32>
    %918 = arith.addf %916, %917 : vector<2x128xf32>
    %919 = vector.extract_strided_slice %918 {offsets = [0, 0], sizes = [2, 32], strides = [1, 1]} : vector<2x128xf32> to vector<2x32xf32>
    %920 = arith.negf %919 : vector<2x32xf32>
    %921 = math.exp %920 : vector<2x32xf32>
    %cst_234 = arith.constant 1.000000e+00 : f32
    %922 = vector.broadcast %cst_234 : f32 to vector<2x32xf32>
    %923 = arith.addf %922, %921 : vector<2x32xf32>
    %924 = arith.divf %922, %923 : vector<2x32xf32>
    %925 = vector.extract_strided_slice %918 {offsets = [0, 32], sizes = [2, 32], strides = [1, 1]} : vector<2x128xf32> to vector<2x32xf32>
    %926 = arith.negf %925 : vector<2x32xf32>
    %927 = math.exp %926 : vector<2x32xf32>
    %cst_235 = arith.constant 1.000000e+00 : f32
    %928 = vector.broadcast %cst_235 : f32 to vector<2x32xf32>
    %929 = arith.addf %928, %927 : vector<2x32xf32>
    %930 = arith.divf %928, %929 : vector<2x32xf32>
    %931 = vector.extract_strided_slice %918 {offsets = [0, 64], sizes = [2, 32], strides = [1, 1]} : vector<2x128xf32> to vector<2x32xf32>
    %932 = math.tanh %931 : vector<2x32xf32>
    %933 = vector.extract_strided_slice %918 {offsets = [0, 96], sizes = [2, 32], strides = [1, 1]} : vector<2x128xf32> to vector<2x32xf32>
    %934 = arith.negf %933 : vector<2x32xf32>
    %935 = math.exp %934 : vector<2x32xf32>
    %cst_236 = arith.constant 1.000000e+00 : f32
    %936 = vector.broadcast %cst_236 : f32 to vector<2x32xf32>
    %937 = arith.addf %936, %935 : vector<2x32xf32>
    %938 = arith.divf %936, %937 : vector<2x32xf32>
    %939 = arith.mulf %930, %907 : vector<2x32xf32>
    %940 = arith.mulf %924, %932 : vector<2x32xf32>
    %941 = arith.addf %939, %940 : vector<2x32xf32>
    %942 = math.tanh %941 : vector<2x32xf32>
    %943 = arith.mulf %938, %942 : vector<2x32xf32>
    %c27_i32 = arith.constant 27 : i32
    %c0_i32_237 = arith.constant 0 : i32
    %944 = arith.addi %c0_i32_237, %c27_i32 : i32
    %945 = arith.index_cast %944 : i32 to index
    %c0_238 = arith.constant 0 : index
    %946 = vector.load %arg9[%945, %c0_238] : memref<64x128xf32, #tpu.memory_space<vmem>>, vector<1x128xf32>
    %c32_i32_239 = arith.constant 32 : i32
    %947 = arith.addi %c32_i32_239, %c27_i32 : i32
    %948 = arith.index_cast %947 : i32 to index
    %c0_240 = arith.constant 0 : index
    %949 = vector.load %arg9[%948, %c0_240] : memref<64x128xf32, #tpu.memory_space<vmem>>, vector<1x128xf32>
    %950 = tpu.concatenate %946, %949 in 0 : vector<1x128xf32>, vector<1x128xf32> -> vector<2x128xf32>
    %cst_241 = arith.constant dense<0.000000e+00> : vector<2x128xf32>
    %951 = tpu.matmul %943, %23, %cst_241 {dimension_numbers = #tpu.dot_dimension_numbers<[1], [0], [0], [1], [0, 0, 1, 1], [], []>} : vector<2x32xf32>, vector<32x128xf32>, vector<2x128xf32> -> vector<2x128xf32>
    %952 = arith.addf %950, %951 : vector<2x128xf32>
    %953 = vector.extract_strided_slice %952 {offsets = [0, 0], sizes = [2, 32], strides = [1, 1]} : vector<2x128xf32> to vector<2x32xf32>
    %954 = arith.negf %953 : vector<2x32xf32>
    %955 = math.exp %954 : vector<2x32xf32>
    %cst_242 = arith.constant 1.000000e+00 : f32
    %956 = vector.broadcast %cst_242 : f32 to vector<2x32xf32>
    %957 = arith.addf %956, %955 : vector<2x32xf32>
    %958 = arith.divf %956, %957 : vector<2x32xf32>
    %959 = vector.extract_strided_slice %952 {offsets = [0, 32], sizes = [2, 32], strides = [1, 1]} : vector<2x128xf32> to vector<2x32xf32>
    %960 = arith.negf %959 : vector<2x32xf32>
    %961 = math.exp %960 : vector<2x32xf32>
    %cst_243 = arith.constant 1.000000e+00 : f32
    %962 = vector.broadcast %cst_243 : f32 to vector<2x32xf32>
    %963 = arith.addf %962, %961 : vector<2x32xf32>
    %964 = arith.divf %962, %963 : vector<2x32xf32>
    %965 = vector.extract_strided_slice %952 {offsets = [0, 64], sizes = [2, 32], strides = [1, 1]} : vector<2x128xf32> to vector<2x32xf32>
    %966 = math.tanh %965 : vector<2x32xf32>
    %967 = vector.extract_strided_slice %952 {offsets = [0, 96], sizes = [2, 32], strides = [1, 1]} : vector<2x128xf32> to vector<2x32xf32>
    %968 = arith.negf %967 : vector<2x32xf32>
    %969 = math.exp %968 : vector<2x32xf32>
    %cst_244 = arith.constant 1.000000e+00 : f32
    %970 = vector.broadcast %cst_244 : f32 to vector<2x32xf32>
    %971 = arith.addf %970, %969 : vector<2x32xf32>
    %972 = arith.divf %970, %971 : vector<2x32xf32>
    %973 = arith.mulf %964, %941 : vector<2x32xf32>
    %974 = arith.mulf %958, %966 : vector<2x32xf32>
    %975 = arith.addf %973, %974 : vector<2x32xf32>
    %976 = math.tanh %975 : vector<2x32xf32>
    %977 = arith.mulf %972, %976 : vector<2x32xf32>
    %c28_i32 = arith.constant 28 : i32
    %c0_i32_245 = arith.constant 0 : i32
    %978 = arith.addi %c0_i32_245, %c28_i32 : i32
    %979 = arith.index_cast %978 : i32 to index
    %c0_246 = arith.constant 0 : index
    %980 = vector.load %arg9[%979, %c0_246] : memref<64x128xf32, #tpu.memory_space<vmem>>, vector<1x128xf32>
    %c32_i32_247 = arith.constant 32 : i32
    %981 = arith.addi %c32_i32_247, %c28_i32 : i32
    %982 = arith.index_cast %981 : i32 to index
    %c0_248 = arith.constant 0 : index
    %983 = vector.load %arg9[%982, %c0_248] : memref<64x128xf32, #tpu.memory_space<vmem>>, vector<1x128xf32>
    %984 = tpu.concatenate %980, %983 in 0 : vector<1x128xf32>, vector<1x128xf32> -> vector<2x128xf32>
    %cst_249 = arith.constant dense<0.000000e+00> : vector<2x128xf32>
    %985 = tpu.matmul %977, %23, %cst_249 {dimension_numbers = #tpu.dot_dimension_numbers<[1], [0], [0], [1], [0, 0, 1, 1], [], []>} : vector<2x32xf32>, vector<32x128xf32>, vector<2x128xf32> -> vector<2x128xf32>
    %986 = arith.addf %984, %985 : vector<2x128xf32>
    %987 = vector.extract_strided_slice %986 {offsets = [0, 0], sizes = [2, 32], strides = [1, 1]} : vector<2x128xf32> to vector<2x32xf32>
    %988 = arith.negf %987 : vector<2x32xf32>
    %989 = math.exp %988 : vector<2x32xf32>
    %cst_250 = arith.constant 1.000000e+00 : f32
    %990 = vector.broadcast %cst_250 : f32 to vector<2x32xf32>
    %991 = arith.addf %990, %989 : vector<2x32xf32>
    %992 = arith.divf %990, %991 : vector<2x32xf32>
    %993 = vector.extract_strided_slice %986 {offsets = [0, 32], sizes = [2, 32], strides = [1, 1]} : vector<2x128xf32> to vector<2x32xf32>
    %994 = arith.negf %993 : vector<2x32xf32>
    %995 = math.exp %994 : vector<2x32xf32>
    %cst_251 = arith.constant 1.000000e+00 : f32
    %996 = vector.broadcast %cst_251 : f32 to vector<2x32xf32>
    %997 = arith.addf %996, %995 : vector<2x32xf32>
    %998 = arith.divf %996, %997 : vector<2x32xf32>
    %999 = vector.extract_strided_slice %986 {offsets = [0, 64], sizes = [2, 32], strides = [1, 1]} : vector<2x128xf32> to vector<2x32xf32>
    %1000 = math.tanh %999 : vector<2x32xf32>
    %1001 = vector.extract_strided_slice %986 {offsets = [0, 96], sizes = [2, 32], strides = [1, 1]} : vector<2x128xf32> to vector<2x32xf32>
    %1002 = arith.negf %1001 : vector<2x32xf32>
    %1003 = math.exp %1002 : vector<2x32xf32>
    %cst_252 = arith.constant 1.000000e+00 : f32
    %1004 = vector.broadcast %cst_252 : f32 to vector<2x32xf32>
    %1005 = arith.addf %1004, %1003 : vector<2x32xf32>
    %1006 = arith.divf %1004, %1005 : vector<2x32xf32>
    %1007 = arith.mulf %998, %975 : vector<2x32xf32>
    %1008 = arith.mulf %992, %1000 : vector<2x32xf32>
    %1009 = arith.addf %1007, %1008 : vector<2x32xf32>
    %1010 = math.tanh %1009 : vector<2x32xf32>
    %1011 = arith.mulf %1006, %1010 : vector<2x32xf32>
    %c29_i32 = arith.constant 29 : i32
    %c0_i32_253 = arith.constant 0 : i32
    %1012 = arith.addi %c0_i32_253, %c29_i32 : i32
    %1013 = arith.index_cast %1012 : i32 to index
    %c0_254 = arith.constant 0 : index
    %1014 = vector.load %arg9[%1013, %c0_254] : memref<64x128xf32, #tpu.memory_space<vmem>>, vector<1x128xf32>
    %c32_i32_255 = arith.constant 32 : i32
    %1015 = arith.addi %c32_i32_255, %c29_i32 : i32
    %1016 = arith.index_cast %1015 : i32 to index
    %c0_256 = arith.constant 0 : index
    %1017 = vector.load %arg9[%1016, %c0_256] : memref<64x128xf32, #tpu.memory_space<vmem>>, vector<1x128xf32>
    %1018 = tpu.concatenate %1014, %1017 in 0 : vector<1x128xf32>, vector<1x128xf32> -> vector<2x128xf32>
    %cst_257 = arith.constant dense<0.000000e+00> : vector<2x128xf32>
    %1019 = tpu.matmul %1011, %23, %cst_257 {dimension_numbers = #tpu.dot_dimension_numbers<[1], [0], [0], [1], [0, 0, 1, 1], [], []>} : vector<2x32xf32>, vector<32x128xf32>, vector<2x128xf32> -> vector<2x128xf32>
    %1020 = arith.addf %1018, %1019 : vector<2x128xf32>
    %1021 = vector.extract_strided_slice %1020 {offsets = [0, 0], sizes = [2, 32], strides = [1, 1]} : vector<2x128xf32> to vector<2x32xf32>
    %1022 = arith.negf %1021 : vector<2x32xf32>
    %1023 = math.exp %1022 : vector<2x32xf32>
    %cst_258 = arith.constant 1.000000e+00 : f32
    %1024 = vector.broadcast %cst_258 : f32 to vector<2x32xf32>
    %1025 = arith.addf %1024, %1023 : vector<2x32xf32>
    %1026 = arith.divf %1024, %1025 : vector<2x32xf32>
    %1027 = vector.extract_strided_slice %1020 {offsets = [0, 32], sizes = [2, 32], strides = [1, 1]} : vector<2x128xf32> to vector<2x32xf32>
    %1028 = arith.negf %1027 : vector<2x32xf32>
    %1029 = math.exp %1028 : vector<2x32xf32>
    %cst_259 = arith.constant 1.000000e+00 : f32
    %1030 = vector.broadcast %cst_259 : f32 to vector<2x32xf32>
    %1031 = arith.addf %1030, %1029 : vector<2x32xf32>
    %1032 = arith.divf %1030, %1031 : vector<2x32xf32>
    %1033 = vector.extract_strided_slice %1020 {offsets = [0, 64], sizes = [2, 32], strides = [1, 1]} : vector<2x128xf32> to vector<2x32xf32>
    %1034 = math.tanh %1033 : vector<2x32xf32>
    %1035 = vector.extract_strided_slice %1020 {offsets = [0, 96], sizes = [2, 32], strides = [1, 1]} : vector<2x128xf32> to vector<2x32xf32>
    %1036 = arith.negf %1035 : vector<2x32xf32>
    %1037 = math.exp %1036 : vector<2x32xf32>
    %cst_260 = arith.constant 1.000000e+00 : f32
    %1038 = vector.broadcast %cst_260 : f32 to vector<2x32xf32>
    %1039 = arith.addf %1038, %1037 : vector<2x32xf32>
    %1040 = arith.divf %1038, %1039 : vector<2x32xf32>
    %1041 = arith.mulf %1032, %1009 : vector<2x32xf32>
    %1042 = arith.mulf %1026, %1034 : vector<2x32xf32>
    %1043 = arith.addf %1041, %1042 : vector<2x32xf32>
    %1044 = math.tanh %1043 : vector<2x32xf32>
    %1045 = arith.mulf %1040, %1044 : vector<2x32xf32>
    %c30_i32 = arith.constant 30 : i32
    %c0_i32_261 = arith.constant 0 : i32
    %1046 = arith.addi %c0_i32_261, %c30_i32 : i32
    %1047 = arith.index_cast %1046 : i32 to index
    %c0_262 = arith.constant 0 : index
    %1048 = vector.load %arg9[%1047, %c0_262] : memref<64x128xf32, #tpu.memory_space<vmem>>, vector<1x128xf32>
    %c32_i32_263 = arith.constant 32 : i32
    %1049 = arith.addi %c32_i32_263, %c30_i32 : i32
    %1050 = arith.index_cast %1049 : i32 to index
    %c0_264 = arith.constant 0 : index
    %1051 = vector.load %arg9[%1050, %c0_264] : memref<64x128xf32, #tpu.memory_space<vmem>>, vector<1x128xf32>
    %1052 = tpu.concatenate %1048, %1051 in 0 : vector<1x128xf32>, vector<1x128xf32> -> vector<2x128xf32>
    %cst_265 = arith.constant dense<0.000000e+00> : vector<2x128xf32>
    %1053 = tpu.matmul %1045, %23, %cst_265 {dimension_numbers = #tpu.dot_dimension_numbers<[1], [0], [0], [1], [0, 0, 1, 1], [], []>} : vector<2x32xf32>, vector<32x128xf32>, vector<2x128xf32> -> vector<2x128xf32>
    %1054 = arith.addf %1052, %1053 : vector<2x128xf32>
    %1055 = vector.extract_strided_slice %1054 {offsets = [0, 0], sizes = [2, 32], strides = [1, 1]} : vector<2x128xf32> to vector<2x32xf32>
    %1056 = arith.negf %1055 : vector<2x32xf32>
    %1057 = math.exp %1056 : vector<2x32xf32>
    %cst_266 = arith.constant 1.000000e+00 : f32
    %1058 = vector.broadcast %cst_266 : f32 to vector<2x32xf32>
    %1059 = arith.addf %1058, %1057 : vector<2x32xf32>
    %1060 = arith.divf %1058, %1059 : vector<2x32xf32>
    %1061 = vector.extract_strided_slice %1054 {offsets = [0, 32], sizes = [2, 32], strides = [1, 1]} : vector<2x128xf32> to vector<2x32xf32>
    %1062 = arith.negf %1061 : vector<2x32xf32>
    %1063 = math.exp %1062 : vector<2x32xf32>
    %cst_267 = arith.constant 1.000000e+00 : f32
    %1064 = vector.broadcast %cst_267 : f32 to vector<2x32xf32>
    %1065 = arith.addf %1064, %1063 : vector<2x32xf32>
    %1066 = arith.divf %1064, %1065 : vector<2x32xf32>
    %1067 = vector.extract_strided_slice %1054 {offsets = [0, 64], sizes = [2, 32], strides = [1, 1]} : vector<2x128xf32> to vector<2x32xf32>
    %1068 = math.tanh %1067 : vector<2x32xf32>
    %1069 = vector.extract_strided_slice %1054 {offsets = [0, 96], sizes = [2, 32], strides = [1, 1]} : vector<2x128xf32> to vector<2x32xf32>
    %1070 = arith.negf %1069 : vector<2x32xf32>
    %1071 = math.exp %1070 : vector<2x32xf32>
    %cst_268 = arith.constant 1.000000e+00 : f32
    %1072 = vector.broadcast %cst_268 : f32 to vector<2x32xf32>
    %1073 = arith.addf %1072, %1071 : vector<2x32xf32>
    %1074 = arith.divf %1072, %1073 : vector<2x32xf32>
    %1075 = arith.mulf %1066, %1043 : vector<2x32xf32>
    %1076 = arith.mulf %1060, %1068 : vector<2x32xf32>
    %1077 = arith.addf %1075, %1076 : vector<2x32xf32>
    %1078 = math.tanh %1077 : vector<2x32xf32>
    %1079 = arith.mulf %1074, %1078 : vector<2x32xf32>
    %c31_i32 = arith.constant 31 : i32
    %c0_i32_269 = arith.constant 0 : i32
    %1080 = arith.addi %c0_i32_269, %c31_i32 : i32
    %1081 = arith.index_cast %1080 : i32 to index
    %c0_270 = arith.constant 0 : index
    %1082 = vector.load %arg9[%1081, %c0_270] : memref<64x128xf32, #tpu.memory_space<vmem>>, vector<1x128xf32>
    %c32_i32_271 = arith.constant 32 : i32
    %1083 = arith.addi %c32_i32_271, %c31_i32 : i32
    %1084 = arith.index_cast %1083 : i32 to index
    %c0_272 = arith.constant 0 : index
    %1085 = vector.load %arg9[%1084, %c0_272] : memref<64x128xf32, #tpu.memory_space<vmem>>, vector<1x128xf32>
    %1086 = tpu.concatenate %1082, %1085 in 0 : vector<1x128xf32>, vector<1x128xf32> -> vector<2x128xf32>
    %cst_273 = arith.constant dense<0.000000e+00> : vector<2x128xf32>
    %1087 = tpu.matmul %1079, %23, %cst_273 {dimension_numbers = #tpu.dot_dimension_numbers<[1], [0], [0], [1], [0, 0, 1, 1], [], []>} : vector<2x32xf32>, vector<32x128xf32>, vector<2x128xf32> -> vector<2x128xf32>
    %1088 = arith.addf %1086, %1087 : vector<2x128xf32>
    %1089 = vector.extract_strided_slice %1088 {offsets = [0, 0], sizes = [2, 32], strides = [1, 1]} : vector<2x128xf32> to vector<2x32xf32>
    %1090 = arith.negf %1089 : vector<2x32xf32>
    %1091 = math.exp %1090 : vector<2x32xf32>
    %cst_274 = arith.constant 1.000000e+00 : f32
    %1092 = vector.broadcast %cst_274 : f32 to vector<2x32xf32>
    %1093 = arith.addf %1092, %1091 : vector<2x32xf32>
    %1094 = arith.divf %1092, %1093 : vector<2x32xf32>
    %1095 = vector.extract_strided_slice %1088 {offsets = [0, 32], sizes = [2, 32], strides = [1, 1]} : vector<2x128xf32> to vector<2x32xf32>
    %1096 = arith.negf %1095 : vector<2x32xf32>
    %1097 = math.exp %1096 : vector<2x32xf32>
    %cst_275 = arith.constant 1.000000e+00 : f32
    %1098 = vector.broadcast %cst_275 : f32 to vector<2x32xf32>
    %1099 = arith.addf %1098, %1097 : vector<2x32xf32>
    %1100 = arith.divf %1098, %1099 : vector<2x32xf32>
    %1101 = vector.extract_strided_slice %1088 {offsets = [0, 64], sizes = [2, 32], strides = [1, 1]} : vector<2x128xf32> to vector<2x32xf32>
    %1102 = math.tanh %1101 : vector<2x32xf32>
    %1103 = vector.extract_strided_slice %1088 {offsets = [0, 96], sizes = [2, 32], strides = [1, 1]} : vector<2x128xf32> to vector<2x32xf32>
    %1104 = arith.negf %1103 : vector<2x32xf32>
    %1105 = math.exp %1104 : vector<2x32xf32>
    %cst_276 = arith.constant 1.000000e+00 : f32
    %1106 = vector.broadcast %cst_276 : f32 to vector<2x32xf32>
    %1107 = arith.addf %1106, %1105 : vector<2x32xf32>
    %1108 = arith.divf %1106, %1107 : vector<2x32xf32>
    %1109 = arith.mulf %1100, %1077 : vector<2x32xf32>
    %1110 = arith.mulf %1094, %1102 : vector<2x32xf32>
    %1111 = arith.addf %1109, %1110 : vector<2x32xf32>
    %1112 = math.tanh %1111 : vector<2x32xf32>
    %1113 = arith.mulf %1108, %1112 : vector<2x32xf32>
    %c32_i32_277 = arith.constant 32 : i32
    %c0_278 = arith.constant 0 : index
    %c0_279 = arith.constant 0 : index
    %1114 = vector.load %arg6[%c0_278, %c0_279] : memref<32x5xf32, #tpu.memory_space<vmem>>, vector<32x5xf32>
    %cst_280 = arith.constant dense<0.000000e+00> : vector<2x5xf32>
    %1115 = tpu.matmul %1113, %1114, %cst_280 {dimension_numbers = #tpu.dot_dimension_numbers<[1], [0], [0], [1], [0, 0, 1, 1], [], []>} : vector<2x32xf32>, vector<32x5xf32>, vector<2x5xf32> -> vector<2x5xf32>
    %c0_281 = arith.constant 0 : index
    %c0_282 = arith.constant 0 : index
    %1116 = vector.load %arg7[%c0_281, %c0_282] : memref<1x5xf32, #tpu.memory_space<vmem>>, vector<1x5xf32>
    %1117 = vector.broadcast %1116 : vector<1x5xf32> to vector<2x5xf32>
    %1118 = arith.addf %1115, %1117 : vector<2x5xf32>
    %c0_283 = arith.constant 0 : index
    %c0_284 = arith.constant 0 : index
    %1119 = vector.load %arg8[%c0_283, %c0_284] : memref<2x5xf32, #tpu.memory_space<vmem>>, vector<2x5xf32>
    tpu.vector_store %arg8[%c0_283, %c0_284], %1118 {strides = array<i32>} : memref<2x5xf32, #tpu.memory_space<vmem>>, vector<2x5xf32>,
    return
  }
}

</mosaic_0001>

<bundles_post_ra>
// kernel: tpu_custom_call.1
= control target key start
LH: loop header
LB: loop body
LE: loop exit
PB: predicated region body
PF: predicated region fallthrough
CT: control target
= control target key end

     0   :  { %vm73_vm0 = vcmask 1043456   ;;  %vm60_vm1 = vcmask 97280   ;;  %v2883_v5 = vmov 0   ;;  %s3395_s0 = inlined_call_operand.vmem [shape: f32[2,12,44], index: 0, kind: input, shape index: {}]   ;;  %s3396_s1 = inlined_call_operand.vmem [shape: f32[32,12], index: 1, kind: input, shape index: {}]   ;;  %s3397_s2 = inlined_call_operand.vmem [shape: f32[32,1], index: 2, kind: input, shape index: {}]   ;;  %s3398_s3 = inlined_call_operand.vmem [shape: f32[44,128], index: 3, kind: input, shape index: {}]   ;;  %s3399_s4 = inlined_call_operand.vmem [shape: f32[1,128], index: 4, kind: input, shape index: {}]   ;;  %s3400_s5 = inlined_call_operand.vmem [shape: f32[32,128], index: 5, kind: input, shape index: {}]   ;;  %s3401_s6 = inlined_call_operand.vmem [shape: f32[32,5], index: 6, kind: input, shape index: {}]   ;;  %s3402_s7 = inlined_call_operand.vmem [shape: f32[1,5], index: 7, kind: input, shape index: {}]   ;;  %s3403_s8 = inlined_call_operand.hbm [shape: f32[2,5], index: 8, kind: output, shape index: {}]  }
   0x1   :  { %v39_v0 = vld [vmem:[%s3395_s0 + $0x8] sm:$0xf]  ;;  %v2505_v1 = vld [vmem:[%s3395_s0 + $0x18] sm:$0xf]  ;;  %v38_v2 = vld [vmem:[%s3395_s0] sm:$0xff]  ;;  %2589 = vset.pattern.permute.xlu0 %v2883_v5  ;;  %2590 = vset.pattern.permute.xlu1 %v2883_v5 }
   0x2   :  { %2499 = vmatpush.msk.msra.mxu0 %vm73_vm0, %v39_v0  ;;  %2506 = vmatpush.msk.msra.mxu1 %vm73_vm0, %v2505_v1  ;;  %v2504_v3 = vld [vmem:[%s3395_s0 + $0x10] sm:$0xff]  ;;  %v30_v4 = vld [vmem:[%s3396_s1] sm:$0xff] }
   0x3   :  { %v34_v6 = vld [vmem:[%s3397_s2] sm:$0xff]  ;;  %v36_v7 = vld [vmem:[%s3397_s2 + $0x10] sm:$0xff] }
   0x4   :  { %92 = vmatpush.msra.mxu0 %v38_v2  ;;  %131 = vmatpush.msra.mxu1 %v2504_v3 }
   0x5   :  { %2500 = vmatmul.msk.f32.vlgmr.msra.gmra.mxu0 %vm60_vm1, %v30_v4  ;;  %2507 = vmatmul.msk.f32.vlgmr.msra.gmra.mxu1 %vm60_vm1, %v30_v4 }
   0x6   :  { %13 = vsyncpa [#allocation4], 0  ;;  %42 = vperm.xlu0 %2589, %v34_v6   ;;  %52 = vperm.xlu1 %2590, %v36_v7   ;;  %v31_v8 = vld [vmem:[%s3396_s1 + $0x8] sm:$0xff]  ;;  %v37_v10 = vld [vmem:[%s3397_s2 + $0x18] sm:$0xff]  ;;  %vm159_vm2 = vcmask 359424   ;;  %v2884_v34 = vmov 0.0  }
   0x7   :  { %v35_v9 = vld [vmem:[%s3397_s2 + $0x8] sm:$0xff]  ;;  %v32_v11 = vld [vmem:[%s3396_s1 + $0x10] sm:$0xff]  ;;  %v33_v12 = vld [vmem:[%s3396_s1 + $0x18] sm:$0xff]  ;;  %vm245_vm3 = vcmask 1040384   ;;  %s2886_s24 = smov 32   ;;  %vm247_vm8 = vcmask 261120  }
   0x8   :  { %v154_v13 = vld [vmem:[%s3398_s3 + $0x28] sm:$0xf]  ;;  %v153_v14 = vld [vmem:[%s3398_s3 + $0x20] sm:$0xff]  ;;  %v152_v15 = vld [vmem:[%s3398_s3 + $0x18] sm:$0xff]  ;;  %s2490_s2 = sshll.u32 %s3403_s8, 4  ;;  %s2491_s2 = int_to_ptr.hbm [resolvable:$true] %s2490_s2 }
   0x9   :  { %2511 = vmatpush.msk.msra.mxu2 %vm73_vm0, %v154_v13  ;;  %v151_v16 = vld [vmem:[%s3398_s3 + $0x10] sm:$0xff]  ;;  %v150_v17 = vld [vmem:[%s3398_s3 + $0x8] sm:$0xff]  ;;  %v149_v18 = vld [vmem:[%s3398_s3] sm:$0xff] }
   0xa   :  { %v3002_v23 = vld [vmem:[%s3400_s5 + $0x18] sm:$0xff]  ;;  %v3011_v28 = vld [vmem:[%s3400_s5 + $0x10] sm:$0xff]  ;;  %v3018_v29 = vld [vmem:[%s3400_s5 + $0x8] sm:$0xff] }
   0xb   :  { %198 = vmatpush.msra.mxu2 %v153_v14  ;;  %263 = vmatpush.msra.mxu3 %v3002_v23  ;;  %v3023_v31 = vld [vmem:[%s3400_s5] sm:$0xff] }
   0xc   :  { %539 = vmatpush.msrb.mxu0 %v3002_v23  ;;  %608 = vmatpush.msrb.mxu1 %v3002_v23  ;;  %v2591_v52 = vld [vmem:[%s3399_s4] ss:$0 sm:$0xff]  ;;  %s2885_s4 = smov 64  }
   0xd   :  { %2501 = vmatmul.msk.f32.gmra.mxu0 %vm60_vm1, %v31_v8  ;;  %2508 = vmatmul.msk.f32.gmra.mxu1 %vm60_vm1, %v31_v8 }
   0xe   :  { %47 = vperm.xlu0 %2589, %v35_v9   ;;  %57 = vperm.xlu1 %2590, %v37_v10  }
   0xf   :  { %199 = vmatpush.msra.mxu2 %v152_v15  ;;  %264 = vmatpush.msra.mxu3 %v3011_v28 }
  0x10   :  { %540 = vmatpush.msrb.mxu0 %v3011_v28  ;;  %609 = vmatpush.msrb.mxu1 %v3011_v28 }
  0x11   :  { %200 = vmatpush.msra.mxu2 %v151_v16  ;;  %265 = vmatpush.msra.mxu3 %v3018_v29 }
  0x12   :  { %541 = vmatpush.msrb.mxu0 %v3018_v29  ;;  %610 = vmatpush.msrb.mxu1 %v3018_v29 }
  0x13   :  { %201 = vmatpush.msra.mxu2 %v150_v17  ;;  %266 = vmatpush.msra.mxu3 %v3023_v31 }
  0x14   :  { %267 = vmatmul.f32.vlgmr.msra.gmra.mxu3 %v2884_v34  ;;  %542 = vmatpush.msrb.mxu0 %v3023_v31 }
  0x15   :  { %2502 = vmatmul.msk.f32.gmra.mxu0 %vm60_vm1, %v32_v11  ;;  %2509 = vmatmul.msk.f32.gmra.mxu1 %vm60_vm1, %v32_v11 }
  0x16   :  { %202 = vmatpush.msra.mxu2 %v149_v18  ;;  %332 = vmatpush.msrb.mxu3 %v3002_v23 }
  0x17   :  { %611 = vmatpush.msrb.mxu1 %v3023_v31  ;;  %746 = vmatpush.msra.mxu0 %v3002_v23 }
  0x18   :  { %1712 = vmatpush.msrb.mxu2 %v3002_v23  ;;  %333 = vmatpush.msrb.mxu3 %v3011_v28 }
  0x19   :  { %815 = vmatpush.msra.mxu1 %v3002_v23  ;;  %747 = vmatpush.msra.mxu0 %v3011_v28 }
  0x1a   :  { %1713 = vmatpush.msrb.mxu2 %v3011_v28  ;;  %334 = vmatpush.msrb.mxu3 %v3018_v29 }
  0x1b   :  { %816 = vmatpush.msra.mxu1 %v3011_v28  ;;  %748 = vmatpush.msra.mxu0 %v3018_v29 }
  0x1c   :  { %1714 = vmatpush.msrb.mxu2 %v3018_v29  ;;  %335 = vmatpush.msrb.mxu3 %v3023_v31 }
  0x1d   :  { %2503 = vmatmul.msk.f32.gmra.mxu0 %vm60_vm1, %v33_v12  ;;  %2510 = vmatmul.msk.f32.gmra.mxu1 %vm60_vm1, %v33_v12 }
  0x1e   :  { %1715 = vmatpush.msrb.mxu2 %v3023_v31  ;;  %817 = vmatpush.msra.mxu1 %v3018_v29 }
  0x1f   :  { %401 = vmatpush.msra.mxu3 %v3002_v23  ;;  %749 = vmatpush.msra.mxu0 %v3023_v31 }
  0x20   :  { %818 = vmatpush.msra.mxu1 %v3023_v31 }
  0x21   :  { %402 = vmatpush.msra.mxu3 %v3011_v28 }
  0x23   :  { %403 = vmatpush.msra.mxu3 %v3018_v29 }
  0x25   :  { %404 = vmatpush.msra.mxu3 %v3023_v31 }
  0x78   :  { %v43_v19 = vpop.permute.xlu0 %42  ;;  %v53_v30 = vpop.permute.xlu1 %52 }
  0x80   :  { %v48_v24 = vpop.permute.xlu0 %47  ;;  %v58_v37 = vpop.permute.xlu1 %57 }
  0x82   :  { %v94_v20 = vpop.f32.mrf.mxu0  ;;  %v133_v36 = vpop.f32.mrf.mxu1 }
  0x83   :  { %v95_v21 = vadd.f32 %v94_v20, %v43_v19  ;;  %v134_v41 = vadd.f32 %v133_v36, %v43_v19 }
  0x85   :  { %v106_v22 = vmax.f32 %v95_v21, 0.0  ;;  %v145_v43 = vmax.f32 %v134_v41, 0.0 }
  0x87   :  { %2512 = vmatmul.msk.f32.vlgmr.msra.gmra.mxu2 %vm159_vm2, %v106_v22 }
  0x88   :  { %1988 = vmatpush.msra.mxu2 %v3002_v23 }
  0x8a   :  { %v97_v25 = vpop.f32.mrf.mxu0  ;;  %1989 = vmatpush.msra.mxu2 %v3011_v28  ;;  %v136_v42 = vpop.f32.mrf.mxu1 }
  0x8b   :  { %v98_v26 = vadd.f32 %v97_v25, %v48_v24  ;;  %v137_v44 = vadd.f32 %v136_v42, %v48_v24 }
  0x8c   :  { %1990 = vmatpush.msra.mxu2 %v3018_v29 }
  0x8d   :  { %v107_v27 = vmax.f32 %v98_v26, 0.0  ;;  %v146_v46 = vmax.f32 %v137_v44, 0.0 }
  0x8e   :  { %1991 = vmatpush.msra.mxu2 %v3023_v31 }
  0x8f   :  { %2513 = vmatmul.msk.f32.gmra.mxu2 %vm159_vm2, %v107_v27 }
  0x92   :  { %v100_v32 = vpop.f32.mrf.mxu0  ;;  %v139_v45 = vpop.f32.mrf.mxu1 }
  0x93   :  { %v101_v33 = vadd.f32 %v100_v32, %v53_v30  ;;  %v140_v47 = vadd.f32 %v139_v45, %v53_v30 }
  0x95   :  { %v108_v35 = vmax.f32 %v101_v33, 0.0  ;;  %v147_v48 = vmax.f32 %v140_v47, 0.0 }
  0x97   :  { %2514 = vmatmul.msk.f32.gmra.mxu2 %vm159_vm2, %v108_v35  ;;  %v268_v3 = vpop.f32.mrf.mxu3 }
  0x9a   :  { %v103_v38 = vpop.f32.mrf.mxu0  ;;  %v142_v49 = vpop.f32.mrf.mxu1 }
  0x9b   :  { %v104_v39 = vadd.f32 %v103_v38, %v58_v37  ;;  %v143_v50 = vadd.f32 %v142_v49, %v58_v37 }
  0x9d   :  { %v109_v40 = vmax.f32 %v104_v39, 0.0  ;;  %v148_v51 = vmax.f32 %v143_v50, 0.0 }
  0x9f   :  { %2515 = vmatmul.msk.f32.gmra.mxu2 %vm159_vm2, %v109_v40 }
  0xa7   :  { %2516 = vmatmul.msk.f32.gmra.mxu2 %vm159_vm2, %v145_v43 }
  0xaf   :  { %2517 = vmatmul.msk.f32.gmra.mxu2 %vm159_vm2, %v146_v46 }
  0xb7   :  { %2518 = vmatmul.msk.f32.gmra.mxu2 %vm159_vm2, %v147_v48 }
  0xbf   :  { %2519 = vmatmul.msk.f32.gmra.mxu2 %vm159_vm2, %v148_v51 }
 0x10a   :  { %v204_v53 = vpop.f32.mrf.mxu2 }
 0x10b   :  { %v205_v54 = vadd.f32 %v2591_v52, %v204_v53 }
 0x10d   :  { %228 = vst [vmem:[#allocation2] sm:$0xff] %v205_v54 }
 0x112   :  { %v207_v55 = vpop.f32.mrf.mxu2 }
 0x113   :  { %v208_v56 = vadd.f32 %v2591_v52, %v207_v55 }
 0x114   :  { %v240_v4 = vld [vmem:[#allocation2] sm:$0x1]  ;;  %v309_v40 = vld [vmem:[#allocation2 + $0x1] sm:$0x1] }
 0x115   :  { %229 = vst [vmem:[#allocation2 + $0x8] sm:$0xff] %v208_v56 }
 0x11a   :  { %v210_v57 = vpop.f32.mrf.mxu2 }
 0x11b   :  { %v211_v58 = vadd.f32 %v2591_v52, %v210_v57 }
 0x11d   :  { %230 = vst [vmem:[#allocation2 + $0x10] sm:$0xff] %v211_v58 }
 0x122   :  { %v213_v59 = vpop.f32.mrf.mxu2 }
 0x123   :  { %v214_v60 = vadd.f32 %v2591_v52, %v213_v59 }
 0x125   :  { %231 = vst [vmem:[#allocation2 + $0x18] sm:$0xff] %v214_v60 }
 0x12a   :  { %v216_v61 = vpop.f32.mrf.mxu2 }
 0x12b   :  { %v217_v62 = vadd.f32 %v2591_v52, %v216_v61 }
 0x12d   :  { %232 = vst [vmem:[#allocation2 + $0x20] sm:$0xff] %v217_v62 }
 0x132   :  { %v219_v63 = vpop.f32.mrf.mxu2 }
 0x133   :  { %v220_v0 = vadd.f32 %v2591_v52, %v219_v63 }
 0x134   :  { %v241_v1 = vld [vmem:[#allocation2 + $0x20] sm:$0x1]  ;;  %v310_v38 = vld [vmem:[#allocation2 + $0x21] sm:$0x1] }
 0x135   :  { %233 = vst [vmem:[#allocation2 + $0x28] sm:$0xff] %v220_v0  ;;  %v243_v2 = vrot.slane %v241_v1, 7  ;;  %v312_v39 = vrot.slane %v310_v38, 7  ;;  %v447_v38 = vld [vmem:[#allocation2 + $0x3] sm:$0x1] }
 0x137   :  { %v246_v5 = vsel %vm245_vm3, %v240_v4, %v243_v2  ;;  %v314_v41 = vsel %vm245_vm3, %v309_v40, %v312_v39 }
 0x138   :  { %v271_v6 = vadd.f32 %v268_v3, %v246_v5  ;;  %v379_v3 = vld [vmem:[#allocation2 + $0x22] sm:$0x1] }
 0x139   :  { %v381_v4 = vrot.slane %v379_v3, 7  ;;  %v378_v5 = vld [vmem:[#allocation2 + $0x2] sm:$0x1]  ;;  %v516_v3 = vld [vmem:[#allocation2 + $0x4] sm:$0x1] }
 0x13a   :  { %2593 = vtanh.f32 %v271_v6  ;;  %v222_v7 = vpop.f32.mrf.mxu2  ;;  %v2520_v12 = vmul.f32 -1.442695, %v271_v6 }
 0x13b   :  { %v223_v8 = vadd.f32 %v2591_v52, %v222_v7  ;;  %v383_v6 = vsel %vm245_vm3, %v378_v5, %v381_v4 }
 0x13c   :  { %2595 = vpow2.f32 %v2520_v12 }
 0x13d   :  { %234 = vst [vmem:[#allocation2 + $0x30] sm:$0xff] %v223_v8 }
 0x140   :  { %v2594_v9 = vpop.eup %2593 }
 0x141   :  { %294 = vrot.lane.b32.xlu2 %v2594_v9, %s2885_s4 }
 0x142   :  { %v225_v10 = vpop.f32.mrf.mxu2  ;;  %v2596_v13 = vpop.eup %2595 }
 0x143   :  { %v226_v11 = vadd.f32 %v2591_v52, %v225_v10  ;;  %v275_v14 = vadd.f32 1.0, %v2596_v13 }
 0x145   :  { %235 = vst [vmem:[#allocation2 + $0x38] sm:$0xff] %v226_v11  ;;  %2597 = vrcp.f32 %v275_v14  ;;  %v287_v20 = vand.u32 2147483648, %v275_v14  ;;  %vm281_vm5 = vweird.f32 %v275_v14  ;;  %v285_v21 = vand.u32 2147483647, %v275_v14 }
 0x147   :  { %v288_v24 = vor.u32 1.1754944e-38, %v287_v20  ;;  %vm286_vm7 = vcmp.eq.f32.partialorder %v285_v21, 8.507059e+37 }
 0x14b   :  { %v2598_v15 = vpop.eup %2597 }
 0x14c   :  { %v277_v16 = vmul.f32 %v2598_v15, %v275_v14  ;;  %vm282_vm4 = vweird.f32 %v2598_v15 }
 0x14d   :  { %vm283_vm6 = vmor %vm281_vm5, %vm282_vm4 }
 0x14e   :  { %v278_v17 = vsub.f32 1.0, %v277_v16 }
 0x150   :  { %v279_v18 = vmul.f32 %v2598_v15, %v278_v17 }
 0x152   :  { %v280_v19 = vadd.f32 %v2598_v15, %v279_v18 }
 0x154   :  { %v284_v22 = vsel %vm283_vm6, %v2598_v15, %v280_v19 }
 0x155   :  { %v289_v26 = vsel %vm286_vm7, %v288_v24, %v284_v22 }
 0x156   :  { %v292_v30 = vmul.f32 0.0, %v289_v26 }
 0x19b   :  { %v295_v25 = vpop.permute.xlu2 %294 }
 0x19c   :  { %v297_v27 = vmul.f32 %v295_v25, %v289_v26 }
 0x19e   :  { %299 = vrot.lane.b32.xlu2 %v297_v27, %s2886_s24 }
 0x1f8   :  { %v300_v32 = vpop.permute.xlu2 %299 }
 0x1f9   :  { %v302_v33 = vadd.f32 %v300_v32, %v292_v30 }
 0x1fb   :  { %2599 = vtanh.f32 %v302_v33 }
 0x201   :  { %v2600_v34 = vpop.eup %2599 }
 0x202   :  { %305 = vrot.lane.b32.xlu0 %v2600_v34, %s2885_s4 }
 0x274   :  { %v306_v35 = vpop.permute.xlu0 %305 }
 0x275   :  { %v308_v36 = vmul.f32 %v306_v35, %v289_v26 }
 0x277   :  { %316 = vrot.lane.b32.xlu1 %v308_v36, %s2886_s24  ;;  %v448_v36 = vld [vmem:[#allocation2 + $0x23] sm:$0x1] }
 0x2e9   :  { %v317_v37 = vpop.permute.xlu1 %316 }
 0x2ea   :  { %2521 = vmatmul.msk.f32.vlgmr.msrb.gmra.mxu3 %vm247_vm8, %v317_v37  ;;  %v450_v37 = vrot.slane %v448_v36, 7  ;;  %v585_v36 = vld [vmem:[#allocation2 + $0x5] sm:$0x1] }
 0x2eb   :  { %470 = vmatpush.msrb.mxu3 %v3002_v23 }
 0x2ec   :  { %v452_v39 = vsel %vm245_vm3, %v447_v38, %v450_v37 }
 0x2ed   :  { %471 = vmatpush.msrb.mxu3 %v3011_v28 }
 0x2ef   :  { %472 = vmatpush.msrb.mxu3 %v3018_v29 }
 0x2f1   :  { %473 = vmatpush.msrb.mxu3 %v3023_v31 }
 0x36d   :  { %v337_v42 = vpop.f32.mrf.mxu3 }
 0x36e   :  { %v340_v43 = vadd.f32 %v337_v42, %v314_v41 }
 0x370   :  { %2601 = vtanh.f32 %v340_v43  ;;  %v2522_v45 = vmul.f32 -1.442695, %v340_v43 }
 0x372   :  { %2603 = vpow2.f32 %v2522_v45 }
 0x376   :  { %v2602_v44 = vpop.eup %2601 }
 0x377   :  { %363 = vrot.lane.b32.xlu2 %v2602_v44, %s2885_s4 }
 0x378   :  { %v2604_v46 = vpop.eup %2603 }
 0x379   :  { %v344_v47 = vadd.f32 1.0, %v2604_v46 }
 0x37b   :  { %2605 = vrcp.f32 %v344_v47  ;;  %v356_v53 = vand.u32 2147483648, %v344_v47  ;;  %vm350_vm10 = vweird.f32 %v344_v47  ;;  %v354_v54 = vand.u32 2147483647, %v344_v47 }
 0x37d   :  { %v357_v56 = vor.u32 1.1754944e-38, %v356_v53  ;;  %vm355_vm12 = vcmp.eq.f32.partialorder %v354_v54, 8.507059e+37 }
 0x381   :  { %v2606_v48 = vpop.eup %2605 }
 0x382   :  { %v346_v49 = vmul.f32 %v2606_v48, %v344_v47  ;;  %vm351_vm9 = vweird.f32 %v2606_v48 }
 0x383   :  { %vm352_vm11 = vmor %vm350_vm10, %vm351_vm9 }
 0x384   :  { %v347_v50 = vsub.f32 1.0, %v346_v49 }
 0x386   :  { %v348_v51 = vmul.f32 %v2606_v48, %v347_v50 }
 0x388   :  { %v349_v52 = vadd.f32 %v2606_v48, %v348_v51 }
 0x38a   :  { %v353_v55 = vsel %vm352_vm11, %v2606_v48, %v349_v52 }
 0x38b   :  { %v358_v58 = vsel %vm355_vm12, %v357_v56, %v353_v55 }
 0x38c   :  { %v361_v60 = vmul.f32 %v358_v58, %v302_v33 }
 0x3d1   :  { %v364_v57 = vpop.permute.xlu2 %363 }
 0x3d2   :  { %v366_v59 = vmul.f32 %v364_v57, %v358_v58 }
 0x3d4   :  { %368 = vrot.lane.b32.xlu0 %v366_v59, %s2886_s24 }
 0x446   :  { %v369_v61 = vpop.permute.xlu0 %368 }
 0x447   :  { %v371_v62 = vadd.f32 %v369_v61, %v361_v60 }
 0x449   :  { %2607 = vtanh.f32 %v371_v62 }
 0x44f   :  { %v2608_v63 = vpop.eup %2607 }
 0x450   :  { %374 = vrot.lane.b32.xlu1 %v2608_v63, %s2885_s4 }
 0x4c2   :  { %v375_v0 = vpop.permute.xlu1 %374 }
 0x4c3   :  { %v377_v1 = vmul.f32 %v375_v0, %v358_v58 }
 0x4c5   :  { %385 = vrot.lane.b32.xlu2 %v377_v1, %s2886_s24  ;;  %v517_v1 = vld [vmem:[#allocation2 + $0x24] sm:$0x1] }
 0x51f   :  { %v386_v2 = vpop.permute.xlu2 %385 }
 0x520   :  { %2523 = vmatmul.msk.f32.vlgmr.msra.gmra.mxu3 %vm247_vm8, %v386_v2  ;;  %v519_v2 = vrot.slane %v517_v1, 7  ;;  %v654_v1 = vld [vmem:[#allocation2 + $0x6] sm:$0x1] }
 0x521   :  { %677 = vmatpush.msra.mxu3 %v3002_v23 }
 0x522   :  { %v521_v4 = vsel %vm245_vm3, %v516_v3, %v519_v2 }
 0x523   :  { %678 = vmatpush.msra.mxu3 %v3011_v28 }
 0x525   :  { %679 = vmatpush.msra.mxu3 %v3018_v29 }
 0x527   :  { %680 = vmatpush.msra.mxu3 %v3023_v31 }
 0x5a3   :  { %v406_v7 = vpop.f32.mrf.mxu3 }
 0x5a4   :  { %v409_v8 = vadd.f32 %v406_v7, %v383_v6 }
 0x5a6   :  { %2609 = vtanh.f32 %v409_v8  ;;  %v2524_v10 = vmul.f32 -1.442695, %v409_v8 }
 0x5a8   :  { %2611 = vpow2.f32 %v2524_v10 }
 0x5ac   :  { %v2610_v9 = vpop.eup %2609 }
 0x5ad   :  { %432 = vrot.lane.b32.xlu0 %v2610_v9, %s2885_s4 }
 0x5ae   :  { %v2612_v11 = vpop.eup %2611 }
 0x5af   :  { %v413_v12 = vadd.f32 1.0, %v2612_v11 }
 0x5b1   :  { %2613 = vrcp.f32 %v413_v12  ;;  %v425_v18 = vand.u32 2147483648, %v413_v12  ;;  %vm419_vm14 = vweird.f32 %v413_v12  ;;  %v423_v19 = vand.u32 2147483647, %v413_v12 }
 0x5b3   :  { %v426_v21 = vor.u32 1.1754944e-38, %v425_v18  ;;  %vm424_vm0 = vcmp.eq.f32.partialorder %v423_v19, 8.507059e+37 }
 0x5b7   :  { %v2614_v13 = vpop.eup %2613 }
 0x5b8   :  { %v415_v14 = vmul.f32 %v2614_v13, %v413_v12  ;;  %vm420_vm13 = vweird.f32 %v2614_v13 }
 0x5b9   :  { %vm421_vm15 = vmor %vm419_vm14, %vm420_vm13 }
 0x5ba   :  { %v416_v15 = vsub.f32 1.0, %v415_v14 }
 0x5bc   :  { %v417_v16 = vmul.f32 %v2614_v13, %v416_v15 }
 0x5be   :  { %v418_v17 = vadd.f32 %v2614_v13, %v417_v16 }
 0x5c0   :  { %v422_v20 = vsel %vm421_vm15, %v2614_v13, %v418_v17 }
 0x5c1   :  { %v427_v24 = vsel %vm424_vm0, %v426_v21, %v422_v20 }
 0x5c2   :  { %v430_v26 = vmul.f32 %v427_v24, %v371_v62 }
 0x61f   :  { %v433_v22 = vpop.permute.xlu0 %432 }
 0x620   :  { %v435_v25 = vmul.f32 %v433_v22, %v427_v24 }
 0x622   :  { %437 = vrot.lane.b32.xlu1 %v435_v25, %s2886_s24 }
 0x694   :  { %v438_v27 = vpop.permute.xlu1 %437 }
 0x695   :  { %v440_v30 = vadd.f32 %v438_v27, %v430_v26 }
 0x697   :  { %2615 = vtanh.f32 %v440_v30 }
 0x69d   :  { %v2616_v32 = vpop.eup %2615 }
 0x69e   :  { %443 = vrot.lane.b32.xlu2 %v2616_v32, %s2885_s4 }
 0x6f8   :  { %v444_v33 = vpop.permute.xlu2 %443 }
 0x6f9   :  { %v446_v34 = vmul.f32 %v444_v33, %v427_v24 }
 0x6fb   :  { %454 = vrot.lane.b32.xlu0 %v446_v34, %s2886_s24  ;;  %v586_v34 = vld [vmem:[#allocation2 + $0x25] sm:$0x1] }
 0x76d   :  { %v455_v35 = vpop.permute.xlu0 %454 }
 0x76e   :  { %2525 = vmatmul.msk.f32.vlgmr.msrb.gmra.mxu3 %vm247_vm8, %v455_v35  ;;  %v588_v35 = vrot.slane %v586_v34, 7  ;;  %v723_v34 = vld [vmem:[#allocation2 + $0x7] sm:$0x1] }
 0x76f   :  { %884 = vmatpush.msrb.mxu3 %v3002_v23 }
 0x770   :  { %v590_v37 = vsel %vm245_vm3, %v585_v36, %v588_v35 }
 0x771   :  { %885 = vmatpush.msrb.mxu3 %v3011_v28 }
 0x773   :  { %886 = vmatpush.msrb.mxu3 %v3018_v29 }
 0x775   :  { %887 = vmatpush.msrb.mxu3 %v3023_v31 }
 0x7f1   :  { %v475_v40 = vpop.f32.mrf.mxu3 }
 0x7f2   :  { %v478_v41 = vadd.f32 %v475_v40, %v452_v39 }
 0x7f4   :  { %2617 = vtanh.f32 %v478_v41  ;;  %v2526_v43 = vmul.f32 -1.442695, %v478_v41 }
 0x7f6   :  { %2619 = vpow2.f32 %v2526_v43 }
 0x7fa   :  { %v2618_v42 = vpop.eup %2617 }
 0x7fb   :  { %501 = vrot.lane.b32.xlu1 %v2618_v42, %s2885_s4 }
 0x7fc   :  { %v2620_v44 = vpop.eup %2619 }
 0x7fd   :  { %v482_v45 = vadd.f32 1.0, %v2620_v44 }
 0x7ff   :  { %2621 = vrcp.f32 %v482_v45  ;;  %v494_v51 = vand.u32 2147483648, %v482_v45  ;;  %vm488_vm2 = vweird.f32 %v482_v45  ;;  %v492_v52 = vand.u32 2147483647, %v482_v45 }
 0x801   :  { %v495_v54 = vor.u32 1.1754944e-38, %v494_v51  ;;  %vm493_vm5 = vcmp.eq.f32.partialorder %v492_v52, 8.507059e+37 }
 0x805   :  { %v2622_v46 = vpop.eup %2621 }
 0x806   :  { %v484_v47 = vmul.f32 %v2622_v46, %v482_v45  ;;  %vm489_vm1 = vweird.f32 %v2622_v46 }
 0x807   :  { %vm490_vm4 = vmor %vm488_vm2, %vm489_vm1 }
 0x808   :  { %v485_v48 = vsub.f32 1.0, %v484_v47 }
 0x80a   :  { %v486_v49 = vmul.f32 %v2622_v46, %v485_v48 }
 0x80c   :  { %v487_v50 = vadd.f32 %v2622_v46, %v486_v49 }
 0x80e   :  { %v491_v53 = vsel %vm490_vm4, %v2622_v46, %v487_v50 }
 0x80f   :  { %v496_v56 = vsel %vm493_vm5, %v495_v54, %v491_v53 }
 0x810   :  { %v499_v58 = vmul.f32 %v496_v56, %v440_v30 }
 0x86d   :  { %v502_v55 = vpop.permute.xlu1 %501 }
 0x86e   :  { %v504_v57 = vmul.f32 %v502_v55, %v496_v56 }
 0x870   :  { %506 = vrot.lane.b32.xlu2 %v504_v57, %s2886_s24 }
 0x8ca   :  { %v507_v59 = vpop.permute.xlu2 %506 }
 0x8cb   :  { %v509_v60 = vadd.f32 %v507_v59, %v499_v58 }
 0x8cd   :  { %2623 = vtanh.f32 %v509_v60 }
 0x8d3   :  { %v2624_v61 = vpop.eup %2623 }
 0x8d4   :  { %512 = vrot.lane.b32.xlu0 %v2624_v61, %s2885_s4 }
 0x946   :  { %v513_v62 = vpop.permute.xlu0 %512 }
 0x947   :  { %v515_v63 = vmul.f32 %v513_v62, %v496_v56 }
 0x949   :  { %523 = vrot.lane.b32.xlu1 %v515_v63, %s2886_s24  ;;  %v655_v63 = vld [vmem:[#allocation2 + $0x26] sm:$0x1] }
 0x9bb   :  { %v524_v0 = vpop.permute.xlu1 %523 }
 0x9bc   :  { %2527 = vmatmul.msk.f32.vlgmr.msrb.gmra.mxu0 %vm247_vm8, %v524_v0  ;;  %v657_v0 = vrot.slane %v655_v63, 7  ;;  %v792_v63 = vld [vmem:[#allocation2 + $0x8] sm:$0x1] }
 0x9bd   :  { %953 = vmatpush.msrb.mxu0 %v3002_v23 }
 0x9be   :  { %v659_v2 = vsel %vm245_vm3, %v654_v1, %v657_v0 }
 0x9bf   :  { %954 = vmatpush.msrb.mxu0 %v3011_v28 }
 0x9c1   :  { %955 = vmatpush.msrb.mxu0 %v3018_v29 }
 0x9c3   :  { %956 = vmatpush.msrb.mxu0 %v3023_v31 }
 0xa39   :  { %v544_v5 = vpop.f32.mrf.mxu0 }
 0xa3a   :  { %v547_v6 = vadd.f32 %v544_v5, %v521_v4 }
 0xa3c   :  { %2625 = vtanh.f32 %v547_v6  ;;  %v2528_v8 = vmul.f32 -1.442695, %v547_v6 }
 0xa3e   :  { %2627 = vpow2.f32 %v2528_v8 }
 0xa42   :  { %v2626_v7 = vpop.eup %2625 }
 0xa43   :  { %570 = vrot.lane.b32.xlu2 %v2626_v7, %s2885_s4 }
 0xa44   :  { %v2628_v9 = vpop.eup %2627 }
 0xa45   :  { %v551_v10 = vadd.f32 1.0, %v2628_v9 }
 0xa47   :  { %2629 = vrcp.f32 %v551_v10  ;;  %v563_v16 = vand.u32 2147483648, %v551_v10  ;;  %vm557_vm7 = vweird.f32 %v551_v10  ;;  %v561_v17 = vand.u32 2147483647, %v551_v10 }
 0xa49   :  { %v564_v19 = vor.u32 1.1754944e-38, %v563_v16  ;;  %vm562_vm10 = vcmp.eq.f32.partialorder %v561_v17, 8.507059e+37 }
 0xa4d   :  { %v2630_v11 = vpop.eup %2629 }
 0xa4e   :  { %v553_v12 = vmul.f32 %v2630_v11, %v551_v10  ;;  %vm558_vm6 = vweird.f32 %v2630_v11 }
 0xa4f   :  { %vm559_vm9 = vmor %vm557_vm7, %vm558_vm6 }
 0xa50   :  { %v554_v13 = vsub.f32 1.0, %v553_v12 }
 0xa52   :  { %v555_v14 = vmul.f32 %v2630_v11, %v554_v13 }
 0xa54   :  { %v556_v15 = vadd.f32 %v2630_v11, %v555_v14 }
 0xa56   :  { %v560_v18 = vsel %vm559_vm9, %v2630_v11, %v556_v15 }
 0xa57   :  { %v565_v21 = vsel %vm562_vm10, %v564_v19, %v560_v18 }
 0xa58   :  { %v568_v24 = vmul.f32 %v565_v21, %v509_v60 }
 0xa9d   :  { %v571_v20 = vpop.permute.xlu2 %570 }
 0xa9e   :  { %v573_v22 = vmul.f32 %v571_v20, %v565_v21 }
 0xaa0   :  { %575 = vrot.lane.b32.xlu0 %v573_v22, %s2886_s24 }
 0xb12   :  { %v576_v25 = vpop.permute.xlu0 %575 }
 0xb13   :  { %v578_v26 = vadd.f32 %v576_v25, %v568_v24 }
 0xb15   :  { %2631 = vtanh.f32 %v578_v26 }
 0xb1b   :  { %v2632_v27 = vpop.eup %2631 }
 0xb1c   :  { %581 = vrot.lane.b32.xlu1 %v2632_v27, %s2885_s4 }
 0xb8e   :  { %v582_v30 = vpop.permute.xlu1 %581 }
 0xb8f   :  { %v584_v32 = vmul.f32 %v582_v30, %v565_v21 }
 0xb91   :  { %592 = vrot.lane.b32.xlu2 %v584_v32, %s2886_s24  ;;  %v724_v32 = vld [vmem:[#allocation2 + $0x27] sm:$0x1] }
 0xbeb   :  { %v593_v33 = vpop.permute.xlu2 %592 }
 0xbec   :  { %2529 = vmatmul.msk.f32.vlgmr.msrb.gmra.mxu1 %vm247_vm8, %v593_v33  ;;  %v726_v33 = vrot.slane %v724_v32, 7  ;;  %v861_v32 = vld [vmem:[#allocation2 + $0x9] sm:$0x1] }
 0xbed   :  { %1022 = vmatpush.msrb.mxu1 %v3002_v23 }
 0xbee   :  { %v728_v35 = vsel %vm245_vm3, %v723_v34, %v726_v33 }
 0xbef   :  { %1023 = vmatpush.msrb.mxu1 %v3011_v28 }
 0xbf1   :  { %1024 = vmatpush.msrb.mxu1 %v3018_v29 }
 0xbf3   :  { %1025 = vmatpush.msrb.mxu1 %v3023_v31 }
 0xc69   :  { %v613_v38 = vpop.f32.mrf.mxu1 }
 0xc6a   :  { %v616_v39 = vadd.f32 %v613_v38, %v590_v37 }
 0xc6c   :  { %2633 = vtanh.f32 %v616_v39  ;;  %v2530_v41 = vmul.f32 -1.442695, %v616_v39 }
 0xc6e   :  { %2635 = vpow2.f32 %v2530_v41 }
 0xc72   :  { %v2634_v40 = vpop.eup %2633 }
 0xc73   :  { %639 = vrot.lane.b32.xlu0 %v2634_v40, %s2885_s4 }
 0xc74   :  { %v2636_v42 = vpop.eup %2635 }
 0xc75   :  { %v620_v43 = vadd.f32 1.0, %v2636_v42 }
 0xc77   :  { %2637 = vrcp.f32 %v620_v43  ;;  %v632_v49 = vand.u32 2147483648, %v620_v43  ;;  %vm626_vm12 = vweird.f32 %v620_v43  ;;  %v630_v50 = vand.u32 2147483647, %v620_v43 }
 0xc79   :  { %v633_v52 = vor.u32 1.1754944e-38, %v632_v49  ;;  %vm631_vm14 = vcmp.eq.f32.partialorder %v630_v50, 8.507059e+37 }
 0xc7d   :  { %v2638_v44 = vpop.eup %2637 }
 0xc7e   :  { %v622_v45 = vmul.f32 %v2638_v44, %v620_v43  ;;  %vm627_vm11 = vweird.f32 %v2638_v44 }
 0xc7f   :  { %vm628_vm13 = vmor %vm626_vm12, %vm627_vm11 }
 0xc80   :  { %v623_v46 = vsub.f32 1.0, %v622_v45 }
 0xc82   :  { %v624_v47 = vmul.f32 %v2638_v44, %v623_v46 }
 0xc84   :  { %v625_v48 = vadd.f32 %v2638_v44, %v624_v47 }
 0xc86   :  { %v629_v51 = vsel %vm628_vm13, %v2638_v44, %v625_v48 }
 0xc87   :  { %v634_v54 = vsel %vm631_vm14, %v633_v52, %v629_v51 }
 0xc88   :  { %v637_v56 = vmul.f32 %v634_v54, %v578_v26 }
 0xce5   :  { %v640_v53 = vpop.permute.xlu0 %639 }
 0xce6   :  { %v642_v55 = vmul.f32 %v640_v53, %v634_v54 }
 0xce8   :  { %644 = vrot.lane.b32.xlu1 %v642_v55, %s2886_s24 }
 0xd5a   :  { %v645_v57 = vpop.permute.xlu1 %644 }
 0xd5b   :  { %v647_v58 = vadd.f32 %v645_v57, %v637_v56 }
 0xd5d   :  { %2639 = vtanh.f32 %v647_v58 }
 0xd63   :  { %v2640_v59 = vpop.eup %2639 }
 0xd64   :  { %650 = vrot.lane.b32.xlu2 %v2640_v59, %s2885_s4 }
 0xdbe   :  { %v651_v60 = vpop.permute.xlu2 %650 }
 0xdbf   :  { %v653_v61 = vmul.f32 %v651_v60, %v634_v54 }
 0xdc1   :  { %661 = vrot.lane.b32.xlu0 %v653_v61, %s2886_s24  ;;  %v793_v61 = vld [vmem:[#allocation2 + $0x28] sm:$0x1] }
 0xe33   :  { %v662_v62 = vpop.permute.xlu0 %661 }
 0xe34   :  { %2531 = vmatmul.msk.f32.vlgmr.msra.gmra.mxu3 %vm247_vm8, %v662_v62  ;;  %v795_v62 = vrot.slane %v793_v61, 7  ;;  %v930_v61 = vld [vmem:[#allocation2 + $0xa] sm:$0x1] }
 0xe35   :  { %1091 = vmatpush.msra.mxu3 %v3002_v23 }
 0xe36   :  { %v797_v0 = vsel %vm245_vm3, %v792_v63, %v795_v62 }
 0xe37   :  { %1092 = vmatpush.msra.mxu3 %v3011_v28 }
 0xe39   :  { %1093 = vmatpush.msra.mxu3 %v3018_v29 }
 0xe3b   :  { %1094 = vmatpush.msra.mxu3 %v3023_v31 }
 0xeb7   :  { %v682_v3 = vpop.f32.mrf.mxu3 }
 0xeb8   :  { %v685_v4 = vadd.f32 %v682_v3, %v659_v2 }
 0xeba   :  { %2641 = vtanh.f32 %v685_v4  ;;  %v2532_v6 = vmul.f32 -1.442695, %v685_v4 }
 0xebc   :  { %2643 = vpow2.f32 %v2532_v6 }
 0xec0   :  { %v2642_v5 = vpop.eup %2641 }
 0xec1   :  { %708 = vrot.lane.b32.xlu1 %v2642_v5, %s2885_s4 }
 0xec2   :  { %v2644_v7 = vpop.eup %2643 }
 0xec3   :  { %v689_v8 = vadd.f32 1.0, %v2644_v7 }
 0xec5   :  { %2645 = vrcp.f32 %v689_v8  ;;  %v701_v14 = vand.u32 2147483648, %v689_v8  ;;  %vm695_vm0 = vweird.f32 %v689_v8  ;;  %v699_v15 = vand.u32 2147483647, %v689_v8 }
 0xec7   :  { %v702_v17 = vor.u32 1.1754944e-38, %v701_v14  ;;  %vm700_vm2 = vcmp.eq.f32.partialorder %v699_v15, 8.507059e+37 }
 0xecb   :  { %v2646_v9 = vpop.eup %2645 }
 0xecc   :  { %v691_v10 = vmul.f32 %v2646_v9, %v689_v8  ;;  %vm696_vm15 = vweird.f32 %v2646_v9 }
 0xecd   :  { %vm697_vm1 = vmor %vm695_vm0, %vm696_vm15 }
 0xece   :  { %v692_v11 = vsub.f32 1.0, %v691_v10 }
 0xed0   :  { %v693_v12 = vmul.f32 %v2646_v9, %v692_v11 }
 0xed2   :  { %v694_v13 = vadd.f32 %v2646_v9, %v693_v12 }
 0xed4   :  { %v698_v16 = vsel %vm697_vm1, %v2646_v9, %v694_v13 }
 0xed5   :  { %v703_v19 = vsel %vm700_vm2, %v702_v17, %v698_v16 }
 0xed6   :  { %v706_v21 = vmul.f32 %v703_v19, %v647_v58 }
 0xf33   :  { %v709_v18 = vpop.permute.xlu1 %708 }
 0xf34   :  { %v711_v20 = vmul.f32 %v709_v18, %v703_v19 }
 0xf36   :  { %713 = vrot.lane.b32.xlu2 %v711_v20, %s2886_s24 }
 0xf90   :  { %v714_v22 = vpop.permute.xlu2 %713 }
 0xf91   :  { %v716_v24 = vadd.f32 %v714_v22, %v706_v21 }
 0xf93   :  { %2647 = vtanh.f32 %v716_v24 }
 0xf99   :  { %v2648_v25 = vpop.eup %2647 }
 0xf9a   :  { %719 = vrot.lane.b32.xlu0 %v2648_v25, %s2885_s4 }
0x100c   :  { %v720_v26 = vpop.permute.xlu0 %719 }
0x100d   :  { %v722_v27 = vmul.f32 %v720_v26, %v703_v19  ;;  %v3154_v26 = vld [vmem:[%s3400_s5 + $0x18] sm:$0xff] }
0x100f   :  { %730 = vrot.lane.b32.xlu1 %v722_v27, %s2886_s24  ;;  %v862_v27 = vld [vmem:[#allocation2 + $0x29] sm:$0x1] }
0x1081   :  { %v731_v30 = vpop.permute.xlu1 %730 }
0x1082   :  { %2533 = vmatmul.msk.f32.vlgmr.msra.gmra.mxu0 %vm247_vm8, %v731_v30  ;;  %v864_v30 = vrot.slane %v862_v27, 7  ;;  %v999_v27 = vld [vmem:[#allocation2 + $0xb] sm:$0x1] }
0x1083   :  { %1160 = vmatpush.msra.mxu0 %v3002_v23 }
0x1084   :  { %v866_v33 = vsel %vm245_vm3, %v861_v32, %v864_v30 }
0x1085   :  { %1161 = vmatpush.msra.mxu0 %v3011_v28 }
0x1087   :  { %1162 = vmatpush.msra.mxu0 %v3018_v29 }
0x1089   :  { %1163 = vmatpush.msra.mxu0 %v3023_v31 }
0x10ff   :  { %v751_v36 = vpop.f32.mrf.mxu0 }
0x1100   :  { %v754_v37 = vadd.f32 %v751_v36, %v728_v35 }
0x1102   :  { %2649 = vtanh.f32 %v754_v37  ;;  %v2534_v39 = vmul.f32 -1.442695, %v754_v37 }
0x1104   :  { %2651 = vpow2.f32 %v2534_v39 }
0x1108   :  { %v2650_v38 = vpop.eup %2649 }
0x1109   :  { %777 = vrot.lane.b32.xlu2 %v2650_v38, %s2885_s4 }
0x110a   :  { %v2652_v40 = vpop.eup %2651 }
0x110b   :  { %v758_v41 = vadd.f32 1.0, %v2652_v40 }
0x110d   :  { %2653 = vrcp.f32 %v758_v41  ;;  %v770_v47 = vand.u32 2147483648, %v758_v41  ;;  %vm764_vm5 = vweird.f32 %v758_v41  ;;  %v768_v48 = vand.u32 2147483647, %v758_v41 }
0x110f   :  { %v771_v50 = vor.u32 1.1754944e-38, %v770_v47  ;;  %vm769_vm7 = vcmp.eq.f32.partialorder %v768_v48, 8.507059e+37 }
0x1113   :  { %v2654_v42 = vpop.eup %2653 }
0x1114   :  { %v760_v43 = vmul.f32 %v2654_v42, %v758_v41  ;;  %vm765_vm4 = vweird.f32 %v2654_v42 }
0x1115   :  { %vm766_vm6 = vmor %vm764_vm5, %vm765_vm4 }
0x1116   :  { %v761_v44 = vsub.f32 1.0, %v760_v43 }
0x1118   :  { %v762_v45 = vmul.f32 %v2654_v42, %v761_v44 }
0x111a   :  { %v763_v46 = vadd.f32 %v2654_v42, %v762_v45 }
0x111c   :  { %v767_v49 = vsel %vm766_vm6, %v2654_v42, %v763_v46 }
0x111d   :  { %v772_v52 = vsel %vm769_vm7, %v771_v50, %v767_v49 }
0x111e   :  { %v775_v54 = vmul.f32 %v772_v52, %v716_v24 }
0x1163   :  { %v778_v51 = vpop.permute.xlu2 %777 }
0x1164   :  { %v780_v53 = vmul.f32 %v778_v51, %v772_v52 }
0x1166   :  { %782 = vrot.lane.b32.xlu0 %v780_v53, %s2886_s24 }
0x11d8   :  { %v783_v55 = vpop.permute.xlu0 %782 }
0x11d9   :  { %v785_v56 = vadd.f32 %v783_v55, %v775_v54 }
0x11db   :  { %2655 = vtanh.f32 %v785_v56 }
0x11e1   :  { %v2656_v57 = vpop.eup %2655 }
0x11e2   :  { %788 = vrot.lane.b32.xlu1 %v2656_v57, %s2885_s4  ;;  %v3176_v57 = vld [vmem:[%s3400_s5 + $0x8] sm:$0xff] }
0x1254   :  { %v789_v58 = vpop.permute.xlu1 %788 }
0x1255   :  { %v791_v59 = vmul.f32 %v789_v58, %v772_v52  ;;  %v3182_v58 = vld [vmem:[%s3400_s5] sm:$0xff] }
0x1257   :  { %799 = vrot.lane.b32.xlu2 %v791_v59, %s2886_s24  ;;  %v931_v59 = vld [vmem:[#allocation2 + $0x2a] sm:$0x1] }
0x12b1   :  { %v800_v60 = vpop.permute.xlu2 %799 }
0x12b2   :  { %2535 = vmatmul.msk.f32.vlgmr.msra.gmra.mxu1 %vm247_vm8, %v800_v60  ;;  %v933_v60 = vrot.slane %v931_v59, 7  ;;  %v1068_v59 = vld [vmem:[#allocation2 + $0xc] sm:$0x1] }
0x12b3   :  { %1229 = vmatpush.msra.mxu1 %v3002_v23 }
0x12b4   :  { %v935_v62 = vsel %vm245_vm3, %v930_v61, %v933_v60 }
0x12b5   :  { %1230 = vmatpush.msra.mxu1 %v3011_v28 }
0x12b7   :  { %1231 = vmatpush.msra.mxu1 %v3018_v29 }
0x12b9   :  { %1232 = vmatpush.msra.mxu1 %v3023_v31 }
0x132f   :  { %v820_v1 = vpop.f32.mrf.mxu1 }
0x1330   :  { %v823_v2 = vadd.f32 %v820_v1, %v797_v0 }
0x1332   :  { %2657 = vtanh.f32 %v823_v2  ;;  %v2536_v4 = vmul.f32 -1.442695, %v823_v2 }
0x1334   :  { %2659 = vpow2.f32 %v2536_v4 }
0x1338   :  { %v2658_v3 = vpop.eup %2657 }
0x1339   :  { %846 = vrot.lane.b32.xlu0 %v2658_v3, %s2885_s4 }
0x133a   :  { %v2660_v23 = vpop.eup %2659 }
0x133b   :  { %v827_v5 = vadd.f32 1.0, %v2660_v23 }
0x133d   :  { %2661 = vrcp.f32 %v827_v5  ;;  %v839_v11 = vand.u32 2147483648, %v827_v5  ;;  %vm833_vm10 = vweird.f32 %v827_v5  ;;  %v837_v12 = vand.u32 2147483647, %v827_v5 }
0x133f   :  { %v840_v14 = vor.u32 1.1754944e-38, %v839_v11  ;;  %vm838_vm12 = vcmp.eq.f32.partialorder %v837_v12, 8.507059e+37 }
0x1343   :  { %v2662_v6 = vpop.eup %2661 }
0x1344   :  { %v829_v7 = vmul.f32 %v2662_v6, %v827_v5  ;;  %vm834_vm9 = vweird.f32 %v2662_v6 }
0x1345   :  { %vm835_vm11 = vmor %vm833_vm10, %vm834_vm9 }
0x1346   :  { %v830_v8 = vsub.f32 1.0, %v829_v7 }
0x1348   :  { %v831_v9 = vmul.f32 %v2662_v6, %v830_v8 }
0x134a   :  { %v832_v10 = vadd.f32 %v2662_v6, %v831_v9 }
0x134c   :  { %v836_v13 = vsel %vm835_vm11, %v2662_v6, %v832_v10 }
0x134d   :  { %v841_v16 = vsel %vm838_vm12, %v840_v14, %v836_v13 }
0x134e   :  { %v844_v18 = vmul.f32 %v841_v16, %v785_v56  ;;  %v3170_v56 = vld [vmem:[%s3400_s5 + $0x10] sm:$0xff] }
0x13ab   :  { %v847_v15 = vpop.permute.xlu0 %846 }
0x13ac   :  { %v849_v17 = vmul.f32 %v847_v15, %v841_v16 }
0x13ae   :  { %851 = vrot.lane.b32.xlu1 %v849_v17, %s2886_s24 }
0x1420   :  { %v852_v19 = vpop.permute.xlu1 %851 }
0x1421   :  { %v854_v20 = vadd.f32 %v852_v19, %v844_v18 }
0x1423   :  { %2663 = vtanh.f32 %v854_v20 }
0x1429   :  { %v2664_v21 = vpop.eup %2663 }
0x142a   :  { %857 = vrot.lane.b32.xlu2 %v2664_v21, %s2885_s4 }
0x1484   :  { %v858_v22 = vpop.permute.xlu2 %857 }
0x1485   :  { %v860_v24 = vmul.f32 %v858_v22, %v841_v16 }
0x1487   :  { %868 = vrot.lane.b32.xlu0 %v860_v24, %s2886_s24  ;;  %v1000_v24 = vld [vmem:[#allocation2 + $0x2b] sm:$0x1] }
0x14f9   :  { %v869_v25 = vpop.permute.xlu0 %868 }
0x14fa   :  { %2537 = vmatmul.msk.f32.vlgmr.msrb.gmra.mxu3 %vm247_vm8, %v869_v25  ;;  %v1002_v25 = vrot.slane %v1000_v24, 7  ;;  %v1137_v24 = vld [vmem:[#allocation2 + $0xd] sm:$0x1] }
0x14fb   :  { %1298 = vmatpush.msrb.mxu3 %v3154_v26 }
0x14fc   :  { %v1004_v30 = vsel %vm245_vm3, %v999_v27, %v1002_v25 }
0x14fd   :  { %1299 = vmatpush.msrb.mxu3 %v3011_v28 }
0x14ff   :  { %1300 = vmatpush.msrb.mxu3 %v3018_v29 }
0x1501   :  { %1301 = vmatpush.msrb.mxu3 %v3023_v31 }
0x157d   :  { %v889_v34 = vpop.f32.mrf.mxu3 }
0x157e   :  { %v892_v35 = vadd.f32 %v889_v34, %v866_v33 }
0x1580   :  { %2665 = vtanh.f32 %v892_v35  ;;  %v2538_v37 = vmul.f32 -1.442695, %v892_v35 }
0x1582   :  { %2667 = vpow2.f32 %v2538_v37 }
0x1586   :  { %v2666_v36 = vpop.eup %2665 }
0x1587   :  { %915 = vrot.lane.b32.xlu1 %v2666_v36, %s2885_s4 }
0x1588   :  { %v2668_v38 = vpop.eup %2667 }
0x1589   :  { %v896_v39 = vadd.f32 1.0, %v2668_v38 }
0x158b   :  { %2669 = vrcp.f32 %v896_v39  ;;  %v908_v42 = vand.u32 2147483648, %v896_v39  ;;  %vm902_vm14 = vweird.f32 %v896_v39  ;;  %v906_v43 = vand.u32 2147483647, %v896_v39 }
0x158d   :  { %v909_v45 = vor.u32 1.1754944e-38, %v908_v42  ;;  %vm907_vm0 = vcmp.eq.f32.partialorder %v906_v43, 8.507059e+37 }
0x1591   :  { %v2670_v28 = vpop.eup %2669 }
0x1592   :  { %v898_v29 = vmul.f32 %v2670_v28, %v896_v39  ;;  %vm903_vm13 = vweird.f32 %v2670_v28 }
0x1593   :  { %vm904_vm15 = vmor %vm902_vm14, %vm903_vm13 }
0x1594   :  { %v899_v40 = vsub.f32 1.0, %v898_v29 }
0x1596   :  { %v900_v31 = vmul.f32 %v2670_v28, %v899_v40 }
0x1598   :  { %v901_v41 = vadd.f32 %v2670_v28, %v900_v31 }
0x159a   :  { %v905_v44 = vsel %vm904_vm15, %v2670_v28, %v901_v41 }
0x159b   :  { %v910_v47 = vsel %vm907_vm0, %v909_v45, %v905_v44 }
0x159c   :  { %v913_v49 = vmul.f32 %v910_v47, %v854_v20 }
0x15f9   :  { %v916_v46 = vpop.permute.xlu1 %915 }
0x15fa   :  { %v918_v48 = vmul.f32 %v916_v46, %v910_v47 }
0x15fc   :  { %920 = vrot.lane.b32.xlu2 %v918_v48, %s2886_s24 }
0x1656   :  { %v921_v50 = vpop.permute.xlu2 %920 }
0x1657   :  { %v923_v51 = vadd.f32 %v921_v50, %v913_v49 }
0x1659   :  { %2671 = vtanh.f32 %v923_v51 }
0x165f   :  { %v2672_v52 = vpop.eup %2671 }
0x1660   :  { %926 = vrot.lane.b32.xlu0 %v2672_v52, %s2885_s4 }
0x16d2   :  { %v927_v53 = vpop.permute.xlu0 %926 }
0x16d3   :  { %v929_v54 = vmul.f32 %v927_v53, %v910_v47 }
0x16d5   :  { %937 = vrot.lane.b32.xlu1 %v929_v54, %s2886_s24  ;;  %v1069_v54 = vld [vmem:[#allocation2 + $0x2c] sm:$0x1] }
0x1747   :  { %v938_v55 = vpop.permute.xlu1 %937 }
0x1748   :  { %2539 = vmatmul.msk.f32.vlgmr.msrb.gmra.mxu0 %vm247_vm8, %v938_v55  ;;  %v1071_v55 = vrot.slane %v1069_v54, 7  ;;  %v1206_v54 = vld [vmem:[#allocation2 + $0xe] sm:$0x1] }
0x1749   :  { %1367 = vmatpush.msrb.mxu0 %v3154_v26 }
0x174a   :  { %v1073_v60 = vsel %vm245_vm3, %v1068_v59, %v1071_v55 }
0x174b   :  { %1368 = vmatpush.msrb.mxu0 %v3170_v56 }
0x174d   :  { %1369 = vmatpush.msrb.mxu0 %v3176_v57 }
0x174f   :  { %1370 = vmatpush.msrb.mxu0 %v3182_v58 }
0x17c5   :  { %v958_v63 = vpop.f32.mrf.mxu0 }
0x17c6   :  { %v961_v0 = vadd.f32 %v958_v63, %v935_v62 }
0x17c8   :  { %2673 = vtanh.f32 %v961_v0  ;;  %v2540_v2 = vmul.f32 -1.442695, %v961_v0 }
0x17ca   :  { %2675 = vpow2.f32 %v2540_v2 }
0x17ce   :  { %v2674_v1 = vpop.eup %2673 }
0x17cf   :  { %984 = vrot.lane.b32.xlu2 %v2674_v1, %s2885_s4 }
0x17d0   :  { %v2676_v3 = vpop.eup %2675 }
0x17d1   :  { %v965_v4 = vadd.f32 1.0, %v2676_v3 }
0x17d3   :  { %2677 = vrcp.f32 %v965_v4  ;;  %v977_v9 = vand.u32 2147483648, %v965_v4  ;;  %vm971_vm2 = vweird.f32 %v965_v4  ;;  %v975_v10 = vand.u32 2147483647, %v965_v4 }
0x17d5   :  { %v978_v12 = vor.u32 1.1754944e-38, %v977_v9  ;;  %vm976_vm5 = vcmp.eq.f32.partialorder %v975_v10, 8.507059e+37 }
0x17d9   :  { %v2678_v23 = vpop.eup %2677 }
0x17da   :  { %v967_v5 = vmul.f32 %v2678_v23, %v965_v4  ;;  %vm972_vm1 = vweird.f32 %v2678_v23 }
0x17db   :  { %vm973_vm4 = vmor %vm971_vm2, %vm972_vm1 }
0x17dc   :  { %v968_v6 = vsub.f32 1.0, %v967_v5 }
0x17de   :  { %v969_v7 = vmul.f32 %v2678_v23, %v968_v6 }
0x17e0   :  { %v970_v8 = vadd.f32 %v2678_v23, %v969_v7 }
0x17e2   :  { %v974_v11 = vsel %vm973_vm4, %v2678_v23, %v970_v8 }
0x17e3   :  { %v979_v14 = vsel %vm976_vm5, %v978_v12, %v974_v11 }
0x17e4   :  { %v982_v16 = vmul.f32 %v979_v14, %v923_v51 }
0x1829   :  { %v985_v13 = vpop.permute.xlu2 %984 }
0x182a   :  { %v987_v15 = vmul.f32 %v985_v13, %v979_v14 }
0x182c   :  { %989 = vrot.lane.b32.xlu0 %v987_v15, %s2886_s24 }
0x189e   :  { %v990_v17 = vpop.permute.xlu0 %989 }
0x189f   :  { %v992_v18 = vadd.f32 %v990_v17, %v982_v16 }
0x18a1   :  { %2679 = vtanh.f32 %v992_v18 }
0x18a7   :  { %v2680_v19 = vpop.eup %2679 }
0x18a8   :  { %995 = vrot.lane.b32.xlu1 %v2680_v19, %s2885_s4 }
0x191a   :  { %v996_v20 = vpop.permute.xlu1 %995 }
0x191b   :  { %v998_v21 = vmul.f32 %v996_v20, %v979_v14 }
0x191d   :  { %1006 = vrot.lane.b32.xlu2 %v998_v21, %s2886_s24  ;;  %v1138_v21 = vld [vmem:[#allocation2 + $0x2d] sm:$0x1] }
0x1977   :  { %v1007_v22 = vpop.permute.xlu2 %1006 }
0x1978   :  { %2541 = vmatmul.msk.f32.vlgmr.msrb.gmra.mxu1 %vm247_vm8, %v1007_v22  ;;  %v1140_v22 = vrot.slane %v1138_v21, 7  ;;  %v1275_v21 = vld [vmem:[#allocation2 + $0xf] sm:$0x1] }
0x1979   :  { %1436 = vmatpush.msrb.mxu1 %v3154_v26 }
0x197a   :  { %v1142_v25 = vsel %vm245_vm3, %v1137_v24, %v1140_v22 }
0x197b   :  { %1437 = vmatpush.msrb.mxu1 %v3170_v56 }
0x197d   :  { %1438 = vmatpush.msrb.mxu1 %v3176_v57 }
0x197f   :  { %1439 = vmatpush.msrb.mxu1 %v3182_v58 }
0x19f5   :  { %v1027_v32 = vpop.f32.mrf.mxu1 }
0x19f6   :  { %v1030_v33 = vadd.f32 %v1027_v32, %v1004_v30 }
0x19f8   :  { %2681 = vtanh.f32 %v1030_v33  ;;  %v2542_v35 = vmul.f32 -1.442695, %v1030_v33 }
0x19fa   :  { %2683 = vpow2.f32 %v2542_v35 }
0x19fe   :  { %v2682_v34 = vpop.eup %2681 }
0x19ff   :  { %1053 = vrot.lane.b32.xlu0 %v2682_v34, %s2885_s4 }
0x1a00   :  { %v2684_v36 = vpop.eup %2683 }
0x1a01   :  { %v1034_v37 = vadd.f32 1.0, %v2684_v36 }
0x1a03   :  { %2685 = vrcp.f32 %v1034_v37  ;;  %v1046_v31 = vand.u32 2147483648, %v1034_v37  ;;  %vm1040_vm7 = vweird.f32 %v1034_v37  ;;  %v1044_v41 = vand.u32 2147483647, %v1034_v37 }
0x1a05   :  { %v1047_v43 = vor.u32 1.1754944e-38, %v1046_v31  ;;  %vm1045_vm10 = vcmp.eq.f32.partialorder %v1044_v41, 8.507059e+37 }
0x1a09   :  { %v2686_v38 = vpop.eup %2685 }
0x1a0a   :  { %v1036_v39 = vmul.f32 %v2686_v38, %v1034_v37  ;;  %vm1041_vm6 = vweird.f32 %v2686_v38 }
0x1a0b   :  { %vm1042_vm9 = vmor %vm1040_vm7, %vm1041_vm6 }
0x1a0c   :  { %v1037_v28 = vsub.f32 1.0, %v1036_v39 }
0x1a0e   :  { %v1038_v29 = vmul.f32 %v2686_v38, %v1037_v28 }
0x1a10   :  { %v1039_v40 = vadd.f32 %v2686_v38, %v1038_v29 }
0x1a12   :  { %v1043_v42 = vsel %vm1042_vm9, %v2686_v38, %v1039_v40 }
0x1a13   :  { %v1048_v45 = vsel %vm1045_vm10, %v1047_v43, %v1043_v42 }
0x1a14   :  { %v1051_v47 = vmul.f32 %v1048_v45, %v992_v18 }
0x1a71   :  { %v1054_v44 = vpop.permute.xlu0 %1053 }
0x1a72   :  { %v1056_v46 = vmul.f32 %v1054_v44, %v1048_v45 }
0x1a74   :  { %1058 = vrot.lane.b32.xlu1 %v1056_v46, %s2886_s24 }
0x1ae6   :  { %v1059_v48 = vpop.permute.xlu1 %1058 }
0x1ae7   :  { %v1061_v49 = vadd.f32 %v1059_v48, %v1051_v47 }
0x1ae9   :  { %2687 = vtanh.f32 %v1061_v49 }
0x1aef   :  { %v2688_v50 = vpop.eup %2687 }
0x1af0   :  { %1064 = vrot.lane.b32.xlu2 %v2688_v50, %s2885_s4 }
0x1b4a   :  { %v1065_v51 = vpop.permute.xlu2 %1064 }
0x1b4b   :  { %v1067_v52 = vmul.f32 %v1065_v51, %v1048_v45 }
0x1b4d   :  { %1075 = vrot.lane.b32.xlu0 %v1067_v52, %s2886_s24  ;;  %v1207_v52 = vld [vmem:[#allocation2 + $0x2e] sm:$0x1] }
0x1bbf   :  { %v1076_v53 = vpop.permute.xlu0 %1075 }
0x1bc0   :  { %2543 = vmatmul.msk.f32.vlgmr.msra.gmra.mxu3 %vm247_vm8, %v1076_v53  ;;  %v1209_v53 = vrot.slane %v1207_v52, 7  ;;  %v1344_v52 = vld [vmem:[#allocation2 + $0x10] sm:$0x1] }
0x1bc1   :  { %1505 = vmatpush.msra.mxu3 %v3154_v26 }
0x1bc2   :  { %v1211_v55 = vsel %vm245_vm3, %v1206_v54, %v1209_v53 }
0x1bc3   :  { %1506 = vmatpush.msra.mxu3 %v3170_v56 }
0x1bc5   :  { %1507 = vmatpush.msra.mxu3 %v3176_v57 }
0x1bc7   :  { %1508 = vmatpush.msra.mxu3 %v3182_v58 }
0x1c43   :  { %v1096_v61 = vpop.f32.mrf.mxu3 }
0x1c44   :  { %v1099_v62 = vadd.f32 %v1096_v61, %v1073_v60 }
0x1c46   :  { %2689 = vtanh.f32 %v1099_v62  ;;  %v2544_v0 = vmul.f32 -1.442695, %v1099_v62 }
0x1c48   :  { %2691 = vpow2.f32 %v2544_v0 }
0x1c4c   :  { %v2690_v63 = vpop.eup %2689 }
0x1c4d   :  { %1122 = vrot.lane.b32.xlu1 %v2690_v63, %s2885_s4 }
0x1c4e   :  { %v2692_v1 = vpop.eup %2691 }
0x1c4f   :  { %v1103_v2 = vadd.f32 1.0, %v2692_v1 }
0x1c51   :  { %2693 = vrcp.f32 %v1103_v2  ;;  %v1115_v7 = vand.u32 2147483648, %v1103_v2  ;;  %vm1109_vm12 = vweird.f32 %v1103_v2  ;;  %v1113_v8 = vand.u32 2147483647, %v1103_v2 }
0x1c53   :  { %v1116_v10 = vor.u32 1.1754944e-38, %v1115_v7  ;;  %vm1114_vm14 = vcmp.eq.f32.partialorder %v1113_v8, 8.507059e+37 }
0x1c57   :  { %v2694_v3 = vpop.eup %2693 }
0x1c58   :  { %v1105_v4 = vmul.f32 %v2694_v3, %v1103_v2  ;;  %vm1110_vm11 = vweird.f32 %v2694_v3 }
0x1c59   :  { %vm1111_vm13 = vmor %vm1109_vm12, %vm1110_vm11 }
0x1c5a   :  { %v1106_v23 = vsub.f32 1.0, %v1105_v4 }
0x1c5c   :  { %v1107_v5 = vmul.f32 %v2694_v3, %v1106_v23 }
0x1c5e   :  { %v1108_v6 = vadd.f32 %v2694_v3, %v1107_v5 }
0x1c60   :  { %v1112_v9 = vsel %vm1111_vm13, %v2694_v3, %v1108_v6 }
0x1c61   :  { %v1117_v12 = vsel %vm1114_vm14, %v1116_v10, %v1112_v9 }
0x1c62   :  { %v1120_v14 = vmul.f32 %v1117_v12, %v1061_v49 }
0x1cbf   :  { %v1123_v11 = vpop.permute.xlu1 %1122 }
0x1cc0   :  { %v1125_v13 = vmul.f32 %v1123_v11, %v1117_v12 }
0x1cc2   :  { %1127 = vrot.lane.b32.xlu2 %v1125_v13, %s2886_s24 }
0x1d1c   :  { %v1128_v15 = vpop.permute.xlu2 %1127 }
0x1d1d   :  { %v1130_v16 = vadd.f32 %v1128_v15, %v1120_v14 }
0x1d1f   :  { %2695 = vtanh.f32 %v1130_v16 }
0x1d25   :  { %v2696_v17 = vpop.eup %2695 }
0x1d26   :  { %1133 = vrot.lane.b32.xlu0 %v2696_v17, %s2885_s4 }
0x1d98   :  { %v1134_v18 = vpop.permute.xlu0 %1133 }
0x1d99   :  { %v1136_v19 = vmul.f32 %v1134_v18, %v1117_v12 }
0x1d9b   :  { %1144 = vrot.lane.b32.xlu1 %v1136_v19, %s2886_s24  ;;  %v1276_v19 = vld [vmem:[#allocation2 + $0x2f] sm:$0x1] }
0x1e0d   :  { %v1145_v20 = vpop.permute.xlu1 %1144 }
0x1e0e   :  { %2545 = vmatmul.msk.f32.vlgmr.msra.gmra.mxu0 %vm247_vm8, %v1145_v20  ;;  %v1278_v20 = vrot.slane %v1276_v19, 7  ;;  %v1413_v19 = vld [vmem:[#allocation2 + $0x11] sm:$0x1] }
0x1e0f   :  { %1574 = vmatpush.msra.mxu0 %v3154_v26 }
0x1e10   :  { %v1280_v22 = vsel %vm245_vm3, %v1275_v21, %v1278_v20 }
0x1e11   :  { %1575 = vmatpush.msra.mxu0 %v3170_v56 }
0x1e13   :  { %1576 = vmatpush.msra.mxu0 %v3176_v57 }
0x1e15   :  { %1577 = vmatpush.msra.mxu0 %v3182_v58 }
0x1e8b   :  { %v1165_v27 = vpop.f32.mrf.mxu0 }
0x1e8c   :  { %v1168_v30 = vadd.f32 %v1165_v27, %v1142_v25 }
0x1e8e   :  { %2697 = vtanh.f32 %v1168_v30  ;;  %v2546_v33 = vmul.f32 -1.442695, %v1168_v30 }
0x1e90   :  { %2699 = vpow2.f32 %v2546_v33 }
0x1e94   :  { %v2698_v32 = vpop.eup %2697 }
0x1e95   :  { %1191 = vrot.lane.b32.xlu2 %v2698_v32, %s2885_s4 }
0x1e96   :  { %v2700_v34 = vpop.eup %2699 }
0x1e97   :  { %v1172_v35 = vadd.f32 1.0, %v2700_v34 }
0x1e99   :  { %2701 = vrcp.f32 %v1172_v35  ;;  %v1184_v29 = vand.u32 2147483648, %v1172_v35  ;;  %vm1178_vm0 = vweird.f32 %v1172_v35  ;;  %v1182_v40 = vand.u32 2147483647, %v1172_v35 }
0x1e9b   :  { %v1185_v41 = vor.u32 1.1754944e-38, %v1184_v29  ;;  %vm1183_vm2 = vcmp.eq.f32.partialorder %v1182_v40, 8.507059e+37 }
0x1e9f   :  { %v2702_v36 = vpop.eup %2701 }
0x1ea0   :  { %v1174_v37 = vmul.f32 %v2702_v36, %v1172_v35  ;;  %vm1179_vm15 = vweird.f32 %v2702_v36 }
0x1ea1   :  { %vm1180_vm1 = vmor %vm1178_vm0, %vm1179_vm15 }
0x1ea2   :  { %v1175_v38 = vsub.f32 1.0, %v1174_v37 }
0x1ea4   :  { %v1176_v39 = vmul.f32 %v2702_v36, %v1175_v38 }
0x1ea6   :  { %v1177_v28 = vadd.f32 %v2702_v36, %v1176_v39 }
0x1ea8   :  { %v1181_v31 = vsel %vm1180_vm1, %v2702_v36, %v1177_v28 }
0x1ea9   :  { %v1186_v43 = vsel %vm1183_vm2, %v1185_v41, %v1181_v31 }
0x1eaa   :  { %v1189_v45 = vmul.f32 %v1186_v43, %v1130_v16 }
0x1eef   :  { %v1192_v42 = vpop.permute.xlu2 %1191 }
0x1ef0   :  { %v1194_v44 = vmul.f32 %v1192_v42, %v1186_v43 }
0x1ef2   :  { %1196 = vrot.lane.b32.xlu0 %v1194_v44, %s2886_s24 }
0x1f64   :  { %v1197_v46 = vpop.permute.xlu0 %1196 }
0x1f65   :  { %v1199_v47 = vadd.f32 %v1197_v46, %v1189_v45 }
0x1f67   :  { %2703 = vtanh.f32 %v1199_v47 }
0x1f6d   :  { %v2704_v48 = vpop.eup %2703 }
0x1f6e   :  { %1202 = vrot.lane.b32.xlu1 %v2704_v48, %s2885_s4 }
0x1fe0   :  { %v1203_v49 = vpop.permute.xlu1 %1202 }
0x1fe1   :  { %v1205_v50 = vmul.f32 %v1203_v49, %v1186_v43 }
0x1fe3   :  { %1213 = vrot.lane.b32.xlu2 %v1205_v50, %s2886_s24  ;;  %v1345_v50 = vld [vmem:[#allocation2 + $0x30] sm:$0x1] }
0x203d   :  { %v1214_v51 = vpop.permute.xlu2 %1213 }
0x203e   :  { %2547 = vmatmul.msk.f32.vlgmr.msra.gmra.mxu1 %vm247_vm8, %v1214_v51  ;;  %v1347_v51 = vrot.slane %v1345_v50, 7  ;;  %v1482_v50 = vld [vmem:[#allocation2 + $0x12] sm:$0x1] }
0x203f   :  { %1643 = vmatpush.msra.mxu1 %v3154_v26 }
0x2040   :  { %v1349_v53 = vsel %vm245_vm3, %v1344_v52, %v1347_v51 }
0x2041   :  { %1644 = vmatpush.msra.mxu1 %v3170_v56 }
0x2043   :  { %1645 = vmatpush.msra.mxu1 %v3176_v57 }
0x2045   :  { %1646 = vmatpush.msra.mxu1 %v3182_v58 }
0x20bb   :  { %v1234_v59 = vpop.f32.mrf.mxu1 }
0x20bc   :  { %v1237_v60 = vadd.f32 %v1234_v59, %v1211_v55 }
0x20be   :  { %2705 = vtanh.f32 %v1237_v60  ;;  %v2548_v62 = vmul.f32 -1.442695, %v1237_v60 }
0x20c0   :  { %2707 = vpow2.f32 %v2548_v62 }
0x20c4   :  { %v2706_v61 = vpop.eup %2705 }
0x20c5   :  { %1260 = vrot.lane.b32.xlu0 %v2706_v61, %s2885_s4 }
0x20c6   :  { %v2708_v63 = vpop.eup %2707 }
0x20c7   :  { %v1241_v0 = vadd.f32 1.0, %v2708_v63 }
0x20c9   :  { %2709 = vrcp.f32 %v1241_v0  ;;  %v1253_v5 = vand.u32 2147483648, %v1241_v0  ;;  %vm1247_vm5 = vweird.f32 %v1241_v0  ;;  %v1251_v6 = vand.u32 2147483647, %v1241_v0 }
0x20cb   :  { %v1254_v8 = vor.u32 1.1754944e-38, %v1253_v5  ;;  %vm1252_vm7 = vcmp.eq.f32.partialorder %v1251_v6, 8.507059e+37 }
0x20cf   :  { %v2710_v1 = vpop.eup %2709 }
0x20d0   :  { %v1243_v2 = vmul.f32 %v2710_v1, %v1241_v0  ;;  %vm1248_vm4 = vweird.f32 %v2710_v1 }
0x20d1   :  { %vm1249_vm6 = vmor %vm1247_vm5, %vm1248_vm4 }
0x20d2   :  { %v1244_v3 = vsub.f32 1.0, %v1243_v2 }
0x20d4   :  { %v1245_v4 = vmul.f32 %v2710_v1, %v1244_v3 }
0x20d6   :  { %v1246_v23 = vadd.f32 %v2710_v1, %v1245_v4 }
0x20d8   :  { %v1250_v7 = vsel %vm1249_vm6, %v2710_v1, %v1246_v23 }
0x20d9   :  { %v1255_v10 = vsel %vm1252_vm7, %v1254_v8, %v1250_v7 }
0x20da   :  { %v1258_v12 = vmul.f32 %v1255_v10, %v1199_v47 }
0x2137   :  { %v1261_v9 = vpop.permute.xlu0 %1260 }
0x2138   :  { %v1263_v11 = vmul.f32 %v1261_v9, %v1255_v10 }
0x213a   :  { %1265 = vrot.lane.b32.xlu1 %v1263_v11, %s2886_s24 }
0x21ac   :  { %v1266_v13 = vpop.permute.xlu1 %1265 }
0x21ad   :  { %v1268_v14 = vadd.f32 %v1266_v13, %v1258_v12 }
0x21af   :  { %2711 = vtanh.f32 %v1268_v14 }
0x21b5   :  { %v2712_v15 = vpop.eup %2711 }
0x21b6   :  { %1271 = vrot.lane.b32.xlu2 %v2712_v15, %s2885_s4 }
0x2210   :  { %v1272_v16 = vpop.permute.xlu2 %1271 }
0x2211   :  { %v1274_v17 = vmul.f32 %v1272_v16, %v1255_v10 }
0x2213   :  { %1282 = vrot.lane.b32.xlu0 %v1274_v17, %s2886_s24  ;;  %v1414_v17 = vld [vmem:[#allocation2 + $0x31] sm:$0x1] }
0x2285   :  { %v1283_v18 = vpop.permute.xlu0 %1282 }
0x2286   :  { %2549 = vmatmul.msk.f32.vlgmr.msrb.gmra.mxu3 %vm247_vm8, %v1283_v18  ;;  %v1416_v18 = vrot.slane %v1414_v17, 7  ;;  %v1551_v17 = vld [vmem:[#allocation2 + $0x13] sm:$0x1] }
0x2287   :  { %1781 = vmatpush.msrb.mxu3 %v3154_v26 }
0x2288   :  { %v1418_v20 = vsel %vm245_vm3, %v1413_v19, %v1416_v18 }
0x2289   :  { %1782 = vmatpush.msrb.mxu3 %v3170_v56 }
0x228b   :  { %1783 = vmatpush.msrb.mxu3 %v3176_v57 }
0x228d   :  { %1784 = vmatpush.msrb.mxu3 %v3182_v58 }
0x2309   :  { %v1303_v24 = vpop.f32.mrf.mxu3 }
0x230a   :  { %v1306_v25 = vadd.f32 %v1303_v24, %v1280_v22 }
0x230c   :  { %2713 = vtanh.f32 %v1306_v25  ;;  %v2550_v30 = vmul.f32 -1.442695, %v1306_v25 }
0x230e   :  { %2715 = vpow2.f32 %v2550_v30 }
0x2312   :  { %v2714_v27 = vpop.eup %2713 }
0x2313   :  { %1329 = vrot.lane.b32.xlu1 %v2714_v27, %s2885_s4 }
0x2314   :  { %v2716_v32 = vpop.eup %2715 }
0x2315   :  { %v1310_v33 = vadd.f32 1.0, %v2716_v32 }
0x2317   :  { %2717 = vrcp.f32 %v1310_v33  ;;  %v1322_v39 = vand.u32 2147483648, %v1310_v33  ;;  %vm1316_vm10 = vweird.f32 %v1310_v33  ;;  %v1320_v28 = vand.u32 2147483647, %v1310_v33 }
0x2319   :  { %v1323_v40 = vor.u32 1.1754944e-38, %v1322_v39  ;;  %vm1321_vm12 = vcmp.eq.f32.partialorder %v1320_v28, 8.507059e+37 }
0x231d   :  { %v2718_v34 = vpop.eup %2717 }
0x231e   :  { %v1312_v35 = vmul.f32 %v2718_v34, %v1310_v33  ;;  %vm1317_vm9 = vweird.f32 %v2718_v34 }
0x231f   :  { %vm1318_vm11 = vmor %vm1316_vm10, %vm1317_vm9 }
0x2320   :  { %v1313_v36 = vsub.f32 1.0, %v1312_v35 }
0x2322   :  { %v1314_v37 = vmul.f32 %v2718_v34, %v1313_v36 }
0x2324   :  { %v1315_v38 = vadd.f32 %v2718_v34, %v1314_v37 }
0x2326   :  { %v1319_v29 = vsel %vm1318_vm11, %v2718_v34, %v1315_v38 }
0x2327   :  { %v1324_v41 = vsel %vm1321_vm12, %v1323_v40, %v1319_v29 }
0x2328   :  { %v1327_v43 = vmul.f32 %v1324_v41, %v1268_v14 }
0x2385   :  { %v1330_v31 = vpop.permute.xlu1 %1329 }
0x2386   :  { %v1332_v42 = vmul.f32 %v1330_v31, %v1324_v41 }
0x2388   :  { %1334 = vrot.lane.b32.xlu2 %v1332_v42, %s2886_s24 }
0x23e2   :  { %v1335_v44 = vpop.permute.xlu2 %1334 }
0x23e3   :  { %v1337_v45 = vadd.f32 %v1335_v44, %v1327_v43 }
0x23e5   :  { %2719 = vtanh.f32 %v1337_v45 }
0x23eb   :  { %v2720_v46 = vpop.eup %2719 }
0x23ec   :  { %1340 = vrot.lane.b32.xlu0 %v2720_v46, %s2885_s4 }
0x245e   :  { %v1341_v47 = vpop.permute.xlu0 %1340 }
0x245f   :  { %v1343_v48 = vmul.f32 %v1341_v47, %v1324_v41 }
0x2461   :  { %1351 = vrot.lane.b32.xlu1 %v1343_v48, %s2886_s24  ;;  %v1483_v48 = vld [vmem:[#allocation2 + $0x32] sm:$0x1] }
0x24d3   :  { %v1352_v49 = vpop.permute.xlu1 %1351 }
0x24d4   :  { %2551 = vmatmul.msk.f32.vlgmr.msrb.gmra.mxu0 %vm247_vm8, %v1352_v49  ;;  %v1485_v49 = vrot.slane %v1483_v48, 7  ;;  %v1620_v48 = vld [vmem:[#allocation2 + $0x14] sm:$0x1] }
0x24d5   :  { %1850 = vmatpush.msrb.mxu0 %v3154_v26 }
0x24d6   :  { %v1487_v51 = vsel %vm245_vm3, %v1482_v50, %v1485_v49 }
0x24d7   :  { %1851 = vmatpush.msrb.mxu0 %v3170_v56 }
0x24d9   :  { %1852 = vmatpush.msrb.mxu0 %v3176_v57 }
0x24db   :  { %1853 = vmatpush.msrb.mxu0 %v3182_v58 }
0x2551   :  { %v1372_v54 = vpop.f32.mrf.mxu0 }
0x2552   :  { %v1375_v55 = vadd.f32 %v1372_v54, %v1349_v53 }
0x2554   :  { %2721 = vtanh.f32 %v1375_v55  ;;  %v2552_v60 = vmul.f32 -1.442695, %v1375_v55 }
0x2556   :  { %2723 = vpow2.f32 %v2552_v60 }
0x255a   :  { %v2722_v59 = vpop.eup %2721 }
0x255b   :  { %1398 = vrot.lane.b32.xlu2 %v2722_v59, %s2885_s4 }
0x255c   :  { %v2724_v61 = vpop.eup %2723 }
0x255d   :  { %v1379_v62 = vadd.f32 1.0, %v2724_v61 }
0x255f   :  { %2725 = vrcp.f32 %v1379_v62  ;;  %v1391_v4 = vand.u32 2147483648, %v1379_v62  ;;  %vm1385_vm14 = vweird.f32 %v1379_v62  ;;  %v1389_v23 = vand.u32 2147483647, %v1379_v62 }
0x2561   :  { %v1392_v6 = vor.u32 1.1754944e-38, %v1391_v4  ;;  %vm1390_vm0 = vcmp.eq.f32.partialorder %v1389_v23, 8.507059e+37 }
0x2565   :  { %v2726_v63 = vpop.eup %2725 }
0x2566   :  { %v1381_v0 = vmul.f32 %v2726_v63, %v1379_v62  ;;  %vm1386_vm13 = vweird.f32 %v2726_v63 }
0x2567   :  { %vm1387_vm15 = vmor %vm1385_vm14, %vm1386_vm13 }
0x2568   :  { %v1382_v1 = vsub.f32 1.0, %v1381_v0 }
0x256a   :  { %v1383_v2 = vmul.f32 %v2726_v63, %v1382_v1 }
0x256c   :  { %v1384_v3 = vadd.f32 %v2726_v63, %v1383_v2 }
0x256e   :  { %v1388_v5 = vsel %vm1387_vm15, %v2726_v63, %v1384_v3 }
0x256f   :  { %v1393_v8 = vsel %vm1390_vm0, %v1392_v6, %v1388_v5 }
0x2570   :  { %v1396_v10 = vmul.f32 %v1393_v8, %v1337_v45 }
0x25b5   :  { %v1399_v7 = vpop.permute.xlu2 %1398 }
0x25b6   :  { %v1401_v9 = vmul.f32 %v1399_v7, %v1393_v8 }
0x25b8   :  { %1403 = vrot.lane.b32.xlu0 %v1401_v9, %s2886_s24 }
0x262a   :  { %v1404_v11 = vpop.permute.xlu0 %1403 }
0x262b   :  { %v1406_v12 = vadd.f32 %v1404_v11, %v1396_v10 }
0x262d   :  { %2727 = vtanh.f32 %v1406_v12 }
0x2633   :  { %v2728_v13 = vpop.eup %2727 }
0x2634   :  { %1409 = vrot.lane.b32.xlu1 %v2728_v13, %s2885_s4 }
0x26a6   :  { %v1410_v14 = vpop.permute.xlu1 %1409 }
0x26a7   :  { %v1412_v15 = vmul.f32 %v1410_v14, %v1393_v8 }
0x26a9   :  { %1420 = vrot.lane.b32.xlu2 %v1412_v15, %s2886_s24  ;;  %v1552_v15 = vld [vmem:[#allocation2 + $0x33] sm:$0x1] }
0x2703   :  { %v1421_v16 = vpop.permute.xlu2 %1420 }
0x2704   :  { %2553 = vmatmul.msk.f32.vlgmr.msrb.gmra.mxu1 %vm247_vm8, %v1421_v16  ;;  %v1554_v16 = vrot.slane %v1552_v15, 7  ;;  %v1689_v15 = vld [vmem:[#allocation2 + $0x15] sm:$0x1] }
0x2705   :  { %1919 = vmatpush.msrb.mxu1 %v3154_v26 }
0x2706   :  { %v1556_v18 = vsel %vm245_vm3, %v1551_v17, %v1554_v16 }
0x2707   :  { %1920 = vmatpush.msrb.mxu1 %v3170_v56 }
0x2709   :  { %1921 = vmatpush.msrb.mxu1 %v3176_v57 }
0x270b   :  { %1922 = vmatpush.msrb.mxu1 %v3182_v58 }
0x2781   :  { %v1441_v21 = vpop.f32.mrf.mxu1 }
0x2782   :  { %v1444_v22 = vadd.f32 %v1441_v21, %v1418_v20 }
0x2784   :  { %2729 = vtanh.f32 %v1444_v22  ;;  %v2554_v25 = vmul.f32 -1.442695, %v1444_v22 }
0x2786   :  { %2731 = vpow2.f32 %v2554_v25 }
0x278a   :  { %v2730_v24 = vpop.eup %2729 }
0x278b   :  { %1467 = vrot.lane.b32.xlu0 %v2730_v24, %s2885_s4 }
0x278c   :  { %v2732_v27 = vpop.eup %2731 }
0x278d   :  { %v1448_v30 = vadd.f32 1.0, %v2732_v27 }
0x278f   :  { %2733 = vrcp.f32 %v1448_v30  ;;  %v1460_v37 = vand.u32 2147483648, %v1448_v30  ;;  %vm1454_vm2 = vweird.f32 %v1448_v30  ;;  %v1458_v38 = vand.u32 2147483647, %v1448_v30 }
0x2791   :  { %v1461_v28 = vor.u32 1.1754944e-38, %v1460_v37  ;;  %vm1459_vm5 = vcmp.eq.f32.partialorder %v1458_v38, 8.507059e+37 }
0x2795   :  { %v2734_v32 = vpop.eup %2733 }
0x2796   :  { %v1450_v33 = vmul.f32 %v2734_v32, %v1448_v30  ;;  %vm1455_vm1 = vweird.f32 %v2734_v32 }
0x2797   :  { %vm1456_vm4 = vmor %vm1454_vm2, %vm1455_vm1 }
0x2798   :  { %v1451_v34 = vsub.f32 1.0, %v1450_v33 }
0x279a   :  { %v1452_v35 = vmul.f32 %v2734_v32, %v1451_v34 }
0x279c   :  { %v1453_v36 = vadd.f32 %v2734_v32, %v1452_v35 }
0x279e   :  { %v1457_v39 = vsel %vm1456_vm4, %v2734_v32, %v1453_v36 }
0x279f   :  { %v1462_v40 = vsel %vm1459_vm5, %v1461_v28, %v1457_v39 }
0x27a0   :  { %v1465_v41 = vmul.f32 %v1462_v40, %v1406_v12 }
0x27fd   :  { %v1468_v29 = vpop.permute.xlu0 %1467 }
0x27fe   :  { %v1470_v31 = vmul.f32 %v1468_v29, %v1462_v40 }
0x2800   :  { %1472 = vrot.lane.b32.xlu1 %v1470_v31, %s2886_s24 }
0x2872   :  { %v1473_v42 = vpop.permute.xlu1 %1472 }
0x2873   :  { %v1475_v43 = vadd.f32 %v1473_v42, %v1465_v41 }
0x2875   :  { %2735 = vtanh.f32 %v1475_v43 }
0x287b   :  { %v2736_v44 = vpop.eup %2735 }
0x287c   :  { %1478 = vrot.lane.b32.xlu2 %v2736_v44, %s2885_s4 }
0x28d6   :  { %v1479_v45 = vpop.permute.xlu2 %1478 }
0x28d7   :  { %v1481_v46 = vmul.f32 %v1479_v45, %v1462_v40 }
0x28d9   :  { %1489 = vrot.lane.b32.xlu0 %v1481_v46, %s2886_s24  ;;  %v1621_v46 = vld [vmem:[#allocation2 + $0x34] sm:$0x1] }
0x294b   :  { %v1490_v47 = vpop.permute.xlu0 %1489 }
0x294c   :  { %2555 = vmatmul.msk.f32.vlgmr.msra.gmra.mxu3 %vm247_vm8, %v1490_v47  ;;  %v1623_v47 = vrot.slane %v1621_v46, 7  ;;  %v1758_v46 = vld [vmem:[#allocation2 + $0x16] sm:$0x1] }
0x294d   :  { %2057 = vmatpush.msra.mxu3 %v3154_v26 }
0x294e   :  { %v1625_v49 = vsel %vm245_vm3, %v1620_v48, %v1623_v47 }
0x294f   :  { %2058 = vmatpush.msra.mxu3 %v3170_v56 }
0x2951   :  { %2059 = vmatpush.msra.mxu3 %v3176_v57 }
0x2953   :  { %2060 = vmatpush.msra.mxu3 %v3182_v58 }
0x29cf   :  { %v1510_v52 = vpop.f32.mrf.mxu3 }
0x29d0   :  { %v1513_v53 = vadd.f32 %v1510_v52, %v1487_v51 }
0x29d2   :  { %2737 = vtanh.f32 %v1513_v53  ;;  %v2556_v55 = vmul.f32 -1.442695, %v1513_v53 }
0x29d4   :  { %2739 = vpow2.f32 %v2556_v55 }
0x29d8   :  { %v2738_v54 = vpop.eup %2737 }
0x29d9   :  { %1536 = vrot.lane.b32.xlu1 %v2738_v54, %s2885_s4 }
0x29da   :  { %v2740_v59 = vpop.eup %2739 }
0x29db   :  { %v1517_v60 = vadd.f32 1.0, %v2740_v59 }
0x29dd   :  { %2741 = vrcp.f32 %v1517_v60  ;;  %v1529_v2 = vand.u32 2147483648, %v1517_v60  ;;  %vm1523_vm7 = vweird.f32 %v1517_v60  ;;  %v1527_v3 = vand.u32 2147483647, %v1517_v60 }
0x29df   :  { %v1530_v23 = vor.u32 1.1754944e-38, %v1529_v2  ;;  %vm1528_vm10 = vcmp.eq.f32.partialorder %v1527_v3, 8.507059e+37 }
0x29e3   :  { %v2742_v61 = vpop.eup %2741 }
0x29e4   :  { %v1519_v62 = vmul.f32 %v2742_v61, %v1517_v60  ;;  %vm1524_vm6 = vweird.f32 %v2742_v61 }
0x29e5   :  { %vm1525_vm9 = vmor %vm1523_vm7, %vm1524_vm6 }
0x29e6   :  { %v1520_v63 = vsub.f32 1.0, %v1519_v62 }
0x29e8   :  { %v1521_v0 = vmul.f32 %v2742_v61, %v1520_v63 }
0x29ea   :  { %v1522_v1 = vadd.f32 %v2742_v61, %v1521_v0 }
0x29ec   :  { %v1526_v4 = vsel %vm1525_vm9, %v2742_v61, %v1522_v1 }
0x29ed   :  { %v1531_v6 = vsel %vm1528_vm10, %v1530_v23, %v1526_v4 }
0x29ee   :  { %v1534_v8 = vmul.f32 %v1531_v6, %v1475_v43 }
0x2a4b   :  { %v1537_v5 = vpop.permute.xlu1 %1536 }
0x2a4c   :  { %v1539_v7 = vmul.f32 %v1537_v5, %v1531_v6 }
0x2a4e   :  { %1541 = vrot.lane.b32.xlu2 %v1539_v7, %s2886_s24 }
0x2aa8   :  { %v1542_v9 = vpop.permute.xlu2 %1541 }
0x2aa9   :  { %v1544_v10 = vadd.f32 %v1542_v9, %v1534_v8 }
0x2aab   :  { %2743 = vtanh.f32 %v1544_v10 }
0x2ab1   :  { %v2744_v11 = vpop.eup %2743 }
0x2ab2   :  { %1547 = vrot.lane.b32.xlu0 %v2744_v11, %s2885_s4 }
0x2b24   :  { %v1548_v12 = vpop.permute.xlu0 %1547 }
0x2b25   :  { %v1550_v13 = vmul.f32 %v1548_v12, %v1531_v6  ;;  %v3294_v12 = vld [vmem:[%s3400_s5 + $0x18] sm:$0xff] }
0x2b27   :  { %1558 = vrot.lane.b32.xlu1 %v1550_v13, %s2886_s24  ;;  %v1690_v13 = vld [vmem:[#allocation2 + $0x35] sm:$0x1] }
0x2b99   :  { %v1559_v14 = vpop.permute.xlu1 %1558 }
0x2b9a   :  { %2557 = vmatmul.msk.f32.vlgmr.msra.gmra.mxu0 %vm247_vm8, %v1559_v14  ;;  %v1692_v14 = vrot.slane %v1690_v13, 7  ;;  %v1827_v13 = vld [vmem:[#allocation2 + $0x17] sm:$0x1] }
0x2b9b   :  { %2126 = vmatpush.msra.mxu0 %v3154_v26 }
0x2b9c   :  { %v1694_v16 = vsel %vm245_vm3, %v1689_v15, %v1692_v14 }
0x2b9d   :  { %2127 = vmatpush.msra.mxu0 %v3170_v56 }
0x2b9f   :  { %2128 = vmatpush.msra.mxu0 %v3176_v57 }
0x2ba1   :  { %2129 = vmatpush.msra.mxu0 %v3182_v58 }
0x2c17   :  { %v1579_v19 = vpop.f32.mrf.mxu0 }
0x2c18   :  { %v1582_v20 = vadd.f32 %v1579_v19, %v1556_v18 }
0x2c1a   :  { %2745 = vtanh.f32 %v1582_v20  ;;  %v2558_v22 = vmul.f32 -1.442695, %v1582_v20 }
0x2c1c   :  { %2747 = vpow2.f32 %v2558_v22 }
0x2c20   :  { %v2746_v21 = vpop.eup %2745 }
0x2c21   :  { %1605 = vrot.lane.b32.xlu2 %v2746_v21, %s2885_s4 }
0x2c22   :  { %v2748_v24 = vpop.eup %2747 }
0x2c23   :  { %v1586_v25 = vadd.f32 1.0, %v2748_v24 }
0x2c25   :  { %2749 = vrcp.f32 %v1586_v25  ;;  %v1598_v35 = vand.u32 2147483648, %v1586_v25  ;;  %vm1592_vm12 = vweird.f32 %v1586_v25  ;;  %v1596_v36 = vand.u32 2147483647, %v1586_v25 }
0x2c27   :  { %v1599_v38 = vor.u32 1.1754944e-38, %v1598_v35  ;;  %vm1597_vm14 = vcmp.eq.f32.partialorder %v1596_v36, 8.507059e+37 }
0x2c2b   :  { %v2750_v27 = vpop.eup %2749 }
0x2c2c   :  { %v1588_v30 = vmul.f32 %v2750_v27, %v1586_v25  ;;  %vm1593_vm11 = vweird.f32 %v2750_v27 }
0x2c2d   :  { %vm1594_vm13 = vmor %vm1592_vm12, %vm1593_vm11 }
0x2c2e   :  { %v1589_v32 = vsub.f32 1.0, %v1588_v30 }
0x2c30   :  { %v1590_v33 = vmul.f32 %v2750_v27, %v1589_v32 }
0x2c32   :  { %v1591_v34 = vadd.f32 %v2750_v27, %v1590_v33 }
0x2c34   :  { %v1595_v37 = vsel %vm1594_vm13, %v2750_v27, %v1591_v34 }
0x2c35   :  { %v1600_v28 = vsel %vm1597_vm14, %v1599_v38, %v1595_v37 }
0x2c36   :  { %v1603_v40 = vmul.f32 %v1600_v28, %v1544_v10 }
0x2c7b   :  { %v1606_v39 = vpop.permute.xlu2 %1605 }
0x2c7c   :  { %v1608_v29 = vmul.f32 %v1606_v39, %v1600_v28 }
0x2c7e   :  { %1610 = vrot.lane.b32.xlu0 %v1608_v29, %s2886_s24 }
0x2cf0   :  { %v1611_v31 = vpop.permute.xlu0 %1610 }
0x2cf1   :  { %v1613_v41 = vadd.f32 %v1611_v31, %v1603_v40 }
0x2cf3   :  { %2751 = vtanh.f32 %v1613_v41 }
0x2cf9   :  { %v2752_v42 = vpop.eup %2751 }
0x2cfa   :  { %1616 = vrot.lane.b32.xlu1 %v2752_v42, %s2885_s4  ;;  %v2855_v42 = vld [vmem:[%s3400_s5 + $0x8] sm:$0xff] }
0x2d6c   :  { %v1617_v43 = vpop.permute.xlu1 %1616 }
0x2d6d   :  { %v1619_v44 = vmul.f32 %v1617_v43, %v1600_v28  ;;  %v2856_v43 = vld [vmem:[%s3400_s5] sm:$0xff] }
0x2d6f   :  { %1627 = vrot.lane.b32.xlu2 %v1619_v44, %s2886_s24  ;;  %v1759_v44 = vld [vmem:[#allocation2 + $0x36] sm:$0x1] }
0x2dc9   :  { %v1628_v45 = vpop.permute.xlu2 %1627 }
0x2dca   :  { %2559 = vmatmul.msk.f32.vlgmr.msra.gmra.mxu1 %vm247_vm8, %v1628_v45  ;;  %v1761_v45 = vrot.slane %v1759_v44, 7 }
0x2dcb   :  { %2195 = vmatpush.msra.mxu1 %v3154_v26 }
0x2dcc   :  { %v1763_v47 = vsel %vm245_vm3, %v1758_v46, %v1761_v45 }
0x2dcd   :  { %2196 = vmatpush.msra.mxu1 %v3170_v56 }
0x2dcf   :  { %2197 = vmatpush.msra.mxu1 %v3176_v57 }
0x2dd1   :  { %2198 = vmatpush.msra.mxu1 %v3182_v58 }
0x2e47   :  { %v1648_v50 = vpop.f32.mrf.mxu1 }
0x2e48   :  { %v1651_v51 = vadd.f32 %v1648_v50, %v1625_v49 }
0x2e4a   :  { %2753 = vtanh.f32 %v1651_v51  ;;  %v2560_v53 = vmul.f32 -1.442695, %v1651_v51 }
0x2e4c   :  { %2755 = vpow2.f32 %v2560_v53 }
0x2e50   :  { %v2754_v52 = vpop.eup %2753 }
0x2e51   :  { %1674 = vrot.lane.b32.xlu0 %v2754_v52, %s2885_s4 }
0x2e52   :  { %v2756_v26 = vpop.eup %2755 }
0x2e53   :  { %v1655_v54 = vadd.f32 1.0, %v2756_v26 }
0x2e55   :  { %2757 = vrcp.f32 %v1655_v54  ;;  %v1667_v63 = vand.u32 2147483648, %v1655_v54  ;;  %vm1661_vm0 = vweird.f32 %v1655_v54  ;;  %v1665_v0 = vand.u32 2147483647, %v1655_v54 }
0x2e57   :  { %v1668_v2 = vor.u32 1.1754944e-38, %v1667_v63  ;;  %vm1666_vm2 = vcmp.eq.f32.partialorder %v1665_v0, 8.507059e+37 }
0x2e5b   :  { %v2758_v55 = vpop.eup %2757 }
0x2e5c   :  { %v1657_v59 = vmul.f32 %v2758_v55, %v1655_v54  ;;  %vm1662_vm15 = vweird.f32 %v2758_v55 }
0x2e5d   :  { %vm1663_vm1 = vmor %vm1661_vm0, %vm1662_vm15 }
0x2e5e   :  { %v1658_v60 = vsub.f32 1.0, %v1657_v59 }
0x2e60   :  { %v1659_v61 = vmul.f32 %v2758_v55, %v1658_v60 }
0x2e62   :  { %v1660_v62 = vadd.f32 %v2758_v55, %v1659_v61 }
0x2e64   :  { %v1664_v1 = vsel %vm1663_vm1, %v2758_v55, %v1660_v62 }
0x2e65   :  { %v1669_v4 = vsel %vm1666_vm2, %v1668_v2, %v1664_v1 }
0x2e66   :  { %v1672_v5 = vmul.f32 %v1669_v4, %v1613_v41  ;;  %v2854_v41 = vld [vmem:[%s3400_s5 + $0x10] sm:$0xff] }
0x2ec3   :  { %v1675_v3 = vpop.permute.xlu0 %1674 }
0x2ec4   :  { %v1677_v23 = vmul.f32 %v1675_v3, %v1669_v4 }
0x2ec6   :  { %1679 = vrot.lane.b32.xlu1 %v1677_v23, %s2886_s24 }
0x2f38   :  { %v1680_v6 = vpop.permute.xlu1 %1679 }
0x2f39   :  { %v1682_v7 = vadd.f32 %v1680_v6, %v1672_v5 }
0x2f3b   :  { %2759 = vtanh.f32 %v1682_v7 }
0x2f41   :  { %v2760_v8 = vpop.eup %2759 }
0x2f42   :  { %1685 = vrot.lane.b32.xlu2 %v2760_v8, %s2885_s4 }
0x2f9c   :  { %v1686_v9 = vpop.permute.xlu2 %1685 }
0x2f9d   :  { %v1688_v10 = vmul.f32 %v1686_v9, %v1669_v4 }
0x2f9f   :  { %1696 = vrot.lane.b32.xlu0 %v1688_v10, %s2886_s24  ;;  %v1828_v10 = vld [vmem:[#allocation2 + $0x37] sm:$0x1] }
0x3011   :  { %v1697_v11 = vpop.permute.xlu0 %1696 }
0x3012   :  { %2561 = vmatmul.msk.f32.vlgmr.msrb.gmra.mxu2 %vm247_vm8, %v1697_v11  ;;  %v1830_v11 = vrot.slane %v1828_v10, 7 }
0x3013   :  { %2264 = vmatpush.msrb.mxu2 %v3294_v12 }
0x3014   :  { %v1832_v14 = vsel %vm245_vm3, %v1827_v13, %v1830_v11 }
0x3015   :  { %2265 = vmatpush.msrb.mxu2 %v3170_v56 }
0x3017   :  { %2266 = vmatpush.msrb.mxu2 %v3176_v57 }
0x3019   :  { %2267 = vmatpush.msrb.mxu2 %v3182_v58 }
0x3095   :  { %v1717_v17 = vpop.f32.mrf.mxu2 }
0x3096   :  { %v1720_v18 = vadd.f32 %v1717_v17, %v1694_v16 }
0x3098   :  { %2761 = vtanh.f32 %v1720_v18  ;;  %v2562_v20 = vmul.f32 -1.442695, %v1720_v18 }
0x309a   :  { %2763 = vpow2.f32 %v2562_v20 }
0x309e   :  { %v2762_v19 = vpop.eup %2761 }
0x309f   :  { %1743 = vrot.lane.b32.xlu1 %v2762_v19, %s2885_s4 }
0x30a0   :  { %v2764_v21 = vpop.eup %2763 }
0x30a1   :  { %v1724_v22 = vadd.f32 1.0, %v2764_v21 }
0x30a3   :  { %2765 = vrcp.f32 %v1724_v22  ;;  %v1736_v27 = vand.u32 2147483648, %v1724_v22  ;;  %vm1730_vm5 = vweird.f32 %v1724_v22  ;;  %v1734_v30 = vand.u32 2147483647, %v1724_v22 }
0x30a5   :  { %v1737_v33 = vor.u32 1.1754944e-38, %v1736_v27  ;;  %vm1735_vm7 = vcmp.eq.f32.partialorder %v1734_v30, 8.507059e+37 }
0x30a9   :  { %v2766_v56 = vpop.eup %2765 }
0x30aa   :  { %v1726_v57 = vmul.f32 %v2766_v56, %v1724_v22  ;;  %vm1731_vm4 = vweird.f32 %v2766_v56 }
0x30ab   :  { %vm1732_vm6 = vmor %vm1730_vm5, %vm1731_vm4 }
0x30ac   :  { %v1727_v24 = vsub.f32 1.0, %v1726_v57 }
0x30ae   :  { %v1728_v58 = vmul.f32 %v2766_v56, %v1727_v24 }
0x30b0   :  { %v1729_v25 = vadd.f32 %v2766_v56, %v1728_v58 }
0x30b2   :  { %v1733_v32 = vsel %vm1732_vm6, %v2766_v56, %v1729_v25 }
0x30b3   :  { %v1738_v35 = vsel %vm1735_vm7, %v1737_v33, %v1733_v32 }
0x30b4   :  { %v1741_v37 = vmul.f32 %v1738_v35, %v1682_v7 }
0x3111   :  { %v1744_v34 = vpop.permute.xlu1 %1743 }
0x3112   :  { %v1746_v36 = vmul.f32 %v1744_v34, %v1738_v35 }
0x3114   :  { %1748 = vrot.lane.b32.xlu2 %v1746_v36, %s2886_s24 }
0x316e   :  { %v1749_v38 = vpop.permute.xlu2 %1748 }
0x316f   :  { %v1751_v39 = vadd.f32 %v1749_v38, %v1741_v37 }
0x3171   :  { %2767 = vtanh.f32 %v1751_v39 }
0x3177   :  { %v2768_v28 = vpop.eup %2767 }
0x3178   :  { %1754 = vrot.lane.b32.xlu0 %v2768_v28, %s2885_s4 }
0x31ea   :  { %v1755_v29 = vpop.permute.xlu0 %1754 }
0x31eb   :  { %v1757_v40 = vmul.f32 %v1755_v29, %v1738_v35  ;;  %v1897_v29 = vld [vmem:[#allocation2 + $0x38] sm:$0x1] }
0x31ed   :  { %1765 = vrot.lane.b32.xlu1 %v1757_v40, %s2886_s24  ;;  %v1899_v40 = vrot.slane %v1897_v29, 7 }
0x325f   :  { %v1766_v31 = vpop.permute.xlu1 %1765 }
0x3260   :  { %2563 = vmatmul.msk.f32.vlgmr.msrb.gmra.mxu3 %vm247_vm8, %v1766_v31  ;;  %v1896_v31 = vld [vmem:[#allocation2 + $0x18] sm:$0x1] }
0x3261   :  { %2333 = vmatpush.msrb.mxu3 %v3294_v12 }
0x3263   :  { %2334 = vmatpush.msrb.mxu3 %v2854_v41 }
0x3265   :  { %2335 = vmatpush.msrb.mxu3 %v2855_v42 }
0x3267   :  { %2336 = vmatpush.msrb.mxu3 %v2856_v43 }
0x32e3   :  { %v1786_v48 = vpop.f32.mrf.mxu3 }
0x32e4   :  { %v1789_v49 = vadd.f32 %v1786_v48, %v1763_v47 }
0x32e6   :  { %2769 = vtanh.f32 %v1789_v49  ;;  %v2564_v51 = vmul.f32 -1.442695, %v1789_v49 }
0x32e8   :  { %2771 = vpow2.f32 %v2564_v51 }
0x32ec   :  { %v2770_v50 = vpop.eup %2769 }
0x32ed   :  { %1812 = vrot.lane.b32.xlu2 %v2770_v50, %s2885_s4 }
0x32ee   :  { %v2772_v52 = vpop.eup %2771 }
0x32ef   :  { %v1793_v53 = vadd.f32 1.0, %v2772_v52 }
0x32f1   :  { %2773 = vrcp.f32 %v1793_v53  ;;  %v1805_v61 = vand.u32 2147483648, %v1793_v53  ;;  %vm1799_vm10 = vweird.f32 %v1793_v53  ;;  %v1803_v62 = vand.u32 2147483647, %v1793_v53 }
0x32f3   :  { %v1806_v0 = vor.u32 1.1754944e-38, %v1805_v61  ;;  %vm1804_vm12 = vcmp.eq.f32.partialorder %v1803_v62, 8.507059e+37 }
0x32f7   :  { %v2774_v26 = vpop.eup %2773 }
0x32f8   :  { %v1795_v54 = vmul.f32 %v2774_v26, %v1793_v53  ;;  %vm1800_vm9 = vweird.f32 %v2774_v26 }
0x32f9   :  { %vm1801_vm11 = vmor %vm1799_vm10, %vm1800_vm9 }
0x32fa   :  { %v1796_v55 = vsub.f32 1.0, %v1795_v54 }
0x32fc   :  { %v1797_v59 = vmul.f32 %v2774_v26, %v1796_v55 }
0x32fe   :  { %v1798_v60 = vadd.f32 %v2774_v26, %v1797_v59 }
0x3300   :  { %v1802_v63 = vsel %vm1801_vm11, %v2774_v26, %v1798_v60 }
0x3301   :  { %v1807_v2 = vsel %vm1804_vm12, %v1806_v0, %v1802_v63 }
0x3302   :  { %v1810_v4 = vmul.f32 %v1807_v2, %v1751_v39 }
0x3347   :  { %v1813_v1 = vpop.permute.xlu2 %1812 }
0x3348   :  { %v1815_v3 = vmul.f32 %v1813_v1, %v1807_v2 }
0x334a   :  { %1817 = vrot.lane.b32.xlu0 %v1815_v3, %s2886_s24 }
0x33bc   :  { %v1818_v23 = vpop.permute.xlu0 %1817 }
0x33bd   :  { %v1820_v5 = vadd.f32 %v1818_v23, %v1810_v4  ;;  %v1966_v23 = vld [vmem:[#allocation2 + $0x39] sm:$0x1] }
0x33bf   :  { %2775 = vtanh.f32 %v1820_v5 }
0x33c5   :  { %v2776_v6 = vpop.eup %2775 }
0x33c6   :  { %1823 = vrot.lane.b32.xlu1 %v2776_v6, %s2885_s4  ;;  %v1965_v6 = vld [vmem:[#allocation2 + $0x19] sm:$0x1] }
0x3438   :  { %v1824_v7 = vpop.permute.xlu1 %1823 }
0x3439   :  { %v1826_v8 = vmul.f32 %v1824_v7, %v1807_v2 }
0x343b   :  { %1834 = vrot.lane.b32.xlu2 %v1826_v8, %s2886_s24 }
0x3495   :  { %v1835_v9 = vpop.permute.xlu2 %1834 }
0x3496   :  { %2565 = vmatmul.msk.f32.vlgmr.msrb.gmra.mxu0 %vm247_vm8, %v1835_v9 }
0x3497   :  { %2402 = vmatpush.msrb.mxu0 %v3294_v12 }
0x3499   :  { %2403 = vmatpush.msrb.mxu0 %v2854_v41  ;;  %v1901_v41 = vsel %vm245_vm3, %v1896_v31, %v1899_v40 }
0x349b   :  { %2404 = vmatpush.msrb.mxu0 %v2855_v42 }
0x349d   :  { %2405 = vmatpush.msrb.mxu0 %v2856_v43 }
0x3513   :  { %v1855_v15 = vpop.f32.mrf.mxu0 }
0x3514   :  { %v1858_v16 = vadd.f32 %v1855_v15, %v1832_v14 }
0x3516   :  { %2777 = vtanh.f32 %v1858_v16  ;;  %v2566_v18 = vmul.f32 -1.442695, %v1858_v16 }
0x3518   :  { %2779 = vpow2.f32 %v2566_v18 }
0x351c   :  { %v2778_v17 = vpop.eup %2777 }
0x351d   :  { %1881 = vrot.lane.b32.xlu0 %v2778_v17, %s2885_s4 }
0x351e   :  { %v2780_v19 = vpop.eup %2779 }
0x351f   :  { %v1862_v20 = vadd.f32 1.0, %v2780_v19 }
0x3521   :  { %2781 = vrcp.f32 %v1862_v20  ;;  %v1874_v24 = vand.u32 2147483648, %v1862_v20  ;;  %vm1868_vm14 = vweird.f32 %v1862_v20  ;;  %v1872_v58 = vand.u32 2147483647, %v1862_v20 }
0x3523   :  { %v1875_v27 = vor.u32 1.1754944e-38, %v1874_v24  ;;  %vm1873_vm0 = vcmp.eq.f32.partialorder %v1872_v58, 8.507059e+37 }
0x3527   :  { %v2782_v12 = vpop.eup %2781 }
0x3528   :  { %v1864_v21 = vmul.f32 %v2782_v12, %v1862_v20  ;;  %vm1869_vm13 = vweird.f32 %v2782_v12 }
0x3529   :  { %vm1870_vm15 = vmor %vm1868_vm14, %vm1869_vm13 }
0x352a   :  { %v1865_v22 = vsub.f32 1.0, %v1864_v21 }
0x352c   :  { %v1866_v56 = vmul.f32 %v2782_v12, %v1865_v22 }
0x352e   :  { %v1867_v57 = vadd.f32 %v2782_v12, %v1866_v56 }
0x3530   :  { %v1871_v25 = vsel %vm1870_vm15, %v2782_v12, %v1867_v57 }
0x3531   :  { %v1876_v32 = vsel %vm1873_vm0, %v1875_v27, %v1871_v25 }
0x3532   :  { %v1879_v34 = vmul.f32 %v1876_v32, %v1820_v5  ;;  %v1968_v5 = vrot.slane %v1966_v23, 7 }
0x3534   :  { %v1970_v7 = vsel %vm245_vm3, %v1965_v6, %v1968_v5 }
0x358f   :  { %v1882_v30 = vpop.permute.xlu0 %1881 }
0x3590   :  { %v1884_v33 = vmul.f32 %v1882_v30, %v1876_v32 }
0x3592   :  { %1886 = vrot.lane.b32.xlu1 %v1884_v33, %s2886_s24 }
0x3604   :  { %v1887_v35 = vpop.permute.xlu1 %1886 }
0x3605   :  { %v1889_v36 = vadd.f32 %v1887_v35, %v1879_v34  ;;  %v2035_v35 = vld [vmem:[#allocation2 + $0x3a] sm:$0x1] }
0x3607   :  { %2783 = vtanh.f32 %v1889_v36 }
0x360d   :  { %v2784_v37 = vpop.eup %2783 }
0x360e   :  { %1892 = vrot.lane.b32.xlu2 %v2784_v37, %s2885_s4  ;;  %v2034_v37 = vld [vmem:[#allocation2 + $0x1a] sm:$0x1] }
0x3668   :  { %v1893_v38 = vpop.permute.xlu2 %1892 }
0x3669   :  { %v1895_v39 = vmul.f32 %v1893_v38, %v1876_v32 }
0x366b   :  { %1903 = vrot.lane.b32.xlu0 %v1895_v39, %s2886_s24 }
0x36dd   :  { %v1904_v28 = vpop.permute.xlu0 %1903 }
0x36de   :  { %2567 = vmatmul.msk.f32.vlgmr.msrb.gmra.mxu1 %vm247_vm8, %v1904_v28 }
0x375b   :  { %v1924_v42 = vpop.f32.mrf.mxu1 }
0x375c   :  { %v1927_v43 = vadd.f32 %v1924_v42, %v1901_v41 }
0x375e   :  { %2785 = vtanh.f32 %v1927_v43  ;;  %v2568_v45 = vmul.f32 -1.442695, %v1927_v43 }
0x3760   :  { %2787 = vpow2.f32 %v2568_v45 }
0x3764   :  { %v2786_v44 = vpop.eup %2785 }
0x3765   :  { %1950 = vrot.lane.b32.xlu1 %v2786_v44, %s2885_s4 }
0x3766   :  { %v2788_v46 = vpop.eup %2787 }
0x3767   :  { %v1931_v47 = vadd.f32 1.0, %v2788_v46 }
0x3769   :  { %2789 = vrcp.f32 %v1931_v47  ;;  %v1943_v53 = vand.u32 2147483648, %v1931_v47  ;;  %vm1937_vm2 = vweird.f32 %v1931_v47  ;;  %v1941_v26 = vand.u32 2147483647, %v1931_v47 }
0x376b   :  { %v1944_v55 = vor.u32 1.1754944e-38, %v1943_v53  ;;  %vm1942_vm5 = vcmp.eq.f32.partialorder %v1941_v26, 8.507059e+37 }
0x376f   :  { %v2790_v48 = vpop.eup %2789 }
0x3770   :  { %v1933_v49 = vmul.f32 %v2790_v48, %v1931_v47  ;;  %vm1938_vm1 = vweird.f32 %v2790_v48 }
0x3771   :  { %vm1939_vm4 = vmor %vm1937_vm2, %vm1938_vm1 }
0x3772   :  { %v1934_v50 = vsub.f32 1.0, %v1933_v49 }
0x3774   :  { %v1935_v51 = vmul.f32 %v2790_v48, %v1934_v50 }
0x3776   :  { %v1936_v52 = vadd.f32 %v2790_v48, %v1935_v51 }
0x3778   :  { %v1940_v54 = vsel %vm1939_vm4, %v2790_v48, %v1936_v52 }
0x3779   :  { %v1945_v60 = vsel %vm1942_vm5, %v1944_v55, %v1940_v54 }
0x377a   :  { %v1948_v62 = vmul.f32 %v1945_v60, %v1889_v36  ;;  %v2037_v36 = vrot.slane %v2035_v35, 7 }
0x377c   :  { %v2039_v38 = vsel %vm245_vm3, %v2034_v37, %v2037_v36 }
0x37d7   :  { %v1951_v59 = vpop.permute.xlu1 %1950 }
0x37d8   :  { %v1953_v61 = vmul.f32 %v1951_v59, %v1945_v60 }
0x37da   :  { %1955 = vrot.lane.b32.xlu2 %v1953_v61, %s2886_s24 }
0x3834   :  { %v1956_v63 = vpop.permute.xlu2 %1955 }
0x3835   :  { %v1958_v0 = vadd.f32 %v1956_v63, %v1948_v62  ;;  %v2104_v63 = vld [vmem:[#allocation2 + $0x3b] sm:$0x1] }
0x3837   :  { %2791 = vtanh.f32 %v1958_v0 }
0x383d   :  { %v2792_v1 = vpop.eup %2791 }
0x383e   :  { %1961 = vrot.lane.b32.xlu0 %v2792_v1, %s2885_s4  ;;  %v2103_v1 = vld [vmem:[#allocation2 + $0x1b] sm:$0x1] }
0x38b0   :  { %v1962_v2 = vpop.permute.xlu0 %1961 }
0x38b1   :  { %v1964_v3 = vmul.f32 %v1962_v2, %v1945_v60 }
0x38b3   :  { %1972 = vrot.lane.b32.xlu1 %v1964_v3, %s2886_s24 }
0x3925   :  { %v1973_v4 = vpop.permute.xlu1 %1972 }
0x3926   :  { %2569 = vmatmul.msk.f32.vlgmr.msra.gmra.mxu2 %vm247_vm8, %v1973_v4 }
0x39a9   :  { %v1993_v8 = vpop.f32.mrf.mxu2 }
0x39aa   :  { %v1996_v9 = vadd.f32 %v1993_v8, %v1970_v7 }
0x39ac   :  { %2793 = vtanh.f32 %v1996_v9  ;;  %v2570_v11 = vmul.f32 -1.442695, %v1996_v9 }
0x39ae   :  { %2795 = vpow2.f32 %v2570_v11 }
0x39b2   :  { %v2794_v10 = vpop.eup %2793 }
0x39b3   :  { %2019 = vrot.lane.b32.xlu2 %v2794_v10, %s2885_s4 }
0x39b4   :  { %v2796_v13 = vpop.eup %2795 }
0x39b5   :  { %v2000_v14 = vadd.f32 1.0, %v2796_v13 }
0x39b7   :  { %2797 = vrcp.f32 %v2000_v14  ;;  %v2012_v20 = vand.u32 2147483648, %v2000_v14  ;;  %vm2006_vm7 = vweird.f32 %v2000_v14  ;;  %v2010_v12 = vand.u32 2147483647, %v2000_v14 }
0x39b9   :  { %v2013_v22 = vor.u32 1.1754944e-38, %v2012_v20  ;;  %vm2011_vm10 = vcmp.eq.f32.partialorder %v2010_v12, 8.507059e+37 }
0x39bd   :  { %v2798_v15 = vpop.eup %2797 }
0x39be   :  { %v2002_v16 = vmul.f32 %v2798_v15, %v2000_v14  ;;  %vm2007_vm6 = vweird.f32 %v2798_v15 }
0x39bf   :  { %vm2008_vm9 = vmor %vm2006_vm7, %vm2007_vm6 }
0x39c0   :  { %v2003_v17 = vsub.f32 1.0, %v2002_v16 }
0x39c2   :  { %v2004_v18 = vmul.f32 %v2798_v15, %v2003_v17 }
0x39c4   :  { %v2005_v19 = vadd.f32 %v2798_v15, %v2004_v18 }
0x39c6   :  { %v2009_v21 = vsel %vm2008_vm9, %v2798_v15, %v2005_v19 }
0x39c7   :  { %v2014_v57 = vsel %vm2011_vm10, %v2013_v22, %v2009_v21 }
0x39c8   :  { %v2017_v58 = vmul.f32 %v2014_v57, %v1958_v0  ;;  %v2106_v0 = vrot.slane %v2104_v63, 7 }
0x39ca   :  { %v2108_v2 = vsel %vm245_vm3, %v2103_v1, %v2106_v0 }
0x3a0d   :  { %v2020_v56 = vpop.permute.xlu2 %2019 }
0x3a0e   :  { %v2022_v24 = vmul.f32 %v2020_v56, %v2014_v57 }
0x3a10   :  { %2024 = vrot.lane.b32.xlu0 %v2022_v24, %s2886_s24 }
0x3a82   :  { %v2025_v25 = vpop.permute.xlu0 %2024 }
0x3a83   :  { %v2027_v27 = vadd.f32 %v2025_v25, %v2017_v58  ;;  %v2173_v25 = vld [vmem:[#allocation2 + $0x3c] sm:$0x1] }
0x3a85   :  { %2799 = vtanh.f32 %v2027_v27 }
0x3a8b   :  { %v2800_v30 = vpop.eup %2799 }
0x3a8c   :  { %2030 = vrot.lane.b32.xlu1 %v2800_v30, %s2885_s4  ;;  %v2172_v30 = vld [vmem:[#allocation2 + $0x1c] sm:$0x1] }
0x3afe   :  { %v2031_v32 = vpop.permute.xlu1 %2030 }
0x3aff   :  { %v2033_v33 = vmul.f32 %v2031_v32, %v2014_v57 }
0x3b01   :  { %2041 = vrot.lane.b32.xlu2 %v2033_v33, %s2886_s24 }
0x3b5b   :  { %v2042_v34 = vpop.permute.xlu2 %2041 }
0x3b5c   :  { %2571 = vmatmul.msk.f32.vlgmr.msra.gmra.mxu3 %vm247_vm8, %v2042_v34 }
0x3bdf   :  { %v2062_v39 = vpop.f32.mrf.mxu3 }
0x3be0   :  { %v2065_v28 = vadd.f32 %v2062_v39, %v2039_v38 }
0x3be2   :  { %2801 = vtanh.f32 %v2065_v28  ;;  %v2572_v40 = vmul.f32 -1.442695, %v2065_v28 }
0x3be4   :  { %2803 = vpow2.f32 %v2572_v40 }
0x3be8   :  { %v2802_v29 = vpop.eup %2801 }
0x3be9   :  { %2088 = vrot.lane.b32.xlu0 %v2802_v29, %s2885_s4 }
0x3bea   :  { %v2804_v31 = vpop.eup %2803 }
0x3beb   :  { %v2069_v41 = vadd.f32 1.0, %v2804_v31 }
0x3bed   :  { %2805 = vrcp.f32 %v2069_v41  ;;  %v2081_v47 = vand.u32 2147483648, %v2069_v41  ;;  %vm2075_vm12 = vweird.f32 %v2069_v41  ;;  %v2079_v48 = vand.u32 2147483647, %v2069_v41 }
0x3bef   :  { %v2082_v50 = vor.u32 1.1754944e-38, %v2081_v47  ;;  %vm2080_vm14 = vcmp.eq.f32.partialorder %v2079_v48, 8.507059e+37 }
0x3bf3   :  { %v2806_v42 = vpop.eup %2805 }
0x3bf4   :  { %v2071_v43 = vmul.f32 %v2806_v42, %v2069_v41  ;;  %vm2076_vm11 = vweird.f32 %v2806_v42 }
0x3bf5   :  { %vm2077_vm13 = vmor %vm2075_vm12, %vm2076_vm11 }
0x3bf6   :  { %v2072_v44 = vsub.f32 1.0, %v2071_v43 }
0x3bf8   :  { %v2073_v45 = vmul.f32 %v2806_v42, %v2072_v44 }
0x3bfa   :  { %v2074_v46 = vadd.f32 %v2806_v42, %v2073_v45 }
0x3bfc   :  { %v2078_v49 = vsel %vm2077_vm13, %v2806_v42, %v2074_v46 }
0x3bfd   :  { %v2083_v52 = vsel %vm2080_vm14, %v2082_v50, %v2078_v49 }
0x3bfe   :  { %v2086_v26 = vmul.f32 %v2083_v52, %v2027_v27  ;;  %v2175_v27 = vrot.slane %v2173_v25, 7 }
0x3c00   :  { %v2177_v32 = vsel %vm245_vm3, %v2172_v30, %v2175_v27 }
0x3c5b   :  { %v2089_v51 = vpop.permute.xlu0 %2088 }
0x3c5c   :  { %v2091_v53 = vmul.f32 %v2089_v51, %v2083_v52 }
0x3c5e   :  { %2093 = vrot.lane.b32.xlu1 %v2091_v53, %s2886_s24 }
0x3cd0   :  { %v2094_v54 = vpop.permute.xlu1 %2093 }
0x3cd1   :  { %v2096_v55 = vadd.f32 %v2094_v54, %v2086_v26  ;;  %v2242_v54 = vld [vmem:[#allocation2 + $0x3d] sm:$0x1] }
0x3cd3   :  { %2807 = vtanh.f32 %v2096_v55 }
0x3cd9   :  { %v2808_v59 = vpop.eup %2807 }
0x3cda   :  { %2099 = vrot.lane.b32.xlu2 %v2808_v59, %s2885_s4  ;;  %v2241_v59 = vld [vmem:[#allocation2 + $0x1d] sm:$0x1] }
0x3d34   :  { %v2100_v60 = vpop.permute.xlu2 %2099 }
0x3d35   :  { %v2102_v61 = vmul.f32 %v2100_v60, %v2083_v52 }
0x3d37   :  { %2110 = vrot.lane.b32.xlu0 %v2102_v61, %s2886_s24 }
0x3da9   :  { %v2111_v62 = vpop.permute.xlu0 %2110 }
0x3daa   :  { %2573 = vmatmul.msk.f32.vlgmr.msra.gmra.mxu0 %vm247_vm8, %v2111_v62 }
0x3e27   :  { %v2131_v3 = vpop.f32.mrf.mxu0 }
0x3e28   :  { %v2134_v4 = vadd.f32 %v2131_v3, %v2108_v2 }
0x3e2a   :  { %2809 = vtanh.f32 %v2134_v4  ;;  %v2574_v5 = vmul.f32 -1.442695, %v2134_v4 }
0x3e2c   :  { %2811 = vpow2.f32 %v2574_v5 }
0x3e30   :  { %v2810_v23 = vpop.eup %2809 }
0x3e31   :  { %2157 = vrot.lane.b32.xlu1 %v2810_v23, %s2885_s4 }
0x3e32   :  { %v2812_v6 = vpop.eup %2811 }
0x3e33   :  { %v2138_v7 = vadd.f32 1.0, %v2812_v6 }
0x3e35   :  { %2813 = vrcp.f32 %v2138_v7  ;;  %v2150_v14 = vand.u32 2147483648, %v2138_v7  ;;  %vm2144_vm0 = vweird.f32 %v2138_v7  ;;  %v2148_v15 = vand.u32 2147483647, %v2138_v7 }
0x3e37   :  { %v2151_v17 = vor.u32 1.1754944e-38, %v2150_v14  ;;  %vm2149_vm2 = vcmp.eq.f32.partialorder %v2148_v15, 8.507059e+37 }
0x3e3b   :  { %v2814_v8 = vpop.eup %2813 }
0x3e3c   :  { %v2140_v9 = vmul.f32 %v2814_v8, %v2138_v7  ;;  %vm2145_vm15 = vweird.f32 %v2814_v8 }
0x3e3d   :  { %vm2146_vm1 = vmor %vm2144_vm0, %vm2145_vm15 }
0x3e3e   :  { %v2141_v10 = vsub.f32 1.0, %v2140_v9 }
0x3e40   :  { %v2142_v11 = vmul.f32 %v2814_v8, %v2141_v10 }
0x3e42   :  { %v2143_v13 = vadd.f32 %v2814_v8, %v2142_v11 }
0x3e44   :  { %v2147_v16 = vsel %vm2146_vm1, %v2814_v8, %v2143_v13 }
0x3e45   :  { %v2152_v19 = vsel %vm2149_vm2, %v2151_v17, %v2147_v16 }
0x3e46   :  { %v2155_v12 = vmul.f32 %v2152_v19, %v2096_v55  ;;  %v2244_v55 = vrot.slane %v2242_v54, 7 }
0x3e48   :  { %v2246_v60 = vsel %vm245_vm3, %v2241_v59, %v2244_v55 }
0x3ea3   :  { %v2158_v18 = vpop.permute.xlu1 %2157 }
0x3ea4   :  { %v2160_v20 = vmul.f32 %v2158_v18, %v2152_v19 }
0x3ea6   :  { %2162 = vrot.lane.b32.xlu2 %v2160_v20, %s2886_s24 }
0x3f00   :  { %v2163_v21 = vpop.permute.xlu2 %2162 }
0x3f01   :  { %v2165_v22 = vadd.f32 %v2163_v21, %v2155_v12  ;;  %v2311_v21 = vld [vmem:[#allocation2 + $0x3e] sm:$0x1] }
0x3f03   :  { %2815 = vtanh.f32 %v2165_v22 }
0x3f09   :  { %v2816_v56 = vpop.eup %2815 }
0x3f0a   :  { %2168 = vrot.lane.b32.xlu0 %v2816_v56, %s2885_s4  ;;  %v2310_v56 = vld [vmem:[#allocation2 + $0x1e] sm:$0x1] }
0x3f7c   :  { %v2169_v57 = vpop.permute.xlu0 %2168 }
0x3f7d   :  { %v2171_v24 = vmul.f32 %v2169_v57, %v2152_v19 }
0x3f7f   :  { %2179 = vrot.lane.b32.xlu1 %v2171_v24, %s2886_s24 }
0x3ff1   :  { %v2180_v58 = vpop.permute.xlu1 %2179 }
0x3ff2   :  { %2575 = vmatmul.msk.f32.vlgmr.msra.gmra.mxu1 %vm247_vm8, %v2180_v58 }
0x406f   :  { %v2200_v33 = vpop.f32.mrf.mxu1 }
0x4070   :  { %v2203_v34 = vadd.f32 %v2200_v33, %v2177_v32 }
0x4072   :  { %2817 = vtanh.f32 %v2203_v34  ;;  %v2576_v36 = vmul.f32 -1.442695, %v2203_v34 }
0x4074   :  { %2819 = vpow2.f32 %v2576_v36 }
0x4078   :  { %v2818_v35 = vpop.eup %2817 }
0x4079   :  { %2226 = vrot.lane.b32.xlu2 %v2818_v35, %s2885_s4 }
0x407a   :  { %v2820_v37 = vpop.eup %2819 }
0x407b   :  { %v2207_v38 = vadd.f32 1.0, %v2820_v37 }
0x407d   :  { %2821 = vrcp.f32 %v2207_v38  ;;  %v2219_v41 = vand.u32 2147483648, %v2207_v38  ;;  %vm2213_vm5 = vweird.f32 %v2207_v38  ;;  %v2217_v42 = vand.u32 2147483647, %v2207_v38 }
0x407f   :  { %v2220_v44 = vor.u32 1.1754944e-38, %v2219_v41  ;;  %vm2218_vm7 = vcmp.eq.f32.partialorder %v2217_v42, 8.507059e+37 }
0x4083   :  { %v2822_v39 = vpop.eup %2821 }
0x4084   :  { %v2209_v28 = vmul.f32 %v2822_v39, %v2207_v38  ;;  %vm2214_vm4 = vweird.f32 %v2822_v39 }
0x4085   :  { %vm2215_vm6 = vmor %vm2213_vm5, %vm2214_vm4  ;;  %vm2481_vm5 = vcmask 33792  }
0x4086   :  { %v2210_v29 = vsub.f32 1.0, %v2209_v28 }
0x4088   :  { %v2211_v40 = vmul.f32 %v2822_v39, %v2210_v29 }
0x408a   :  { %v2212_v31 = vadd.f32 %v2822_v39, %v2211_v40 }
0x408c   :  { %v2216_v43 = vsel %vm2215_vm6, %v2822_v39, %v2212_v31 }
0x408d   :  { %v2221_v46 = vsel %vm2218_vm7, %v2220_v44, %v2216_v43 }
0x408e   :  { %v2224_v48 = vmul.f32 %v2221_v46, %v2165_v22  ;;  %v2313_v22 = vrot.slane %v2311_v21, 7 }
0x4090   :  { %v2315_v57 = vsel %vm245_vm3, %v2310_v56, %v2313_v22 }
0x40d3   :  { %v2227_v45 = vpop.permute.xlu2 %2226 }
0x40d4   :  { %v2229_v47 = vmul.f32 %v2227_v45, %v2221_v46 }
0x40d6   :  { %2231 = vrot.lane.b32.xlu0 %v2229_v47, %s2886_s24 }
0x4148   :  { %v2232_v49 = vpop.permute.xlu0 %2231 }
0x4149   :  { %v2234_v50 = vadd.f32 %v2232_v49, %v2224_v48  ;;  %v2380_v49 = vld [vmem:[#allocation2 + $0x3f] sm:$0x1] }
0x414b   :  { %2823 = vtanh.f32 %v2234_v50 }
0x4151   :  { %v2824_v51 = vpop.eup %2823 }
0x4152   :  { %2237 = vrot.lane.b32.xlu1 %v2824_v51, %s2885_s4  ;;  %v2379_v51 = vld [vmem:[#allocation2 + $0x1f] sm:$0x1] }
0x41c4   :  { %v2238_v52 = vpop.permute.xlu1 %2237 }
0x41c5   :  { %v2240_v53 = vmul.f32 %v2238_v52, %v2221_v46 }
0x41c7   :  { %2248 = vrot.lane.b32.xlu2 %v2240_v53, %s2886_s24 }
0x4221   :  { %v2249_v26 = vpop.permute.xlu2 %2248 }
0x4222   :  { %2577 = vmatmul.msk.f32.vlgmr.msrb.gmra.mxu2 %vm247_vm8, %v2249_v26 }
0x42a5   :  { %v2269_v61 = vpop.f32.mrf.mxu2 }
0x42a6   :  { %v2272_v62 = vadd.f32 %v2269_v61, %v2246_v60 }
0x42a8   :  { %2825 = vtanh.f32 %v2272_v62  ;;  %v2578_v0 = vmul.f32 -1.442695, %v2272_v62 }
0x42aa   :  { %2827 = vpow2.f32 %v2578_v0 }
0x42ae   :  { %v2826_v63 = vpop.eup %2825 }
0x42af   :  { %2295 = vrot.lane.b32.xlu0 %v2826_v63, %s2885_s4 }
0x42b0   :  { %v2828_v1 = vpop.eup %2827 }
0x42b1   :  { %v2276_v2 = vadd.f32 1.0, %v2828_v1 }
0x42b3   :  { %2829 = vrcp.f32 %v2276_v2  ;;  %v2288_v7 = vand.u32 2147483648, %v2276_v2  ;;  %vm2282_vm10 = vweird.f32 %v2276_v2  ;;  %v2286_v8 = vand.u32 2147483647, %v2276_v2 }
0x42b5   :  { %v2289_v10 = vor.u32 1.1754944e-38, %v2288_v7  ;;  %vm2287_vm12 = vcmp.eq.f32.partialorder %v2286_v8, 8.507059e+37 }
0x42b9   :  { %v2830_v3 = vpop.eup %2829 }
0x42ba   :  { %v2278_v4 = vmul.f32 %v2830_v3, %v2276_v2  ;;  %vm2283_vm9 = vweird.f32 %v2830_v3 }
0x42bb   :  { %vm2284_vm11 = vmor %vm2282_vm10, %vm2283_vm9 }
0x42bc   :  { %v2279_v23 = vsub.f32 1.0, %v2278_v4 }
0x42be   :  { %v2280_v5 = vmul.f32 %v2830_v3, %v2279_v23 }
0x42c0   :  { %v2281_v6 = vadd.f32 %v2830_v3, %v2280_v5 }
0x42c2   :  { %v2285_v9 = vsel %vm2284_vm11, %v2830_v3, %v2281_v6 }
0x42c3   :  { %v2290_v13 = vsel %vm2287_vm12, %v2289_v10, %v2285_v9 }
0x42c4   :  { %v2293_v15 = vmul.f32 %v2290_v13, %v2234_v50  ;;  %v2382_v50 = vrot.slane %v2380_v49, 7 }
0x42c6   :  { %v2384_v52 = vsel %vm245_vm3, %v2379_v51, %v2382_v50 }
0x4321   :  { %v2296_v11 = vpop.permute.xlu0 %2295 }
0x4322   :  { %v2298_v14 = vmul.f32 %v2296_v11, %v2290_v13 }
0x4324   :  { %2300 = vrot.lane.b32.xlu1 %v2298_v14, %s2886_s24  ;;  %v2450_v14 = vld [vmem:[%s3401_s6 + $0x10] sm:$0xff] }
0x4396   :  { %v2301_v16 = vpop.permute.xlu1 %2300 }
0x4397   :  { %v2303_v17 = vadd.f32 %v2301_v16, %v2293_v15  ;;  %v2449_v15 = vld [vmem:[%s3401_s6 + $0x8] sm:$0xff]  ;;  %v2448_v16 = vld [vmem:[%s3401_s6] sm:$0xff] }
0x4399   :  { %2831 = vtanh.f32 %v2303_v17 }
0x439f   :  { %v2832_v18 = vpop.eup %2831 }
0x43a0   :  { %2306 = vrot.lane.b32.xlu2 %v2832_v18, %s2885_s4 }
0x43fa   :  { %v2307_v19 = vpop.permute.xlu2 %2306 }
0x43fb   :  { %v2309_v20 = vmul.f32 %v2307_v19, %v2290_v13  ;;  %v2451_v13 = vld [vmem:[%s3401_s6 + $0x18] sm:$0xff] }
0x43fc   :  { %2473 = vmatpush.msrb.mxu1 %v2451_v13 }
0x43fd   :  { %2317 = vrot.lane.b32.xlu0 %v2309_v20, %s2886_s24  ;;  %v2592_v20 = vld [vmem:[%s3402_s7] ss:$0 sm:$0xff] }
0x43fe   :  { %2474 = vmatpush.msrb.mxu1 %v2450_v14 }
0x4400   :  { %2475 = vmatpush.msrb.mxu1 %v2449_v15 }
0x4402   :  { %2476 = vmatpush.msrb.mxu1 %v2448_v16 }
0x446f   :  { %v2318_v12 = vpop.permute.xlu0 %2317 }
0x4470   :  { %2579 = vmatmul.msk.f32.vlgmr.msrb.gmra.mxu3 %vm247_vm8, %v2318_v12 }
0x44f3   :  { %v2338_v24 = vpop.f32.mrf.mxu3 }
0x44f4   :  { %v2341_v58 = vadd.f32 %v2338_v24, %v2315_v57 }
0x44f6   :  { %2833 = vtanh.f32 %v2341_v58  ;;  %v2580_v27 = vmul.f32 -1.442695, %v2341_v58 }
0x44f8   :  { %2835 = vpow2.f32 %v2580_v27 }
0x44fc   :  { %v2834_v25 = vpop.eup %2833 }
0x44fd   :  { %2364 = vrot.lane.b32.xlu1 %v2834_v25, %s2885_s4 }
0x44fe   :  { %v2836_v30 = vpop.eup %2835 }
0x44ff   :  { %v2345_v32 = vadd.f32 1.0, %v2836_v30 }
0x4501   :  { %2837 = vrcp.f32 %v2345_v32  ;;  %v2357_v38 = vand.u32 2147483648, %v2345_v32  ;;  %vm2351_vm14 = vweird.f32 %v2345_v32  ;;  %v2355_v39 = vand.u32 2147483647, %v2345_v32 }
0x4503   :  { %v2358_v29 = vor.u32 1.1754944e-38, %v2357_v38  ;;  %vm2356_vm0 = vcmp.eq.f32.partialorder %v2355_v39, 8.507059e+37 }
0x4507   :  { %v2838_v33 = vpop.eup %2837 }
0x4508   :  { %v2347_v34 = vmul.f32 %v2838_v33, %v2345_v32  ;;  %vm2352_vm13 = vweird.f32 %v2838_v33 }
0x4509   :  { %vm2353_vm15 = vmor %vm2351_vm14, %vm2352_vm13 }
0x450a   :  { %v2348_v35 = vsub.f32 1.0, %v2347_v34 }
0x450c   :  { %v2349_v36 = vmul.f32 %v2838_v33, %v2348_v35 }
0x450e   :  { %v2350_v37 = vadd.f32 %v2838_v33, %v2349_v36 }
0x4510   :  { %v2354_v28 = vsel %vm2353_vm15, %v2838_v33, %v2350_v37 }
0x4511   :  { %v2359_v31 = vsel %vm2356_vm0, %v2358_v29, %v2354_v28 }
0x4512   :  { %v2362_v42 = vmul.f32 %v2359_v31, %v2303_v17 }
0x456f   :  { %v2365_v40 = vpop.permute.xlu1 %2364 }
0x4570   :  { %v2367_v41 = vmul.f32 %v2365_v40, %v2359_v31 }
0x4572   :  { %2369 = vrot.lane.b32.xlu2 %v2367_v41, %s2886_s24 }
0x45cc   :  { %v2370_v43 = vpop.permute.xlu2 %2369 }
0x45cd   :  { %v2372_v44 = vadd.f32 %v2370_v43, %v2362_v42 }
0x45cf   :  { %2839 = vtanh.f32 %v2372_v44 }
0x45d5   :  { %v2840_v45 = vpop.eup %2839 }
0x45d6   :  { %2375 = vrot.lane.b32.xlu0 %v2840_v45, %s2885_s4 }
0x4648   :  { %v2376_v46 = vpop.permute.xlu0 %2375 }
0x4649   :  { %v2378_v47 = vmul.f32 %v2376_v46, %v2359_v31 }
0x464b   :  { %2386 = vrot.lane.b32.xlu1 %v2378_v47, %s2886_s24 }
0x46bd   :  { %v2387_v48 = vpop.permute.xlu1 %2386 }
0x46be   :  { %2581 = vmatmul.msk.f32.vlgmr.msrb.gmra.mxu0 %vm247_vm8, %v2387_v48 }
0x473b   :  { %v2407_v53 = vpop.f32.mrf.mxu0 }
0x473c   :  { %v2410_v26 = vadd.f32 %v2407_v53, %v2384_v52 }
0x473e   :  { %2841 = vtanh.f32 %v2410_v26  ;;  %v2582_v55 = vmul.f32 -1.442695, %v2410_v26 }
0x4740   :  { %2843 = vpow2.f32 %v2582_v55 }
0x4744   :  { %v2842_v54 = vpop.eup %2841 }
0x4745   :  { %2433 = vrot.lane.b32.xlu2 %v2842_v54, %s2885_s4 }
0x4746   :  { %v2844_v59 = vpop.eup %2843 }
0x4747   :  { %v2414_v60 = vadd.f32 1.0, %v2844_v59 }
0x4749   :  { %2845 = vrcp.f32 %v2414_v60  ;;  %v2426_v2 = vand.u32 2147483648, %v2414_v60  ;;  %vm2420_vm2 = vweird.f32 %v2414_v60  ;;  %v2424_v3 = vand.u32 2147483647, %v2414_v60 }
0x474b   :  { %v2427_v23 = vor.u32 1.1754944e-38, %v2426_v2  ;;  %vm2425_vm4 = vcmp.eq.f32.partialorder %v2424_v3, 8.507059e+37 }
0x474f   :  { %v2846_v61 = vpop.eup %2845 }
0x4750   :  { %v2416_v62 = vmul.f32 %v2846_v61, %v2414_v60  ;;  %vm2421_vm1 = vweird.f32 %v2846_v61 }
0x4751   :  { %vm2422_vm3 = vmor %vm2420_vm2, %vm2421_vm1 }
0x4752   :  { %v2417_v63 = vsub.f32 1.0, %v2416_v62 }
0x4754   :  { %v2418_v0 = vmul.f32 %v2846_v61, %v2417_v63 }
0x4756   :  { %v2419_v1 = vadd.f32 %v2846_v61, %v2418_v0 }
0x4758   :  { %v2423_v4 = vsel %vm2422_vm3, %v2846_v61, %v2419_v1 }
0x4759   :  { %v2428_v6 = vsel %vm2425_vm4, %v2427_v23, %v2423_v4 }
0x475a   :  { %v2431_v8 = vmul.f32 %v2428_v6, %v2372_v44 }
0x479f   :  { %v2434_v5 = vpop.permute.xlu2 %2433 }
0x47a0   :  { %v2436_v7 = vmul.f32 %v2434_v5, %v2428_v6 }
0x47a2   :  { %2438 = vrot.lane.b32.xlu0 %v2436_v7, %s2886_s24 }
0x4814   :  { %v2439_v9 = vpop.permute.xlu0 %2438 }
0x4815   :  { %v2441_v10 = vadd.f32 %v2439_v9, %v2431_v8 }
0x4817   :  { %2847 = vtanh.f32 %v2441_v10 }
0x481d   :  { %v2848_v11 = vpop.eup %2847 }
0x481e   :  { %2444 = vrot.lane.b32.xlu1 %v2848_v11, %s2885_s4  ;;  %s2887_s4 = smov [#allocation3]  }
0x481f   :  { %s2488_s25 = sshll.u32 %s2887_s4, 4  ;;  %s2489_s25 = int_to_ptr.vmem [resolvable:$true] %s2488_s25 }
0x4890   :  { %v2445_v17 = vpop.permute.xlu1 %2444 }
0x4891   :  { %v2447_v18 = vmul.f32 %v2445_v17, %v2428_v6 }
0x4893   :  { %2457 = vrot.lane.b32.xlu2 %v2447_v18, %s2886_s24 }
0x48ed   :  { %v2458_v19 = vpop.permute.xlu2 %2457 }
0x48ee   :  { %2583 = vmatmul.msk.f32.vlgmr.msrb.gmra.mxu1 %vm247_vm8, %v2458_v19 }
0x496b   :  { %v2478_v12 = vpop.f32.mrf.mxu1 }
0x496c   :  { %v2479_v21 = vadd.f32 %v2592_v20, %v2478_v12 }
0x496e   :  { %2482 = vst.msk [vmem:[#allocation3] sm:$0x3] %vm2481_vm5, %v2479_v21 }
0x496f   :  { %2493 = dma.vmem_to_hbm [thread:$0]  %s2489_s25, 32, %s2491_s2, [#allocation4]  }
0x4970   :  { %2881 = dma.done.wait [#allocation4], 32  }
0x4971   :  { %2882 = vsyncadd [#allocation4], 4294967264 }
0x4972   :  { %2498 = vsyncpa [#allocation4], 1 }

</bundles_post_ra>
